<compile_context>
chip_gen: v6e
topology: v6e:2x2x1
jax: 0.10.0
libtpu: 0.0.40
codegen_flags: <defaults>
</compile_context>

<pallas_src>
import functools

import jax
import jax.numpy as jnp
import numpy as np
from jax.experimental import pallas as pl
from jax.experimental.pallas import tpu as pltpu


# ----------------------------------------------------------------------------
# Pallas kernel: full MPNN forward for ONE graph of the batch (one grid step).
# ----------------------------------------------------------------------------
def mpnn_kernel(x_ref, e_ref, src_oh_ref, dst_oh_ref, idx_oh_ref,
                wproj_ref, bproj_ref,
                we1_ref, be1_ref, we2_ref, be2_ref, bnn_ref,
                wir_ref, wiz_ref, win_ref, bir_ref, biz_ref, bin_ref,
                whr_ref, whz_ref, whn_ref, bhr_ref, bhz_ref, bhn_ref,
                tile_ref, sum_ref,
                out_ref, *, num_steps):
    f32 = jnp.float32
    bf16 = jnp.bfloat16
    V = x_ref.shape[0]
    H = wproj_ref.shape[1]

    # ---- hoisted, loop-invariant loads & bias broadcasts (read refs once) ----
    src_oh = src_oh_ref[...]                      # (E, V)  bf16 gather operator
    dst_oh = dst_oh_ref[...]                      # (V, E)  bf16 scatter operator
    w_ir, w_iz, w_in = wir_ref[...], wiz_ref[...], win_ref[...]   # (H, H) each
    w_hr, w_hz, w_hn = whr_ref[...], whz_ref[...], whn_ref[...]
    tile_mat = tile_ref[...]                      # (H, H*H) 0/1 bf16, lane replicate
    sum_mat = sum_ref[...]                        # (H*H, H) 0/1 bf16, block lane-sum

    b_nn = jnp.broadcast_to(bnn_ref[...], (V, H))
    b_r = jnp.broadcast_to(bir_ref[...] + bhr_ref[...], (V, H))
    b_z = jnp.broadcast_to(biz_ref[...] + bhz_ref[...], (V, H))
    b_in = jnp.broadcast_to(bin_ref[...], (V, H))
    b_hn = jnp.broadcast_to(bhn_ref[...], (V, H))

    # ---- project_node_feats: Linear + ReLU ----
    h0 = jnp.maximum(
        jnp.dot(x_ref[...], wproj_ref[...], preferred_element_type=f32)
        + bproj_ref[...], 0.0)                    # (V, H) f32

    # ---- NNConv edge network (Linear -> ReLU -> Linear), computed once ----
    # w_flat[e, o*H + i] == W_e[i, o]  (w_e2 / b_e2 columns were permuted to
    # out-major in the wrapper), kept 2-D and lane-dense: no (E, H, H) reshape
    # / relayout is ever materialised.
    e_hid = jnp.maximum(
        jnp.dot(e_ref[...], we1_ref[...], preferred_element_type=f32)
        + be1_ref[...], 0.0)
    w_flat = jnp.dot(e_hid.astype(bf16), we2_ref[...],
                     preferred_element_type=f32) + be2_ref[...]   # (E, H*H) f32

    # ---- message passing + single-step GRU ----
    def step(_, hidden):
        # gather source-node features per edge: bf16 one-hot matmul, f32 acc
        h_src = jnp.dot(src_oh, hidden.astype(bf16),
                        preferred_element_type=f32)               # (E, H)
        # per-edge message m_e[o] = sum_i h_u[i] * W_e[i, o]:
        #   replicate h_src along the H*H lane axis (0/1 bf16 matmul, MXU),
        #   lane-dense f32 VPU multiply with w_flat,
        #   block-sum groups of H lanes (0/1 bf16 matmul, MXU, f32 acc).
        h_rep = jnp.dot(h_src.astype(bf16), tile_mat,
                        preferred_element_type=f32)                    # (E, H*H)
        msgs = jnp.dot((h_rep * w_flat).astype(bf16), sum_mat,
                       preferred_element_type=f32)                     # (E, H)
        # scatter-sum to destination nodes + NNConv bias + ReLU
        m = jnp.maximum(
            jnp.dot(dst_oh, msgs.astype(bf16), preferred_element_type=f32)
            + b_nn, 0.0)                                               # (V, H)
        # single-step GRU, per-gate lane-aligned matmuls (PyTorch order r,z,n)
        r = jax.nn.sigmoid(jnp.dot(m, w_ir, preferred_element_type=f32)
                           + jnp.dot(hidden, w_hr, preferred_element_type=f32)
                           + b_r)
        z = jax.nn.sigmoid(jnp.dot(m, w_iz, preferred_element_type=f32)
                           + jnp.dot(hidden, w_hz, preferred_element_type=f32)
                           + b_z)
        n = jnp.tanh(jnp.dot(m, w_in, preferred_element_type=f32) + b_in
                     + r * (jnp.dot(hidden, w_hn, preferred_element_type=f32)
                            + b_hn))
        return (1.0 - z) * n + z * hidden

    hidden = jax.lax.fori_loop(0, num_steps, step, h0, unroll=True)

    # node_feats[idx] for this graph's selected atoms
    out_ref[...] = jnp.dot(idx_oh_ref[...], hidden.astype(bf16),
                           preferred_element_type=f32)


# ----------------------------------------------------------------------------
# Wrapper: one-time parameter layout plumbing + pallas_call over a graph grid.
# ----------------------------------------------------------------------------
def mpnn_atom_embedder(x, e, src_oh, dst_oh, idx_oh, params, num_steps):
    """x:(G,V,Fn) e:(G,E,Fe) src_oh:(G,E,V) dst_oh:(G,V,E) idx_oh:(G,Kg,V)."""
    f32, bf16 = jnp.float32, jnp.bfloat16
    G, V, _ = x.shape
    KG = idx_oh.shape[1]
    H = params["w_proj"].shape[1]

    # Permute the edge-network output columns from in-major (PyTorch
    # .view(E, in, out): flat index i*H+o) to out-major (o*H+i) so the
    # per-edge weights can stay a 2-D lane-dense (E, H*H) array in-kernel.
    perm = jnp.arange(H * H).reshape(H, H).T.reshape(-1)
    w_e2 = params["w_e2"][:, perm].astype(bf16)
    b_e2 = params["b_e2"][:, perm].astype(f32)

    # Split GRU weights/biases into per-gate (H, H) / (1, H) blocks.
    def split3(a):
        return a[..., :H], a[..., H:2 * H], a[..., 2 * H:]
    w_ir, w_iz, w_in = split3(params["w_ih"].astype(f32))
    w_hr, w_hz, w_hn = split3(params["w_hh"].astype(f32))
    b_ir, b_iz, b_in = split3(params["b_ih"].astype(f32))
    b_hr, b_hz, b_hn = split3(params["b_hh"].astype(f32))

    # Constant 0/1 matrices expressing the per-edge contraction as lane-dense
    # matmuls: tile_mat replicates h_src across the H*H lane axis, sum_mat
    # block-sums groups of H lanes back to H outputs.  0/1 is exact in bf16,
    # so these ride the native bf16 MXU path.
    tile_mat = jnp.tile(jnp.eye(H, dtype=f32), (1, H)).astype(bf16)       # (H, H*H)
    sum_mat = jnp.repeat(jnp.eye(H, dtype=f32), H, axis=0).astype(bf16)   # (H*H, H)

    graph_args = (x.astype(f32), e.astype(f32),
                  src_oh.astype(bf16), dst_oh.astype(bf16), idx_oh.astype(bf16))
    param_args = (params["w_proj"].astype(f32), params["b_proj"].astype(f32),
                  params["w_e1"].astype(f32), params["b_e1"].astype(f32),
                  w_e2, b_e2, params["b_nn"].astype(f32),
                  w_ir, w_iz, w_in, b_ir, b_iz, b_in,
                  w_hr, w_hz, w_hn, b_hr, b_hz, b_hn,
                  tile_mat, sum_mat)

    def graph_spec(a):          # blocked over the graph axis, rest full
        return pl.BlockSpec((None,) + a.shape[1:], lambda g: (g, 0, 0))

    def param_spec(a):          # whole (2-D) parameter resident every step
        return pl.BlockSpec(a.shape, lambda g: (0, 0))

    in_specs = ([graph_spec(a) for a in graph_args]
                + [param_spec(a) for a in param_args])
    out_spec = pl.BlockSpec((None, KG, H), lambda g: (g, 0, 0))

    # Per-generation VMEM budget: ~3/4 of physical (96 MiB v5e/v6e, 48 MiB v7x).
    try:
        phys = pltpu.get_tpu_info().vmem_capacity_bytes
        vmem_limit = int(min(100 * 1024 * 1024, phys * 3 // 4))
    except Exception:  # pragma: no cover - defensive fallback
        vmem_limit = 48 * 1024 * 1024

    out = pl.pallas_call(
        functools.partial(mpnn_kernel, num_steps=num_steps),
        out_shape=jax.ShapeDtypeStruct((G, KG, H), f32),
        grid=(G,),
        in_specs=in_specs,
        out_specs=out_spec,
        compiler_params=pltpu.CompilerParams(
            dimension_semantics=("parallel",),
            vmem_limit_bytes=vmem_limit),
    )(*graph_args, *param_args)
    return out.reshape(G * KG, H)


# ----------------------------------------------------------------------------
# Pure-JAX f32 reference on the globally-batched graph (same math as module).
# ----------------------------------------------------------------------------
def mpnn_reference(x, e, src_oh, dst_oh, idx_oh, p, num_steps):
    H = p["w_proj"].shape[1]
    h = jax.nn.relu(x @ p["w_proj"] + p["b_proj"])
    hidden = h
    e_hid = jax.nn.relu(e @ p["w_e1"] + p["b_e1"])
    w_e = (e_hid @ p["w_e2"] + p["b_e2"]).reshape(e.shape[0], H, H)
    for _ in range(num_steps):
        h_src = src_oh @ h
        msgs = jnp.einsum("ei,eio->eo", h_src, w_e)
        m = jax.nn.relu(dst_oh @ msgs + p["b_nn"])
        gi = m @ p["w_ih"] + p["b_ih"]
        gh = hidden @ p["w_hh"] + p["b_hh"]
        r = jax.nn.sigmoid(gi[:, :H] + gh[:, :H])
        z = jax.nn.sigmoid(gi[:, H:2 * H] + gh[:, H:2 * H])
        n = jnp.tanh(gi[:, 2 * H:] + r * gh[:, 2 * H:])
        hidden = (1.0 - z) * n + z * hidden
        h = hidden
    return idx_oh @ h


if __name__ == "__main__":
    # Small synthetic sizes consistent with the module's forward.
    G = 2                      # graphs in the batch (grid / parallel axis)
    V, E = 16, 32              # nodes / edges per graph
    NODE_IN, EDGE_IN = 16, 8   # ndata['x'], edata['edge_attr'] feature dims
    H, EH = 32, 32             # node_out_feats, edge_hidden_feats
    NUM_STEPS = 3              # num_step_message_passing (small for the demo)
    KG = 4                     # selected atoms per graph (len(idx) == G * KG)

    key = jax.random.PRNGKey(0)
    ks = jax.random.split(key, 16)

    x = jax.random.normal(ks[0], (G, V, NODE_IN), jnp.float32)
    e = jax.random.normal(ks[1], (G, E, EDGE_IN), jnp.float32)
    src = jax.random.randint(ks[2], (G, E), 0, V)
    dst = jax.random.randint(ks[3], (G, E), 0, V)
    idx_local = jnp.array([[0, 3, 5, 7], [1, 4, 9, 15]], jnp.int32)   # (G, KG)

    # Dense one-hot gather/scatter operators per graph (graph glue, plain JAX).
    src_oh = jax.nn.one_hot(src, V, dtype=jnp.float32)                  # (G,E,V)
    dst_oh = jnp.swapaxes(jax.nn.one_hot(dst, V, dtype=jnp.float32), 1, 2)  # (G,V,E)
    idx_oh = jax.nn.one_hot(idx_local, V, dtype=jnp.float32)            # (G,KG,V)

    s = 0.1  # deterministic small-scale init
    params = {
        "w_proj": s * jax.random.normal(ks[4], (NODE_IN, H), jnp.float32),
        "b_proj": s * jax.random.normal(ks[5], (1, H), jnp.float32),
        "w_e1":   s * jax.random.normal(ks[6], (EDGE_IN, EH), jnp.float32),
        "b_e1":   s * jax.random.normal(ks[7], (1, EH), jnp.float32),
        "w_e2":   s * jax.random.normal(ks[8], (EH, H * H), jnp.float32),
        "b_e2":   s * jax.random.normal(ks[9], (1, H * H), jnp.float32),
        "b_nn":   s * jax.random.normal(ks[10], (1, H), jnp.float32),
        "w_ih":   s * jax.random.normal(ks[11], (H, 3 * H), jnp.float32),
        "b_ih":   s * jax.random.normal(ks[12], (1, 3 * H), jnp.float32),
        "w_hh":   s * jax.random.normal(ks[13], (H, 3 * H), jnp.float32),
        "b_hh":   s * jax.random.normal(ks[14], (1, 3 * H), jnp.float32),
    }

    out = mpnn_atom_embedder(x, e, src_oh, dst_oh, idx_oh, params, NUM_STEPS)
    out = jax.block_until_ready(out)

    # Reference: build the single dgl.batch-style block-diagonal graph in f32.
    offs = (jnp.arange(G, dtype=jnp.int32) * V)[:, None]
    x_g = x.reshape(G * V, NODE_IN)
    e_g = e.reshape(G * E, EDGE_IN)
    src_g = (src + offs).reshape(-1)
    dst_g = (dst + offs).reshape(-1)
    idx_g = (idx_local + offs).reshape(-1)
    src_oh_g = jax.nn.one_hot(src_g, G * V, dtype=jnp.float32)
    dst_oh_g = jax.nn.one_hot(dst_g, G * V, dtype=jnp.float32).T
    idx_oh_g = jax.nn.one_hot(idx_g, G * V, dtype=jnp.float32)
    ref = mpnn_reference(x_g, e_g, src_oh_g, dst_oh_g, idx_oh_g, params, NUM_STEPS)
    ref = jax.block_until_ready(ref)

    assert out.shape == (G * KG, H) and out.dtype == jnp.float32
    # Tolerance accommodates the intentional bf16 MXU operands in the kernel.
    np.testing.assert_allclose(np.asarray(out), np.asarray(ref),
                               rtol=5e-2, atol=5e-2)
    print("KERNEL_OK")
</pallas_src>

<mosaic_0001>
module attributes {stable_mosaic.version = 11 : i64} {
  func.func @mpnn_kernel(%arg0: i32, %arg1: memref<1x16x16xf32, #tpu.memory_space<vmem>>, %arg2: memref<1x32x8xf32, #tpu.memory_space<vmem>>, %arg3: memref<1x32x16xbf16, #tpu.memory_space<vmem>>, %arg4: memref<1x16x32xbf16, #tpu.memory_space<vmem>>, %arg5: memref<1x4x16xbf16, #tpu.memory_space<vmem>>, %arg6: memref<16x32xf32, #tpu.memory_space<vmem>>, %arg7: memref<1x32xf32, #tpu.memory_space<vmem>>, %arg8: memref<8x32xf32, #tpu.memory_space<vmem>>, %arg9: memref<1x32xf32, #tpu.memory_space<vmem>>, %arg10: memref<32x1024xbf16, #tpu.memory_space<vmem>>, %arg11: memref<1x1024xf32, #tpu.memory_space<vmem>>, %arg12: memref<1x32xf32, #tpu.memory_space<vmem>>, %arg13: memref<32x32xf32, #tpu.memory_space<vmem>>, %arg14: memref<32x32xf32, #tpu.memory_space<vmem>>, %arg15: memref<32x32xf32, #tpu.memory_space<vmem>>, %arg16: memref<1x32xf32, #tpu.memory_space<vmem>>, %arg17: memref<1x32xf32, #tpu.memory_space<vmem>>, %arg18: memref<1x32xf32, #tpu.memory_space<vmem>>, %arg19: memref<32x32xf32, #tpu.memory_space<vmem>>, %arg20: memref<32x32xf32, #tpu.memory_space<vmem>>, %arg21: memref<32x32xf32, #tpu.memory_space<vmem>>, %arg22: memref<1x32xf32, #tpu.memory_space<vmem>>, %arg23: memref<1x32xf32, #tpu.memory_space<vmem>>, %arg24: memref<1x32xf32, #tpu.memory_space<vmem>>, %arg25: memref<32x1024xbf16, #tpu.memory_space<vmem>>, %arg26: memref<1024x32xbf16, #tpu.memory_space<vmem>>, %arg27: memref<1x4x32xf32, #tpu.memory_space<vmem>>) attributes {dimension_semantics = [#tpu.dimension_semantics<parallel>], iteration_bounds = array<i64: 2>, scalar_prefetch = 0 : i64, scratch_operands = 0 : i64, tpu.core_type = #tpu.core_type<tc>, window_params = [{transform_indices = @transform_0, window_bounds = array<i64: 1, 16, 16>}, {transform_indices = @transform_1, window_bounds = array<i64: 1, 32, 8>}, {transform_indices = @transform_2, window_bounds = array<i64: 1, 32, 16>}, {transform_indices = @transform_3, window_bounds = array<i64: 1, 16, 32>}, {transform_indices = @transform_4, window_bounds = array<i64: 1, 4, 16>}, {pipeline_mode = #tpu.pipeline_mode<synchronous>, transform_indices = @transform_5, window_bounds = array<i64: 16, 32>}, {pipeline_mode = #tpu.pipeline_mode<synchronous>, transform_indices = @transform_6, window_bounds = array<i64: 1, 32>}, {pipeline_mode = #tpu.pipeline_mode<synchronous>, transform_indices = @transform_7, window_bounds = array<i64: 8, 32>}, {pipeline_mode = #tpu.pipeline_mode<synchronous>, transform_indices = @transform_8, window_bounds = array<i64: 1, 32>}, {pipeline_mode = #tpu.pipeline_mode<synchronous>, transform_indices = @transform_9, window_bounds = array<i64: 32, 1024>}, {pipeline_mode = #tpu.pipeline_mode<synchronous>, transform_indices = @transform_10, window_bounds = array<i64: 1, 1024>}, {pipeline_mode = #tpu.pipeline_mode<synchronous>, transform_indices = @transform_11, window_bounds = array<i64: 1, 32>}, {pipeline_mode = #tpu.pipeline_mode<synchronous>, transform_indices = @transform_12, window_bounds = array<i64: 32, 32>}, {pipeline_mode = #tpu.pipeline_mode<synchronous>, transform_indices = @transform_13, window_bounds = array<i64: 32, 32>}, {pipeline_mode = #tpu.pipeline_mode<synchronous>, transform_indices = @transform_14, window_bounds = array<i64: 32, 32>}, {pipeline_mode = #tpu.pipeline_mode<synchronous>, transform_indices = @transform_15, window_bounds = array<i64: 1, 32>}, {pipeline_mode = #tpu.pipeline_mode<synchronous>, transform_indices = @transform_16, window_bounds = array<i64: 1, 32>}, {pipeline_mode = #tpu.pipeline_mode<synchronous>, transform_indices = @transform_17, window_bounds = array<i64: 1, 32>}, {pipeline_mode = #tpu.pipeline_mode<synchronous>, transform_indices = @transform_18, window_bounds = array<i64: 32, 32>}, {pipeline_mode = #tpu.pipeline_mode<synchronous>, transform_indices = @transform_19, window_bounds = array<i64: 32, 32>}, {pipeline_mode = #tpu.pipeline_mode<synchronous>, transform_indices = @transform_20, window_bounds = array<i64: 32, 32>}, {pipeline_mode = #tpu.pipeline_mode<synchronous>, transform_indices = @transform_21, window_bounds = array<i64: 1, 32>}, {pipeline_mode = #tpu.pipeline_mode<synchronous>, transform_indices = @transform_22, window_bounds = array<i64: 1, 32>}, {pipeline_mode = #tpu.pipeline_mode<synchronous>, transform_indices = @transform_23, window_bounds = array<i64: 1, 32>}, {pipeline_mode = #tpu.pipeline_mode<synchronous>, transform_indices = @transform_24, window_bounds = array<i64: 32, 1024>}, {pipeline_mode = #tpu.pipeline_mode<synchronous>, transform_indices = @transform_25, window_bounds = array<i64: 1024, 32>}, {transform_indices = @transform_26, window_bounds = array<i64: 1, 4, 32>}]} {
    %c0 = arith.constant 0 : index
    %c0_0 = arith.constant 0 : index
    %c0_1 = arith.constant 0 : index
    %0 = vector.load %arg3[%c0, %c0_0, %c0_1] : memref<1x32x16xbf16, #tpu.memory_space<vmem>>, vector<1x32x16xbf16>
    %1 = vector.shape_cast %0 : vector<1x32x16xbf16> to vector<32x16xbf16>
    %c0_2 = arith.constant 0 : index
    %c0_3 = arith.constant 0 : index
    %c0_4 = arith.constant 0 : index
    %2 = vector.load %arg4[%c0_2, %c0_3, %c0_4] : memref<1x16x32xbf16, #tpu.memory_space<vmem>>, vector<1x16x32xbf16>
    %3 = vector.shape_cast %2 : vector<1x16x32xbf16> to vector<16x32xbf16>
    %c0_5 = arith.constant 0 : index
    %c0_6 = arith.constant 0 : index
    %4 = vector.load %arg13[%c0_5, %c0_6] : memref<32x32xf32, #tpu.memory_space<vmem>>, vector<32x32xf32>
    %c0_7 = arith.constant 0 : index
    %c0_8 = arith.constant 0 : index
    %5 = vector.load %arg14[%c0_7, %c0_8] : memref<32x32xf32, #tpu.memory_space<vmem>>, vector<32x32xf32>
    %c0_9 = arith.constant 0 : index
    %c0_10 = arith.constant 0 : index
    %6 = vector.load %arg15[%c0_9, %c0_10] : memref<32x32xf32, #tpu.memory_space<vmem>>, vector<32x32xf32>
    %c0_11 = arith.constant 0 : index
    %c0_12 = arith.constant 0 : index
    %7 = vector.load %arg19[%c0_11, %c0_12] : memref<32x32xf32, #tpu.memory_space<vmem>>, vector<32x32xf32>
    %c0_13 = arith.constant 0 : index
    %c0_14 = arith.constant 0 : index
    %8 = vector.load %arg20[%c0_13, %c0_14] : memref<32x32xf32, #tpu.memory_space<vmem>>, vector<32x32xf32>
    %c0_15 = arith.constant 0 : index
    %c0_16 = arith.constant 0 : index
    %9 = vector.load %arg21[%c0_15, %c0_16] : memref<32x32xf32, #tpu.memory_space<vmem>>, vector<32x32xf32>
    %c0_17 = arith.constant 0 : index
    %c0_18 = arith.constant 0 : index
    %10 = vector.load %arg25[%c0_17, %c0_18] : memref<32x1024xbf16, #tpu.memory_space<vmem>>, vector<32x1024xbf16>
    %c0_19 = arith.constant 0 : index
    %c0_20 = arith.constant 0 : index
    %11 = vector.load %arg26[%c0_19, %c0_20] : memref<1024x32xbf16, #tpu.memory_space<vmem>>, vector<1024x32xbf16>
    %c0_21 = arith.constant 0 : index
    %c0_22 = arith.constant 0 : index
    %12 = vector.load %arg12[%c0_21, %c0_22] : memref<1x32xf32, #tpu.memory_space<vmem>>, vector<1x32xf32>
    %13 = vector.shape_cast %12 : vector<1x32xf32> to vector<1x32xf32>
    %14 = vector.broadcast %13 : vector<1x32xf32> to vector<16x32xf32>
    %c0_23 = arith.constant 0 : index
    %c0_24 = arith.constant 0 : index
    %15 = vector.load %arg16[%c0_23, %c0_24] : memref<1x32xf32, #tpu.memory_space<vmem>>, vector<1x32xf32>
    %c0_25 = arith.constant 0 : index
    %c0_26 = arith.constant 0 : index
    %16 = vector.load %arg22[%c0_25, %c0_26] : memref<1x32xf32, #tpu.memory_space<vmem>>, vector<1x32xf32>
    %17 = arith.addf %15, %16 : vector<1x32xf32>
    %18 = vector.shape_cast %17 : vector<1x32xf32> to vector<1x32xf32>
    %19 = vector.broadcast %18 : vector<1x32xf32> to vector<16x32xf32>
    %c0_27 = arith.constant 0 : index
    %c0_28 = arith.constant 0 : index
    %20 = vector.load %arg17[%c0_27, %c0_28] : memref<1x32xf32, #tpu.memory_space<vmem>>, vector<1x32xf32>
    %c0_29 = arith.constant 0 : index
    %c0_30 = arith.constant 0 : index
    %21 = vector.load %arg23[%c0_29, %c0_30] : memref<1x32xf32, #tpu.memory_space<vmem>>, vector<1x32xf32>
    %22 = arith.addf %20, %21 : vector<1x32xf32>
    %23 = vector.shape_cast %22 : vector<1x32xf32> to vector<1x32xf32>
    %24 = vector.broadcast %23 : vector<1x32xf32> to vector<16x32xf32>
    %c0_31 = arith.constant 0 : index
    %c0_32 = arith.constant 0 : index
    %25 = vector.load %arg18[%c0_31, %c0_32] : memref<1x32xf32, #tpu.memory_space<vmem>>, vector<1x32xf32>
    %26 = vector.shape_cast %25 : vector<1x32xf32> to vector<1x32xf32>
    %27 = vector.broadcast %26 : vector<1x32xf32> to vector<16x32xf32>
    %c0_33 = arith.constant 0 : index
    %c0_34 = arith.constant 0 : index
    %28 = vector.load %arg24[%c0_33, %c0_34] : memref<1x32xf32, #tpu.memory_space<vmem>>, vector<1x32xf32>
    %29 = vector.shape_cast %28 : vector<1x32xf32> to vector<1x32xf32>
    %30 = vector.broadcast %29 : vector<1x32xf32> to vector<16x32xf32>
    %c0_35 = arith.constant 0 : index
    %c0_36 = arith.constant 0 : index
    %c0_37 = arith.constant 0 : index
    %31 = vector.load %arg1[%c0_35, %c0_36, %c0_37] : memref<1x16x16xf32, #tpu.memory_space<vmem>>, vector<1x16x16xf32>
    %32 = vector.shape_cast %31 : vector<1x16x16xf32> to vector<16x16xf32>
    %c0_38 = arith.constant 0 : index
    %c0_39 = arith.constant 0 : index
    %33 = vector.load %arg6[%c0_38, %c0_39] : memref<16x32xf32, #tpu.memory_space<vmem>>, vector<16x32xf32>
    %cst = arith.constant dense<0.000000e+00> : vector<16x32xf32>
    %34 = tpu.matmul %32, %33, %cst {dimension_numbers = #tpu.dot_dimension_numbers<[1], [0], [0], [1], [0, 0, 1, 1], [], []>} : vector<16x16xf32>, vector<16x32xf32>, vector<16x32xf32> -> vector<16x32xf32>
    %c0_40 = arith.constant 0 : index
    %c0_41 = arith.constant 0 : index
    %35 = vector.load %arg7[%c0_40, %c0_41] : memref<1x32xf32, #tpu.memory_space<vmem>>, vector<1x32xf32>
    %36 = vector.broadcast %35 : vector<1x32xf32> to vector<16x32xf32>
    %37 = arith.addf %34, %36 : vector<16x32xf32>
    %cst_42 = arith.constant 0.000000e+00 : f32
    %38 = vector.broadcast %cst_42 : f32 to vector<16x32xf32>
    %39 = arith.maximumf %37, %38 : vector<16x32xf32>
    %c0_43 = arith.constant 0 : index
    %c0_44 = arith.constant 0 : index
    %c0_45 = arith.constant 0 : index
    %40 = vector.load %arg2[%c0_43, %c0_44, %c0_45] : memref<1x32x8xf32, #tpu.memory_space<vmem>>, vector<1x32x8xf32>
    %41 = vector.shape_cast %40 : vector<1x32x8xf32> to vector<32x8xf32>
    %c0_46 = arith.constant 0 : index
    %c0_47 = arith.constant 0 : index
    %42 = vector.load %arg8[%c0_46, %c0_47] : memref<8x32xf32, #tpu.memory_space<vmem>>, vector<8x32xf32>
    %cst_48 = arith.constant dense<0.000000e+00> : vector<32x32xf32>
    %43 = tpu.matmul %41, %42, %cst_48 {dimension_numbers = #tpu.dot_dimension_numbers<[1], [0], [0], [1], [0, 0, 1, 1], [], []>} : vector<32x8xf32>, vector<8x32xf32>, vector<32x32xf32> -> vector<32x32xf32>
    %c0_49 = arith.constant 0 : index
    %c0_50 = arith.constant 0 : index
    %44 = vector.load %arg9[%c0_49, %c0_50] : memref<1x32xf32, #tpu.memory_space<vmem>>, vector<1x32xf32>
    %45 = vector.broadcast %44 : vector<1x32xf32> to vector<32x32xf32>
    %46 = arith.addf %43, %45 : vector<32x32xf32>
    %cst_51 = arith.constant 0.000000e+00 : f32
    %47 = vector.broadcast %cst_51 : f32 to vector<32x32xf32>
    %48 = arith.maximumf %46, %47 : vector<32x32xf32>
    %49 = arith.truncf %48 : vector<32x32xf32> to vector<32x32xbf16>
    %c0_52 = arith.constant 0 : index
    %c0_53 = arith.constant 0 : index
    %50 = vector.load %arg10[%c0_52, %c0_53] : memref<32x1024xbf16, #tpu.memory_space<vmem>>, vector<32x1024xbf16>
    %cst_54 = arith.constant dense<0.000000e+00> : vector<32x1024xf32>
    %51 = tpu.matmul %49, %50, %cst_54 {dimension_numbers = #tpu.dot_dimension_numbers<[1], [0], [0], [1], [0, 0, 1, 1], [], []>} : vector<32x32xbf16>, vector<32x1024xbf16>, vector<32x1024xf32> -> vector<32x1024xf32>
    %c0_55 = arith.constant 0 : index
    %c0_56 = arith.constant 0 : index
    %52 = vector.load %arg11[%c0_55, %c0_56] : memref<1x1024xf32, #tpu.memory_space<vmem>>, vector<1x1024xf32>
    %53 = vector.broadcast %52 : vector<1x1024xf32> to vector<32x1024xf32>
    %54 = arith.addf %51, %53 : vector<32x1024xf32>
    %c0_i32 = arith.constant 0 : i32
    %55 = arith.truncf %39 : vector<16x32xf32> to vector<16x32xbf16>
    %cst_57 = arith.constant dense<0.000000e+00> : vector<32x32xf32>
    %56 = tpu.matmul %1, %55, %cst_57 {dimension_numbers = #tpu.dot_dimension_numbers<[1], [0], [0], [1], [0, 0, 1, 1], [], []>} : vector<32x16xbf16>, vector<16x32xbf16>, vector<32x32xf32> -> vector<32x32xf32>
    %57 = arith.truncf %56 : vector<32x32xf32> to vector<32x32xbf16>
    %cst_58 = arith.constant dense<0.000000e+00> : vector<32x1024xf32>
    %58 = tpu.matmul %57, %10, %cst_58 {dimension_numbers = #tpu.dot_dimension_numbers<[1], [0], [0], [1], [0, 0, 1, 1], [], []>} : vector<32x32xbf16>, vector<32x1024xbf16>, vector<32x1024xf32> -> vector<32x1024xf32>
    %59 = arith.mulf %58, %54 : vector<32x1024xf32>
    %60 = arith.truncf %59 : vector<32x1024xf32> to vector<32x1024xbf16>
    %cst_59 = arith.constant dense<0.000000e+00> : vector<32x32xf32>
    %61 = tpu.matmul %60, %11, %cst_59 {dimension_numbers = #tpu.dot_dimension_numbers<[1], [0], [0], [1], [0, 0, 1, 1], [], []>} : vector<32x1024xbf16>, vector<1024x32xbf16>, vector<32x32xf32> -> vector<32x32xf32>
    %62 = arith.truncf %61 : vector<32x32xf32> to vector<32x32xbf16>
    %cst_60 = arith.constant dense<0.000000e+00> : vector<16x32xf32>
    %63 = tpu.matmul %3, %62, %cst_60 {dimension_numbers = #tpu.dot_dimension_numbers<[1], [0], [0], [1], [0, 0, 1, 1], [], []>} : vector<16x32xbf16>, vector<32x32xbf16>, vector<16x32xf32> -> vector<16x32xf32>
    %64 = arith.addf %63, %14 : vector<16x32xf32>
    %cst_61 = arith.constant 0.000000e+00 : f32
    %65 = vector.broadcast %cst_61 : f32 to vector<16x32xf32>
    %66 = arith.maximumf %64, %65 : vector<16x32xf32>
    %cst_62 = arith.constant dense<0.000000e+00> : vector<16x32xf32>
    %67 = tpu.matmul %66, %4, %cst_62 {dimension_numbers = #tpu.dot_dimension_numbers<[1], [0], [0], [1], [0, 0, 1, 1], [], []>} : vector<16x32xf32>, vector<32x32xf32>, vector<16x32xf32> -> vector<16x32xf32>
    %cst_63 = arith.constant dense<0.000000e+00> : vector<16x32xf32>
    %68 = tpu.matmul %39, %7, %cst_63 {dimension_numbers = #tpu.dot_dimension_numbers<[1], [0], [0], [1], [0, 0, 1, 1], [], []>} : vector<16x32xf32>, vector<32x32xf32>, vector<16x32xf32> -> vector<16x32xf32>
    %69 = arith.addf %67, %68 : vector<16x32xf32>
    %70 = arith.addf %69, %19 : vector<16x32xf32>
    %71 = arith.negf %70 : vector<16x32xf32>
    %72 = math.exp %71 : vector<16x32xf32>
    %cst_64 = arith.constant 1.000000e+00 : f32
    %73 = vector.broadcast %cst_64 : f32 to vector<16x32xf32>
    %74 = arith.addf %73, %72 : vector<16x32xf32>
    %75 = arith.divf %73, %74 : vector<16x32xf32>
    %cst_65 = arith.constant dense<0.000000e+00> : vector<16x32xf32>
    %76 = tpu.matmul %66, %5, %cst_65 {dimension_numbers = #tpu.dot_dimension_numbers<[1], [0], [0], [1], [0, 0, 1, 1], [], []>} : vector<16x32xf32>, vector<32x32xf32>, vector<16x32xf32> -> vector<16x32xf32>
    %cst_66 = arith.constant dense<0.000000e+00> : vector<16x32xf32>
    %77 = tpu.matmul %39, %8, %cst_66 {dimension_numbers = #tpu.dot_dimension_numbers<[1], [0], [0], [1], [0, 0, 1, 1], [], []>} : vector<16x32xf32>, vector<32x32xf32>, vector<16x32xf32> -> vector<16x32xf32>
    %78 = arith.addf %76, %77 : vector<16x32xf32>
    %79 = arith.addf %78, %24 : vector<16x32xf32>
    %80 = arith.negf %79 : vector<16x32xf32>
    %81 = math.exp %80 : vector<16x32xf32>
    %cst_67 = arith.constant 1.000000e+00 : f32
    %82 = vector.broadcast %cst_67 : f32 to vector<16x32xf32>
    %83 = arith.addf %82, %81 : vector<16x32xf32>
    %84 = arith.divf %82, %83 : vector<16x32xf32>
    %cst_68 = arith.constant dense<0.000000e+00> : vector<16x32xf32>
    %85 = tpu.matmul %66, %6, %cst_68 {dimension_numbers = #tpu.dot_dimension_numbers<[1], [0], [0], [1], [0, 0, 1, 1], [], []>} : vector<16x32xf32>, vector<32x32xf32>, vector<16x32xf32> -> vector<16x32xf32>
    %86 = arith.addf %85, %27 : vector<16x32xf32>
    %cst_69 = arith.constant dense<0.000000e+00> : vector<16x32xf32>
    %87 = tpu.matmul %39, %9, %cst_69 {dimension_numbers = #tpu.dot_dimension_numbers<[1], [0], [0], [1], [0, 0, 1, 1], [], []>} : vector<16x32xf32>, vector<32x32xf32>, vector<16x32xf32> -> vector<16x32xf32>
    %88 = arith.addf %87, %30 : vector<16x32xf32>
    %89 = arith.mulf %75, %88 : vector<16x32xf32>
    %90 = arith.addf %86, %89 : vector<16x32xf32>
    %91 = math.tanh %90 : vector<16x32xf32>
    %cst_70 = arith.constant 1.000000e+00 : f32
    %92 = vector.broadcast %cst_70 : f32 to vector<16x32xf32>
    %93 = arith.subf %92, %84 : vector<16x32xf32>
    %94 = arith.mulf %93, %91 : vector<16x32xf32>
    %95 = arith.mulf %84, %39 : vector<16x32xf32>
    %96 = arith.addf %94, %95 : vector<16x32xf32>
    %c1_i32 = arith.constant 1 : i32
    %97 = arith.truncf %96 : vector<16x32xf32> to vector<16x32xbf16>
    %cst_71 = arith.constant dense<0.000000e+00> : vector<32x32xf32>
    %98 = tpu.matmul %1, %97, %cst_71 {dimension_numbers = #tpu.dot_dimension_numbers<[1], [0], [0], [1], [0, 0, 1, 1], [], []>} : vector<32x16xbf16>, vector<16x32xbf16>, vector<32x32xf32> -> vector<32x32xf32>
    %99 = arith.truncf %98 : vector<32x32xf32> to vector<32x32xbf16>
    %cst_72 = arith.constant dense<0.000000e+00> : vector<32x1024xf32>
    %100 = tpu.matmul %99, %10, %cst_72 {dimension_numbers = #tpu.dot_dimension_numbers<[1], [0], [0], [1], [0, 0, 1, 1], [], []>} : vector<32x32xbf16>, vector<32x1024xbf16>, vector<32x1024xf32> -> vector<32x1024xf32>
    %101 = arith.mulf %100, %54 : vector<32x1024xf32>
    %102 = arith.truncf %101 : vector<32x1024xf32> to vector<32x1024xbf16>
    %cst_73 = arith.constant dense<0.000000e+00> : vector<32x32xf32>
    %103 = tpu.matmul %102, %11, %cst_73 {dimension_numbers = #tpu.dot_dimension_numbers<[1], [0], [0], [1], [0, 0, 1, 1], [], []>} : vector<32x1024xbf16>, vector<1024x32xbf16>, vector<32x32xf32> -> vector<32x32xf32>
    %104 = arith.truncf %103 : vector<32x32xf32> to vector<32x32xbf16>
    %cst_74 = arith.constant dense<0.000000e+00> : vector<16x32xf32>
    %105 = tpu.matmul %3, %104, %cst_74 {dimension_numbers = #tpu.dot_dimension_numbers<[1], [0], [0], [1], [0, 0, 1, 1], [], []>} : vector<16x32xbf16>, vector<32x32xbf16>, vector<16x32xf32> -> vector<16x32xf32>
    %106 = arith.addf %105, %14 : vector<16x32xf32>
    %cst_75 = arith.constant 0.000000e+00 : f32
    %107 = vector.broadcast %cst_75 : f32 to vector<16x32xf32>
    %108 = arith.maximumf %106, %107 : vector<16x32xf32>
    %cst_76 = arith.constant dense<0.000000e+00> : vector<16x32xf32>
    %109 = tpu.matmul %108, %4, %cst_76 {dimension_numbers = #tpu.dot_dimension_numbers<[1], [0], [0], [1], [0, 0, 1, 1], [], []>} : vector<16x32xf32>, vector<32x32xf32>, vector<16x32xf32> -> vector<16x32xf32>
    %cst_77 = arith.constant dense<0.000000e+00> : vector<16x32xf32>
    %110 = tpu.matmul %96, %7, %cst_77 {dimension_numbers = #tpu.dot_dimension_numbers<[1], [0], [0], [1], [0, 0, 1, 1], [], []>} : vector<16x32xf32>, vector<32x32xf32>, vector<16x32xf32> -> vector<16x32xf32>
    %111 = arith.addf %109, %110 : vector<16x32xf32>
    %112 = arith.addf %111, %19 : vector<16x32xf32>
    %113 = arith.negf %112 : vector<16x32xf32>
    %114 = math.exp %113 : vector<16x32xf32>
    %cst_78 = arith.constant 1.000000e+00 : f32
    %115 = vector.broadcast %cst_78 : f32 to vector<16x32xf32>
    %116 = arith.addf %115, %114 : vector<16x32xf32>
    %117 = arith.divf %115, %116 : vector<16x32xf32>
    %cst_79 = arith.constant dense<0.000000e+00> : vector<16x32xf32>
    %118 = tpu.matmul %108, %5, %cst_79 {dimension_numbers = #tpu.dot_dimension_numbers<[1], [0], [0], [1], [0, 0, 1, 1], [], []>} : vector<16x32xf32>, vector<32x32xf32>, vector<16x32xf32> -> vector<16x32xf32>
    %cst_80 = arith.constant dense<0.000000e+00> : vector<16x32xf32>
    %119 = tpu.matmul %96, %8, %cst_80 {dimension_numbers = #tpu.dot_dimension_numbers<[1], [0], [0], [1], [0, 0, 1, 1], [], []>} : vector<16x32xf32>, vector<32x32xf32>, vector<16x32xf32> -> vector<16x32xf32>
    %120 = arith.addf %118, %119 : vector<16x32xf32>
    %121 = arith.addf %120, %24 : vector<16x32xf32>
    %122 = arith.negf %121 : vector<16x32xf32>
    %123 = math.exp %122 : vector<16x32xf32>
    %cst_81 = arith.constant 1.000000e+00 : f32
    %124 = vector.broadcast %cst_81 : f32 to vector<16x32xf32>
    %125 = arith.addf %124, %123 : vector<16x32xf32>
    %126 = arith.divf %124, %125 : vector<16x32xf32>
    %cst_82 = arith.constant dense<0.000000e+00> : vector<16x32xf32>
    %127 = tpu.matmul %108, %6, %cst_82 {dimension_numbers = #tpu.dot_dimension_numbers<[1], [0], [0], [1], [0, 0, 1, 1], [], []>} : vector<16x32xf32>, vector<32x32xf32>, vector<16x32xf32> -> vector<16x32xf32>
    %128 = arith.addf %127, %27 : vector<16x32xf32>
    %cst_83 = arith.constant dense<0.000000e+00> : vector<16x32xf32>
    %129 = tpu.matmul %96, %9, %cst_83 {dimension_numbers = #tpu.dot_dimension_numbers<[1], [0], [0], [1], [0, 0, 1, 1], [], []>} : vector<16x32xf32>, vector<32x32xf32>, vector<16x32xf32> -> vector<16x32xf32>
    %130 = arith.addf %129, %30 : vector<16x32xf32>
    %131 = arith.mulf %117, %130 : vector<16x32xf32>
    %132 = arith.addf %128, %131 : vector<16x32xf32>
    %133 = math.tanh %132 : vector<16x32xf32>
    %cst_84 = arith.constant 1.000000e+00 : f32
    %134 = vector.broadcast %cst_84 : f32 to vector<16x32xf32>
    %135 = arith.subf %134, %126 : vector<16x32xf32>
    %136 = arith.mulf %135, %133 : vector<16x32xf32>
    %137 = arith.mulf %126, %96 : vector<16x32xf32>
    %138 = arith.addf %136, %137 : vector<16x32xf32>
    %c2_i32 = arith.constant 2 : i32
    %139 = arith.truncf %138 : vector<16x32xf32> to vector<16x32xbf16>
    %cst_85 = arith.constant dense<0.000000e+00> : vector<32x32xf32>
    %140 = tpu.matmul %1, %139, %cst_85 {dimension_numbers = #tpu.dot_dimension_numbers<[1], [0], [0], [1], [0, 0, 1, 1], [], []>} : vector<32x16xbf16>, vector<16x32xbf16>, vector<32x32xf32> -> vector<32x32xf32>
    %141 = arith.truncf %140 : vector<32x32xf32> to vector<32x32xbf16>
    %cst_86 = arith.constant dense<0.000000e+00> : vector<32x1024xf32>
    %142 = tpu.matmul %141, %10, %cst_86 {dimension_numbers = #tpu.dot_dimension_numbers<[1], [0], [0], [1], [0, 0, 1, 1], [], []>} : vector<32x32xbf16>, vector<32x1024xbf16>, vector<32x1024xf32> -> vector<32x1024xf32>
    %143 = arith.mulf %142, %54 : vector<32x1024xf32>
    %144 = arith.truncf %143 : vector<32x1024xf32> to vector<32x1024xbf16>
    %cst_87 = arith.constant dense<0.000000e+00> : vector<32x32xf32>
    %145 = tpu.matmul %144, %11, %cst_87 {dimension_numbers = #tpu.dot_dimension_numbers<[1], [0], [0], [1], [0, 0, 1, 1], [], []>} : vector<32x1024xbf16>, vector<1024x32xbf16>, vector<32x32xf32> -> vector<32x32xf32>
    %146 = arith.truncf %145 : vector<32x32xf32> to vector<32x32xbf16>
    %cst_88 = arith.constant dense<0.000000e+00> : vector<16x32xf32>
    %147 = tpu.matmul %3, %146, %cst_88 {dimension_numbers = #tpu.dot_dimension_numbers<[1], [0], [0], [1], [0, 0, 1, 1], [], []>} : vector<16x32xbf16>, vector<32x32xbf16>, vector<16x32xf32> -> vector<16x32xf32>
    %148 = arith.addf %147, %14 : vector<16x32xf32>
    %cst_89 = arith.constant 0.000000e+00 : f32
    %149 = vector.broadcast %cst_89 : f32 to vector<16x32xf32>
    %150 = arith.maximumf %148, %149 : vector<16x32xf32>
    %cst_90 = arith.constant dense<0.000000e+00> : vector<16x32xf32>
    %151 = tpu.matmul %150, %4, %cst_90 {dimension_numbers = #tpu.dot_dimension_numbers<[1], [0], [0], [1], [0, 0, 1, 1], [], []>} : vector<16x32xf32>, vector<32x32xf32>, vector<16x32xf32> -> vector<16x32xf32>
    %cst_91 = arith.constant dense<0.000000e+00> : vector<16x32xf32>
    %152 = tpu.matmul %138, %7, %cst_91 {dimension_numbers = #tpu.dot_dimension_numbers<[1], [0], [0], [1], [0, 0, 1, 1], [], []>} : vector<16x32xf32>, vector<32x32xf32>, vector<16x32xf32> -> vector<16x32xf32>
    %153 = arith.addf %151, %152 : vector<16x32xf32>
    %154 = arith.addf %153, %19 : vector<16x32xf32>
    %155 = arith.negf %154 : vector<16x32xf32>
    %156 = math.exp %155 : vector<16x32xf32>
    %cst_92 = arith.constant 1.000000e+00 : f32
    %157 = vector.broadcast %cst_92 : f32 to vector<16x32xf32>
    %158 = arith.addf %157, %156 : vector<16x32xf32>
    %159 = arith.divf %157, %158 : vector<16x32xf32>
    %cst_93 = arith.constant dense<0.000000e+00> : vector<16x32xf32>
    %160 = tpu.matmul %150, %5, %cst_93 {dimension_numbers = #tpu.dot_dimension_numbers<[1], [0], [0], [1], [0, 0, 1, 1], [], []>} : vector<16x32xf32>, vector<32x32xf32>, vector<16x32xf32> -> vector<16x32xf32>
    %cst_94 = arith.constant dense<0.000000e+00> : vector<16x32xf32>
    %161 = tpu.matmul %138, %8, %cst_94 {dimension_numbers = #tpu.dot_dimension_numbers<[1], [0], [0], [1], [0, 0, 1, 1], [], []>} : vector<16x32xf32>, vector<32x32xf32>, vector<16x32xf32> -> vector<16x32xf32>
    %162 = arith.addf %160, %161 : vector<16x32xf32>
    %163 = arith.addf %162, %24 : vector<16x32xf32>
    %164 = arith.negf %163 : vector<16x32xf32>
    %165 = math.exp %164 : vector<16x32xf32>
    %cst_95 = arith.constant 1.000000e+00 : f32
    %166 = vector.broadcast %cst_95 : f32 to vector<16x32xf32>
    %167 = arith.addf %166, %165 : vector<16x32xf32>
    %168 = arith.divf %166, %167 : vector<16x32xf32>
    %cst_96 = arith.constant dense<0.000000e+00> : vector<16x32xf32>
    %169 = tpu.matmul %150, %6, %cst_96 {dimension_numbers = #tpu.dot_dimension_numbers<[1], [0], [0], [1], [0, 0, 1, 1], [], []>} : vector<16x32xf32>, vector<32x32xf32>, vector<16x32xf32> -> vector<16x32xf32>
    %170 = arith.addf %169, %27 : vector<16x32xf32>
    %cst_97 = arith.constant dense<0.000000e+00> : vector<16x32xf32>
    %171 = tpu.matmul %138, %9, %cst_97 {dimension_numbers = #tpu.dot_dimension_numbers<[1], [0], [0], [1], [0, 0, 1, 1], [], []>} : vector<16x32xf32>, vector<32x32xf32>, vector<16x32xf32> -> vector<16x32xf32>
    %172 = arith.addf %171, %30 : vector<16x32xf32>
    %173 = arith.mulf %159, %172 : vector<16x32xf32>
    %174 = arith.addf %170, %173 : vector<16x32xf32>
    %175 = math.tanh %174 : vector<16x32xf32>
    %cst_98 = arith.constant 1.000000e+00 : f32
    %176 = vector.broadcast %cst_98 : f32 to vector<16x32xf32>
    %177 = arith.subf %176, %168 : vector<16x32xf32>
    %178 = arith.mulf %177, %175 : vector<16x32xf32>
    %179 = arith.mulf %168, %138 : vector<16x32xf32>
    %180 = arith.addf %178, %179 : vector<16x32xf32>
    %c0_99 = arith.constant 0 : index
    %c0_100 = arith.constant 0 : index
    %c0_101 = arith.constant 0 : index
    %181 = vector.load %arg5[%c0_99, %c0_100, %c0_101] : memref<1x4x16xbf16, #tpu.memory_space<vmem>>, vector<1x4x16xbf16>
    %182 = vector.shape_cast %181 : vector<1x4x16xbf16> to vector<4x16xbf16>
    %183 = arith.truncf %180 : vector<16x32xf32> to vector<16x32xbf16>
    %cst_102 = arith.constant dense<0.000000e+00> : vector<4x32xf32>
    %184 = tpu.matmul %182, %183, %cst_102 {dimension_numbers = #tpu.dot_dimension_numbers<[1], [0], [0], [1], [0, 0, 1, 1], [], []>} : vector<4x16xbf16>, vector<16x32xbf16>, vector<4x32xf32> -> vector<4x32xf32>
    %c0_103 = arith.constant 0 : index
    %c0_104 = arith.constant 0 : index
    %c0_105 = arith.constant 0 : index
    %185 = vector.load %arg27[%c0_103, %c0_104, %c0_105] : memref<1x4x32xf32, #tpu.memory_space<vmem>>, vector<1x4x32xf32>
    %186 = vector.shape_cast %185 : vector<1x4x32xf32> to vector<4x32xf32>
    %187 = vector.shape_cast %184 : vector<4x32xf32> to vector<1x4x32xf32>
    tpu.vector_store %arg27[%c0_103, %c0_104, %c0_105], %187 {strides = array<i32>} : memref<1x4x32xf32, #tpu.memory_space<vmem>>, vector<1x4x32xf32>,
    return
  }
  func.func @transform_0(%arg0: i32) -> (i32, i32, i32) {
    %c0_i32 = arith.constant 0 : i32
    %c0_i32_0 = arith.constant 0 : i32
    %c0_i32_1 = arith.constant 0 : i32
    return %arg0, %c0_i32, %c0_i32_0 : i32, i32, i32
  }
  func.func @transform_1(%arg0: i32) -> (i32, i32, i32) {
    %c0_i32 = arith.constant 0 : i32
    %c0_i32_0 = arith.constant 0 : i32
    %c0_i32_1 = arith.constant 0 : i32
    return %arg0, %c0_i32, %c0_i32_0 : i32, i32, i32
  }
  func.func @transform_2(%arg0: i32) -> (i32, i32, i32) {
    %c0_i32 = arith.constant 0 : i32
    %c0_i32_0 = arith.constant 0 : i32
    %c0_i32_1 = arith.constant 0 : i32
    return %arg0, %c0_i32, %c0_i32_0 : i32, i32, i32
  }
  func.func @transform_3(%arg0: i32) -> (i32, i32, i32) {
    %c0_i32 = arith.constant 0 : i32
    %c0_i32_0 = arith.constant 0 : i32
    %c0_i32_1 = arith.constant 0 : i32
    return %arg0, %c0_i32, %c0_i32_0 : i32, i32, i32
  }
  func.func @transform_4(%arg0: i32) -> (i32, i32, i32) {
    %c0_i32 = arith.constant 0 : i32
    %c0_i32_0 = arith.constant 0 : i32
    %c0_i32_1 = arith.constant 0 : i32
    return %arg0, %c0_i32, %c0_i32_0 : i32, i32, i32
  }
  func.func @transform_5(%arg0: i32) -> (i32, i32) {
    %c0_i32 = arith.constant 0 : i32
    %c0_i32_0 = arith.constant 0 : i32
    %c0_i32_1 = arith.constant 0 : i32
    return %c0_i32, %c0_i32_0 : i32, i32
  }
  func.func @transform_6(%arg0: i32) -> (i32, i32) {
    %c0_i32 = arith.constant 0 : i32
    %c0_i32_0 = arith.constant 0 : i32
    %c0_i32_1 = arith.constant 0 : i32
    return %c0_i32, %c0_i32_0 : i32, i32
  }
  func.func @transform_7(%arg0: i32) -> (i32, i32) {
    %c0_i32 = arith.constant 0 : i32
    %c0_i32_0 = arith.constant 0 : i32
    %c0_i32_1 = arith.constant 0 : i32
    return %c0_i32, %c0_i32_0 : i32, i32
  }
  func.func @transform_8(%arg0: i32) -> (i32, i32) {
    %c0_i32 = arith.constant 0 : i32
    %c0_i32_0 = arith.constant 0 : i32
    %c0_i32_1 = arith.constant 0 : i32
    return %c0_i32, %c0_i32_0 : i32, i32
  }
  func.func @transform_9(%arg0: i32) -> (i32, i32) {
    %c0_i32 = arith.constant 0 : i32
    %c0_i32_0 = arith.constant 0 : i32
    %c0_i32_1 = arith.constant 0 : i32
    return %c0_i32, %c0_i32_0 : i32, i32
  }
  func.func @transform_10(%arg0: i32) -> (i32, i32) {
    %c0_i32 = arith.constant 0 : i32
    %c0_i32_0 = arith.constant 0 : i32
    %c0_i32_1 = arith.constant 0 : i32
    return %c0_i32, %c0_i32_0 : i32, i32
  }
  func.func @transform_11(%arg0: i32) -> (i32, i32) {
    %c0_i32 = arith.constant 0 : i32
    %c0_i32_0 = arith.constant 0 : i32
    %c0_i32_1 = arith.constant 0 : i32
    return %c0_i32, %c0_i32_0 : i32, i32
  }
  func.func @transform_12(%arg0: i32) -> (i32, i32) {
    %c0_i32 = arith.constant 0 : i32
    %c0_i32_0 = arith.constant 0 : i32
    %c0_i32_1 = arith.constant 0 : i32
    return %c0_i32, %c0_i32_0 : i32, i32
  }
  func.func @transform_13(%arg0: i32) -> (i32, i32) {
    %c0_i32 = arith.constant 0 : i32
    %c0_i32_0 = arith.constant 0 : i32
    %c0_i32_1 = arith.constant 0 : i32
    return %c0_i32, %c0_i32_0 : i32, i32
  }
  func.func @transform_14(%arg0: i32) -> (i32, i32) {
    %c0_i32 = arith.constant 0 : i32
    %c0_i32_0 = arith.constant 0 : i32
    %c0_i32_1 = arith.constant 0 : i32
    return %c0_i32, %c0_i32_0 : i32, i32
  }
  func.func @transform_15(%arg0: i32) -> (i32, i32) {
    %c0_i32 = arith.constant 0 : i32
    %c0_i32_0 = arith.constant 0 : i32
    %c0_i32_1 = arith.constant 0 : i32
    return %c0_i32, %c0_i32_0 : i32, i32
  }
  func.func @transform_16(%arg0: i32) -> (i32, i32) {
    %c0_i32 = arith.constant 0 : i32
    %c0_i32_0 = arith.constant 0 : i32
    %c0_i32_1 = arith.constant 0 : i32
    return %c0_i32, %c0_i32_0 : i32, i32
  }
  func.func @transform_17(%arg0: i32) -> (i32, i32) {
    %c0_i32 = arith.constant 0 : i32
    %c0_i32_0 = arith.constant 0 : i32
    %c0_i32_1 = arith.constant 0 : i32
    return %c0_i32, %c0_i32_0 : i32, i32
  }
  func.func @transform_18(%arg0: i32) -> (i32, i32) {
    %c0_i32 = arith.constant 0 : i32
    %c0_i32_0 = arith.constant 0 : i32
    %c0_i32_1 = arith.constant 0 : i32
    return %c0_i32, %c0_i32_0 : i32, i32
  }
  func.func @transform_19(%arg0: i32) -> (i32, i32) {
    %c0_i32 = arith.constant 0 : i32
    %c0_i32_0 = arith.constant 0 : i32
    %c0_i32_1 = arith.constant 0 : i32
    return %c0_i32, %c0_i32_0 : i32, i32
  }
  func.func @transform_20(%arg0: i32) -> (i32, i32) {
    %c0_i32 = arith.constant 0 : i32
    %c0_i32_0 = arith.constant 0 : i32
    %c0_i32_1 = arith.constant 0 : i32
    return %c0_i32, %c0_i32_0 : i32, i32
  }
  func.func @transform_21(%arg0: i32) -> (i32, i32) {
    %c0_i32 = arith.constant 0 : i32
    %c0_i32_0 = arith.constant 0 : i32
    %c0_i32_1 = arith.constant 0 : i32
    return %c0_i32, %c0_i32_0 : i32, i32
  }
  func.func @transform_22(%arg0: i32) -> (i32, i32) {
    %c0_i32 = arith.constant 0 : i32
    %c0_i32_0 = arith.constant 0 : i32
    %c0_i32_1 = arith.constant 0 : i32
    return %c0_i32, %c0_i32_0 : i32, i32
  }
  func.func @transform_23(%arg0: i32) -> (i32, i32) {
    %c0_i32 = arith.constant 0 : i32
    %c0_i32_0 = arith.constant 0 : i32
    %c0_i32_1 = arith.constant 0 : i32
    return %c0_i32, %c0_i32_0 : i32, i32
  }
  func.func @transform_24(%arg0: i32) -> (i32, i32) {
    %c0_i32 = arith.constant 0 : i32
    %c0_i32_0 = arith.constant 0 : i32
    %c0_i32_1 = arith.constant 0 : i32
    return %c0_i32, %c0_i32_0 : i32, i32
  }
  func.func @transform_25(%arg0: i32) -> (i32, i32) {
    %c0_i32 = arith.constant 0 : i32
    %c0_i32_0 = arith.constant 0 : i32
    %c0_i32_1 = arith.constant 0 : i32
    return %c0_i32, %c0_i32_0 : i32, i32
  }
  func.func @transform_26(%arg0: i32) -> (i32, i32, i32) {
    %c0_i32 = arith.constant 0 : i32
    %c0_i32_0 = arith.constant 0 : i32
    %c0_i32_1 = arith.constant 0 : i32
    return %arg0, %c0_i32, %c0_i32_0 : i32, i32, i32
  }
}

</mosaic_0001>

<bundles_post_ra>
// kernel: tpu_custom_call.1
= control target key start
LH: loop header
LB: loop body
LE: loop exit
PB: predicated region body
PF: predicated region fallthrough
CT: control target
= control target key end

     0   :  { %s8720_s0 = inlined_call_operand.vmem [shape: f32[2,16,16], index: 0, kind: input, shape index: {}]   ;;  %s8721_s1 = inlined_call_operand.vmem [shape: f32[2,32,8], index: 1, kind: input, shape index: {}]   ;;  %s8722_s2 = inlined_call_operand.vmem [shape: bf16[2,32,16], index: 2, kind: input, shape index: {}]   ;;  %s8723_s3 = inlined_call_operand.vmem [shape: bf16[2,16,32], index: 3, kind: input, shape index: {}]   ;;  %s8724_s4 = inlined_call_operand.vmem [shape: bf16[2,4,16], index: 4, kind: input, shape index: {}]   ;;  %s8725_s5 = inlined_call_operand.vmem [shape: f32[16,32], index: 5, kind: input, shape index: {}]   ;;  %s8726_s6 = inlined_call_operand.vmem [shape: f32[1,32], index: 6, kind: input, shape index: {}]   ;;  %s8727_s7 = inlined_call_operand.vmem [shape: f32[8,32], index: 7, kind: input, shape index: {}]   ;;  %s8728_s8 = inlined_call_operand.vmem [shape: f32[1,32], index: 8, kind: input, shape index: {}]   ;;  %s8729_s9 = inlined_call_operand.vmem [shape: bf16[32,1024], index: 9, kind: input, shape index: {}]   ;;  %s8730_s10 = inlined_call_operand.vmem [shape: f32[1,1024], index: 10, kind: input, shape index: {}]   ;;  %s8731_s11 = inlined_call_operand.vmem [shape: f32[1,32], index: 11, kind: input, shape index: {}]   ;;  %s8732_s12 = inlined_call_operand.vmem [shape: f32[32,32], index: 12, kind: input, shape index: {}]   ;;  %s8733_s13 = inlined_call_operand.vmem [shape: f32[32,32], index: 13, kind: input, shape index: {}]   ;;  %s8734_s14 = inlined_call_operand.vmem [shape: f32[32,32], index: 14, kind: input, shape index: {}]   ;;  %s8735_s15 = inlined_call_operand.vmem [shape: f32[1,32], index: 15, kind: input, shape index: {}]   ;;  %s8736_s16 = inlined_call_operand.vmem [shape: f32[1,32], index: 16, kind: input, shape index: {}]   ;;  %s8737_s17 = inlined_call_operand.vmem [shape: f32[1,32], index: 17, kind: input, shape index: {}]   ;;  %s8738_s18 = inlined_call_operand.vmem [shape: f32[32,32], index: 18, kind: input, shape index: {}]   ;;  %s8739_s19 = inlined_call_operand.vmem [shape: f32[32,32], index: 19, kind: input, shape index: {}]   ;;  %s8740_s20 = inlined_call_operand.vmem [shape: f32[32,32], index: 20, kind: input, shape index: {}]   ;;  %s8741_s21 = inlined_call_operand.vmem [shape: f32[1,32], index: 21, kind: input, shape index: {}]   ;;  %s8742_s22 = inlined_call_operand.vmem [shape: f32[1,32], index: 22, kind: input, shape index: {}]   ;;  %s8743_s23 = inlined_call_operand.vmem [shape: f32[1,32], index: 23, kind: input, shape index: {}]   ;;  %s8744_s24 = inlined_call_operand.vmem [shape: bf16[32,1024], index: 24, kind: input, shape index: {}]   ;;  %s8745_s25 = inlined_call_operand.vmem [shape: bf16[1024,32], index: 25, kind: input, shape index: {}]   ;;  %s8746_s26 = inlined_call_operand.hbm [shape: f32[2,4,32], index: 26, kind: output, shape index: {}]  }
   0x1   :  { %8936 = sst [smem:[#allocation137_spill]] %s8720_s0 }
   0x2   :  { %8937 = sst [smem:[#allocation138_spill]] %s8721_s1 }
   0x3   :  { %8938 = sst [smem:[#allocation139_spill]] %s8722_s2 }
   0x4   :  { %8939 = sst [smem:[#allocation140_spill]] %s8723_s3 }
   0x5   :  { %8940 = sst [smem:[#allocation141_spill]] %s8724_s4 }
   0x6   :  { %8941 = sst [smem:[#allocation142_spill]] %s8725_s5 }
   0x7   :  { %8942 = sst [smem:[#allocation143_spill]] %s8726_s6 }
   0x8   :  { %8943 = sst [smem:[#allocation144_spill]] %s8727_s7 }
   0x9   :  { %8944 = sst [smem:[#allocation145_spill]] %s8728_s8 }
   0xa   :  { %8945 = sst [smem:[#allocation146_spill]] %s8729_s9 }
   0xb   :  { %8946 = sst [smem:[#allocation147_spill]] %s8730_s10 }
   0xc   :  { %8947 = sst [smem:[#allocation148_spill]] %s8731_s11 }
   0xd   :  { %8948 = sst [smem:[#allocation149_spill]] %s8746_s26 }
   0xe   :  { %31 = vsyncpa [#allocation3], 0 }
   0xf   :  { %33 = vsyncpa [#allocation3 + $0x1], 0  ;;  %s6914_s27 = smov 0   ;;  %s6916_s3 = smov 0  }
  0x10   :  { %s6918_s7 = smov 0   ;;  %s6920_s28 = smov 0  }
  0x11 LB: > { %8949 = sst [smem:[#allocation5_spill]] %s6761_s27  ;;  %s6935_s8 = sadd.s32 4294967295, %s6773_s28   ;;  %s6773_s28 = sphi %s6920_s28, %s9263_s28   ;;  %s6769_s7 = sphi %s6918_s7, %s9265_s7   ;;  %s6765_s3 = sphi %s6916_s3, %s9267_s3   ;;  %s6761_s27 = sphi %s6914_s27, %s9266_s27  }
  0x12   : > { %8950 = sst [smem:[#allocation6_spill]] %s6769_s7  ;;  %s5494_s4 = sadd.s32 4294967294, %s6773_s28  }
  0x13   : > { %8951 = sst [smem:[#allocation7_spill]] %s6773_s28  ;;  %s6939_s29 = sadd.s32 1, %s6773_s28  }
  0x14   : > { %8952 = sst [smem:[#allocation8_spill]] %s6935_s8  ;;  %s617_s0 = sadd.s32 1, %s6769_s7 }
  0x15   : > { %8953 = sst [smem:[#allocation9_spill]] %s6939_s29  ;;  %s614_s9 = ssub.s32 %s6773_s28, %s6939_s29 }
  0x16   : > { %p627_p0 = scmp.ne.s32.totalorder %s6769_s7, %s6765_s3  ;;  %p615_p1 = scmp.eq.s32.totalorder %s614_s9, 0 }
  0x17   : > { %p628_p2 = scmp.eq.s32.totalorder %s6935_s8, 1  ;;  %p633_p3 = scmp.ne.s32.totalorder %s6765_s3, %s6761_s27 }
  0x18   : > { %p634_p4 = scmp.eq.s32.totalorder %s5494_s4, 1  ;;  %p5497_p7 = scmp.ge.s32.totalorder %s6773_s28, 1 }
  0x19   : > { %s6950_s30 = scalar_select %p615_p1, %s6769_s7, %s617_s0  }
  0x1a   : > { %p6952_p5 = por %p628_p2, %p627_p0  ;;  %p6956_p6 = por %p634_p4, %p633_p3 }
  0x1b   : > { %8954 = sst [smem:[#allocation10_spill]] %s6950_s30  ;;  %p754_p8 = scmp.lt.s32.totalorder %s6773_s28, 3 }
  0x1c   : > { %s8955_s2 = scalar_select %p6952_p5, 1, 0 }
  0x1d   : > { %s8957_s5 = scalar_select %p6956_p6, 1, 0 }
  0x1e   : > { %8956 = sst [smem:[#allocation11_spill]] %s8955_s2  ;;  %p755_p9 = pnand %p5497_p7, %p754_p8 }
  0x1f   : > { %8958 = sst [smem:[#allocation12_spill]] %s8957_s5 }
  0x20   : > { %758 = sbr.rel (%p755_p9) target bundleno = 3847 (0xf07), region = 124 }
  0x25   : > { %s8959_s1 = sld [smem:[#allocation144_spill]]  ;;  %p843_p10 = scmp.lt.s32.totalorder %s6935_s8, 1  ;;  %vm1188_vm0 = vcmask 64512   ;;  %vm1092_vm1 = vcmask 130048   ;;  %v8760_v25 = vmov 0   ;;  %vm1430_vm2 = vcmask 261120  }
  0x26   : > { %s8960_s9 = sld [smem:[#allocation142_spill]]  ;;  %vm6777_vm3 = vmmov 0   ;;  %vm5371_vm4 = vcmask 257024  }
  0x27   : > { %s6973_s29 = scalar_select %p843_p10, %s6935_s8, 1 }
  0x28   : > { %s8961_s0 = sld [smem:[#allocation138_spill]] }
  0x29   : > { %s5713_s10 = sshll.u32 %s6973_s29, 5  ;;  %s5712_s6 = sshll.u32 %s6973_s29, 4 }
  0x2a   : > { %s8962_s30 = sld [smem:[#allocation137_spill]] }
  0x2b   : > { %v1180_v0 = vld [vmem:[%s8959_s1] sm:$0xff]  ;;  %s8963_s2 = sld [smem:[#allocation139_spill]] }
  0x2c   : > { %v1084_v1 = vld [vmem:[%s8960_s9 + $0x8] sm:$0xff]  ;;  %v1083_v2 = vld [vmem:[%s8960_s9] sm:$0xff]  ;;  %6196 = vmatprep.subr.mxu1 %v1180_v0  ;;  %s8964_s28 = sld [smem:[#allocation146_spill]] }
  0x2d   : > { %6189 = vmatprep.subr.mxu0 %v1084_v1  ;;  %6197 = vmatpush3.msra.mxu1 %v1180_v0  ;;  %s8967_s4 = sld [smem:[#allocation143_spill]] }
  0x2e   : > { %6190 = vmatpush3.msra.mxu0 %v1084_v1  ;;  %s852_s5 = scalar_lea.vmem %s8961_s0, %s5713_s10  ;;  %s8966_s10 = sld [smem:[#allocation145_spill]] }
  0x2f   : > { %6191 = vmatprep.subr.mxu0 %v1083_v2  ;;  %v1176_v3 = vld [vmem:[%s852_s5] sm:$0xff]  ;;  %v1177_v4 = vld [vmem:[%s852_s5 + $0x8] sm:$0xff]  ;;  %v1178_v5 = vld [vmem:[%s852_s5 + $0x10] sm:$0xff]  ;;  %s8985_s0 = sld [smem:[#allocation147_spill]] }
  0x30   : > { %6192 = vmatpush3.msra.mxu0 %v1083_v2  ;;  %s847_s9 = scalar_lea.vmem %s8962_s30, %s5712_s6  ;;  %6198 = vmatprep.mubr.msk.f32.mxu1 %vm1188_vm0, %v1176_v3  ;;  %v1179_v7 = vld [vmem:[%s852_s5 + $0x18] sm:$0xff]  ;;  %v906_v3 = vld [vmem:[%s8744_s24 + $0x40] sm:$0xff]  ;;  %s9052_s1 = sld [smem:[#allocation140_spill]] }
  0x31   : > { %s6986_s8 = scalar_lea.vmem %s8963_s2, %s5712_s6  ;;  %6199 = vmatmul.mubr.msk.f32.vlgmr.msra.gmra.mxu1 %vm1188_vm0, %v1177_v4  ;;  %v1081_v6 = vld [vmem:[%s847_s9] sm:$0xff]  ;;  %v1082_v8 = vld [vmem:[%s847_s9 + $0x8] sm:$0xff]  ;;  %s9054_s11 = sld [smem:[#allocation148_spill]] }
  0x32   : > { %6201 = vmatprep.mubr.msk.f32.mxu1 %vm1188_vm0, %v1178_v5  ;;  %6193 = vmatprep.mubr.msk.f32.mxu0 %vm1092_vm1, %v1081_v6  ;;  %s8965_s2 = smov %s8964_s28  ;;  %v1300_v9 = vld [vmem:[%s8964_s28 + $0x40] sm:$0xff]  ;;  %v6492_v2 = vld [vmem:[%s6986_s8 + $0x8] sm:$0xff]   ;;  %s5715_s28 = sshll.u32 %s6973_s29, 3 }
  0x33   : > { %6194 = vmatmul.mubr.msk.f32.vlgmr.msra.gmra.mxu0 %vm1092_vm1, %v1082_v8  ;;  %v1304_v10 = vld [vmem:[%s8965_s2 + $0x60] sm:$0xff]  ;;  %v1301_v11 = vld [vmem:[%s8965_s2 + $0x48] sm:$0xff]  ;;  %v1302_v26 = vld [vmem:[%s8965_s2 + $0x50] sm:$0xff] }
  0x34   : > { %v5528_v12 = vcombine.high %v1300_v9, %v1304_v10  ;;  %v1305_v13 = vld [vmem:[%s8965_s2 + $0x68] sm:$0xff]  ;;  %v5527_v14 = vcombine.low %v1300_v9, %v1304_v10  ;;  %v1292_v17 = vld [vmem:[%s8965_s2] sm:$0xff]  ;;  %1522 = vmatprep.mubr.bf16.mxu0 %v8760_v25  ;;  %v1306_v27 = vld [vmem:[%s8965_s2 + $0x70] sm:$0xff] }
  0x35   : > { %6202 = vmatmul.mubr.msk.f32.gmra.mxu1 %vm1188_vm0, %v1179_v7  ;;  %v5529_v15 = vcombine.low %v1301_v11, %v1305_v13  ;;  %v5530_v16 = vcombine.high %v1301_v11, %v1305_v13  ;;  %v1296_v18 = vld [vmem:[%s8965_s2 + $0x20] sm:$0xff]  ;;  %v1293_v19 = vld [vmem:[%s8965_s2 + $0x8] sm:$0xff]  ;;  %v1303_v28 = vld [vmem:[%s8965_s2 + $0x58] sm:$0xff]  ;;  %v5532_v29 = vcombine.high %v1302_v26, %v1306_v27  ;;  %v5531_v31 = vcombine.low %v1302_v26, %v1306_v27 }
  0x36   : > { %1449 = vmatprep.subr.bf16.mxu1 %v5528_v12  ;;  %v5520_v20 = vcombine.high %v1292_v17, %v1296_v18  ;;  %v1297_v21 = vld [vmem:[%s8965_s2 + $0x28] sm:$0xff]  ;;  %v5519_v22 = vcombine.low %v1292_v17, %v1296_v18  ;;  %1469 = vmatprep.mubr.bf16.mxu1 %v8760_v25  ;;  %v1307_v30 = vld [vmem:[%s8965_s2 + $0x78] sm:$0xff]  ;;  %v5514_v34 = vld [vmem:[%s8966_s10] ss:$0 sm:$0xff] }
  0x37   : > { %1502 = vmatprep.subr.bf16.mxu0 %v5530_v16  ;;  %1450 = vmatpush1.bf16.msra.mxu1 %v5527_v14  ;;  %v5521_v23 = vcombine.low %v1293_v19, %v1297_v21  ;;  %v5522_v24 = vcombine.high %v1293_v19, %v1297_v21  ;;  %v5533_v32 = vcombine.low %v1303_v28, %v1307_v30  ;;  %v5511_v37 = vld [vmem:[%s8967_s4] ss:$0 sm:$0xff]  ;;  %v1294_v43 = vld [vmem:[%s8965_s2 + $0x10] sm:$0xff]  ;;  %v1295_v48 = vld [vmem:[%s8965_s2 + $0x18] sm:$0xff]  ;;  %s7760_s4 = scalar_lea.vmem %s9052_s1, %s5715_s28  ;;  %s840_s28 = sand.u32 1, %s6765_s3  }
  0x38   : > { %1503 = vmatpush1.bf16.msra.mxu0 %v5529_v15  ;;  %1451 = vmatprep.subr.bf16.mxu1 %v5520_v20  ;;  %v5534_v33 = vcombine.high %v1303_v28, %v1307_v30  ;;  %v1298_v47 = vld [vmem:[%s8965_s2 + $0x30] sm:$0xff]  ;;  %v1299_v49 = vld [vmem:[%s8965_s2 + $0x38] sm:$0xff]  ;;  %v6493_v1 = vld [vmem:[%s6986_s8] sm:$0xff]   ;;  %s5498_s10 = sshll.u32 %s840_s28, 2  ;;  %s9259_s2 = sld [smem:[#allocation149_spill]] }
  0x39   : > { %1504 = vmatprep.subr.bf16.mxu0 %v5522_v24  ;;  %v5524_v56 = vcombine.high %v1294_v43, %v1298_v47  ;;  %v5526_v57 = vcombine.high %v1295_v48, %v1299_v49  ;;  %v5523_v61 = vcombine.low %v1294_v43, %v1298_v47  ;;  %v5525_v62 = vcombine.low %v1295_v48, %v1299_v49  ;;  %v910_v4 = vld [vmem:[%s8744_s24 + $0x60] sm:$0xff]  ;;  %v907_v5 = vld [vmem:[%s8744_s24 + $0x48] sm:$0xff]  ;;  %v908_v19 = vld [vmem:[%s8744_s24 + $0x50] sm:$0xff]  ;;  %s842_s1 = scalar_lea.vmem [#allocation2], %s5498_s10 }
  0x3a   : > { %v7085_v6 = vcombine.high %v906_v3, %v910_v4  ;;  %v911_v7 = vld [vmem:[%s8744_s24 + $0x68] sm:$0xff]  ;;  %v7090_v8 = vcombine.low %v906_v3, %v910_v4  ;;  %v898_v11 = vld [vmem:[%s8744_s24] sm:$0xff]  ;;  %v912_v20 = vld [vmem:[%s8744_s24 + $0x70] sm:$0xff]  ;;  %s5387_s5 = sshll.u32 %s842_s1, 4  ;;  %s8681_s5 = int_to_ptr.vmem [resolvable:$true] %s5387_s5 }
  0x3b   : > { %1452 = vmatpush1.bf16.msra.mxu1 %v5519_v22  ;;  %v7092_v9 = vcombine.low %v907_v5, %v911_v7  ;;  %v7094_v10 = vcombine.high %v907_v5, %v911_v7  ;;  %v902_v12 = vld [vmem:[%s8744_s24 + $0x20] sm:$0xff]  ;;  %v899_v13 = vld [vmem:[%s8744_s24 + $0x8] sm:$0xff]  ;;  %v909_v21 = vld [vmem:[%s8744_s24 + $0x58] sm:$0xff]  ;;  %v7133_v22 = vcombine.high %v908_v19, %v912_v20  ;;  %v7138_v24 = vcombine.low %v908_v19, %v912_v20  ;;  %s6713_s7 = scalar_lea.vmem %s8681_s5, 64 }
  0x3c   : > { %1505 = vmatpush1.bf16.msra.mxu0 %v5521_v23  ;;  %1555 = vmatprep.subr.bf16.mxu1 %v5532_v29  ;;  %8968 = vst [vmem:[#allocation13_spill] sm:$0xff] %v7085_v6  ;;  %8969 = vst [vmem:[#allocation14_spill] sm:$0xff] %v7090_v8  ;;  %v7109_v14 = vcombine.high %v898_v11, %v902_v12  ;;  %v903_v15 = vld [vmem:[%s8744_s24 + $0x28] sm:$0xff]  ;;  %v7114_v16 = vcombine.low %v898_v11, %v902_v12  ;;  %v913_v23 = vld [vmem:[%s8744_s24 + $0x78] sm:$0xff]  ;;  %p6714_p11 = scmp.ne.s32.totalorder %s8681_s5, %s6713_s7 }
  0x3d   : > { %1608 = vmatprep.subr.bf16.mxu0 %v5534_v33  ;;  %8970 = vst [vmem:[#allocation15_spill] sm:$0xff] %v7092_v9  ;;  %8971 = vst [vmem:[#allocation16_spill] sm:$0xff] %v7094_v10  ;;  %v7116_v17 = vcombine.low %v899_v13, %v903_v15  ;;  %v7118_v18 = vcombine.high %v899_v13, %v903_v15  ;;  %v7140_v26 = vcombine.low %v909_v21, %v913_v23  ;;  %v900_v47 = vld [vmem:[%s8744_s24 + $0x10] sm:$0xff]  ;;  %v901_v49 = vld [vmem:[%s8744_s24 + $0x18] sm:$0xff] }
  0x3e   : > { %8972 = vst [vmem:[#allocation17_spill] sm:$0xff] %v7109_v14  ;;  %8973 = vst [vmem:[#allocation18_spill] sm:$0xff] %v7114_v16  ;;  %v7142_v27 = vcombine.high %v909_v21, %v913_v23  ;;  %v904_v48 = vld [vmem:[%s8744_s24 + $0x30] sm:$0xff]  ;;  %v6502_v4 = vld [vmem:[%s8745_s25 + $0x68] sm:$0xff]   ;;  %p6715_p12 = pnand %p6714_p11, %p6952_p5 }
  0x3f   : > { %8974 = vst [vmem:[#allocation19_spill] sm:$0xff] %v7116_v17  ;;  %8975 = vst [vmem:[#allocation20_spill] sm:$0xff] %v7118_v18  ;;  %v6501_v3 = vld [vmem:[%s8745_s25 + $0xb0] sm:$0xff]   ;;  %v6503_v5 = vld [vmem:[%s8745_s25 + $0xe8] sm:$0xff]  }
  0x40   : > { %8976 = vst [vmem:[#allocation21_spill] sm:$0xff] %v7133_v22  ;;  %8977 = vst [vmem:[#allocation22_spill] sm:$0xff] %v7138_v24  ;;  %v6504_v7 = vld [vmem:[%s8745_s25 + $0x28] sm:$0xff]   ;;  %v6506_v12 = vld [vmem:[%s8745_s25 + $0x60] sm:$0xff]   ;;  %p6716_p13 = pneg %p6715_p12 }
  0x41   : > { %8978 = vst [vmem:[#allocation23_spill] sm:$0xff] %v7140_v26  ;;  %8979 = vst [vmem:[#allocation24_spill] sm:$0xff] %v7142_v27  ;;  %v6505_v11 = vld [vmem:[%s8745_s25 + $0xa8] sm:$0xff]   ;;  %v6507_v13 = vld [vmem:[%s8745_s25 + $0xe0] sm:$0xff]  }
  0x42   : > { %v6508_v15 = vld [vmem:[%s8745_s25 + $0x20] sm:$0xff]   ;;  %v6510_v20 = vld [vmem:[%s8745_s25 + $0x58] sm:$0xff]  }
  0x43   : > { %v6509_v19 = vld [vmem:[%s8745_s25 + $0xa0] sm:$0xff]   ;;  %v6511_v21 = vld [vmem:[%s8745_s25 + $0xd8] sm:$0xff]  }
  0x44   : > { %v6512_v23 = vld [vmem:[%s8745_s25 + $0x18] sm:$0xff]  }
  0xf1   : > { %v6200_v35 = vpop.f32.mrf.mxu1 }
  0xf2   : > { %v1273_v36 = vadd.f32 %v6200_v35, %v5514_v34 }
  0xf3   : > { %v1267_v38 = vpop.f32.mrf.mxu1  ;;  %v6195_v39 = vpop.f32.mrf.mxu0 }
  0xf4   : > { %v1268_v40 = vadd.f32 %v5514_v34, %v1267_v38  ;;  %v1171_v42 = vadd.f32 %v6195_v39, %v5511_v37  ;;  %v1287_v45 = vmax.f32 %v1273_v36, 0.0 }
  0xf5   : > { %v6203_v41 = vpop.f32.mrf.mxu1  ;;  %v1165_v44 = vpop.f32.mrf.mxu0 }
  0xf6   : > { %v1286_v46 = vmax.f32 %v1268_v40, 0.0  ;;  %v1166_v50 = vadd.f32 %v5511_v37, %v1165_v44  ;;  %v1283_v53 = vadd.f32 %v6203_v41, %v5514_v34  ;;  %v7050_v55 = vmax.f32 %v1171_v42, 0.0 }
  0xf7   : > { %v1277_v51 = vpop.f32.mrf.mxu1 }
  0xf8   : > { %v1290_v52 = vpack.c.bf16 %v1287_v45, %v1286_v46  ;;  %v1278_v54 = vadd.f32 %v5514_v34, %v1277_v51  ;;  %v7052_v58 = vmax.f32 %v1166_v50, 0.0  ;;  %v1289_v59 = vmax.f32 %v1283_v53, 0.0  ;;  %v905_v50 = vld [vmem:[%s8744_s24 + $0x38] sm:$0xff] }
  0xf9   : > { %v7190_v53 = vcombine.high %v900_v47, %v904_v48 }
  0xfa   : > { %5535 = vmatmul.mubr.msk.bf16.vlgmr.msra.gmra.mxu1 %vm1430_vm2, %v1290_v52  ;;  %5537 = vmatmul.mubr.msk.bf16.vlgmr.msra.gmra.mxu0 %vm1430_vm2, %v1290_v52  ;;  %v1288_v60 = vmax.f32 %v1278_v54, 0.0  ;;  %v1649_v63 = vpack.c.bf16 %v7050_v55, %v7052_v58  ;;  %v7192_v54 = vcombine.high %v901_v49, %v905_v50 }
  0xfb   : > { %1479 = vmatprep.mubr.bf16.mxu1 %v8760_v25  ;;  %1532 = vmatprep.mubr.bf16.mxu0 %v8760_v25  ;;  %8980 = vst [vmem:[#allocation25_spill] sm:$0xff] %v7190_v53 }
  0xfc   : > { %1556 = vmatpush1.bf16.msra.mxu1 %v5531_v31  ;;  %1609 = vmatpush1.bf16.msra.mxu0 %v5533_v32  ;;  %v1291_v0 = vpack.c.bf16 %v1289_v59, %v1288_v60  ;;  %8981 = vst [vmem:[#allocation26_spill] sm:$0xff] %v7192_v54  ;;  %v6494_v59 = vld [vmem:[%s8745_s25 + $0x78] sm:$0xff]  }
  0xfd   : > { %1557 = vmatprep.subr.bf16.mxu1 %v5524_v56  ;;  %1610 = vmatprep.subr.bf16.mxu0 %v5526_v57  ;;  %v7200_v56 = vcombine.low %v900_v47, %v904_v48  ;;  %v7202_v57 = vcombine.low %v901_v49, %v905_v50  ;;  %v6495_v60 = vld [vmem:[%s8745_s25 + $0xf8] sm:$0xff]   ;;  %v6516_v47 = vld [vmem:[%s8745_s25 + $0x10] sm:$0xff]   ;;  %v6518_v49 = vld [vmem:[%s8745_s25 + $0x48] sm:$0xff]  }
  0xfe   : > { %v6517_v48 = vld [vmem:[%s8745_s25 + $0x90] sm:$0xff]   ;;  %v6519_v50 = vld [vmem:[%s8745_s25 + $0xc8] sm:$0xff]  }
  0xff   : > { %8982 = vst [vmem:[#allocation27_spill] sm:$0xff] %v7200_v56  ;;  %8983 = vst [vmem:[#allocation28_spill] sm:$0xff] %v7202_v57 }
 0x100   : > { %1558 = vmatpush1.bf16.msra.mxu1 %v5523_v61  ;;  %1611 = vmatpush1.bf16.msra.mxu0 %v5525_v62  ;;  %v6496_v62 = vld [vmem:[%s8745_s25 + $0x38] sm:$0xff]  }
 0x101   : > { %6204 = vmatprep.subr.bf16.mxu1 %v1649_v63  ;;  %1815 = vmatprep.subr.bf16.mxu0 %v7085_v6 }
 0x102   : > { %5536 = vmatmul.mubr.msk.bf16.gmra.mxu1 %vm1430_vm2, %v1291_v0  ;;  %5538 = vmatmul.mubr.msk.bf16.gmra.mxu0 %vm1430_vm2, %v1291_v0 }
 0x103   : > { %1575 = vmatprep.mubr.bf16.mxu1 %v8760_v25  ;;  %1628 = vmatprep.mubr.bf16.mxu0 %v8760_v25 }
 0x10a   : > { %5539 = vmatmul.mubr.msk.bf16.vlgmr.msra.gmra.mxu1 %vm1430_vm2, %v1290_v52  ;;  %5541 = vmatmul.mubr.msk.bf16.vlgmr.msra.gmra.mxu0 %vm1430_vm2, %v1290_v52 }
 0x10b   : > { %6205 = vmatpush3.bf16.msra.mxu1 %v1649_v63  ;;  %1585 = vmatprep.mubr.bf16.mxu1 %v8760_v25  ;;  %v6497_v63 = vld [vmem:[%s8745_s25 + $0xb8] sm:$0xff]  }
 0x10c   : > { %1638 = vmatprep.mubr.bf16.mxu0 %v8760_v25  ;;  %1868 = vmatprep.subr.bf16.mxu1 %v7094_v10 }
 0x10d   : > { %1816 = vmatpush1.bf16.msra.mxu0 %v7090_v8 }
 0x10e   : > { %1817 = vmatprep.subr.bf16.mxu0 %v7109_v14 }
 0x111   : > { %1818 = vmatpush1.bf16.msra.mxu0 %v7114_v16 }
 0x112   : > { %5540 = vmatmul.mubr.msk.bf16.gmra.mxu1 %vm1430_vm2, %v1291_v0  ;;  %5542 = vmatmul.mubr.msk.bf16.gmra.mxu0 %vm1430_vm2, %v1291_v0  ;;  %v6498_v0 = vld [vmem:[%s8745_s25 + $0x70] sm:$0xff]  }
 0x113   : > { %6206 = vmatprep.mubr.msk.bf16.mxu1 %vm1092_vm1, %v6493_v1  ;;  %1835 = vmatprep.mubr.bf16.mxu0 %v8760_v25  ;;  %v6499_v1 = vld [vmem:[%s8745_s25 + $0xf0] sm:$0xff]  }
 0x114   : > { %1921 = vmatprep.subr.bf16.mxu0 %v7133_v22 }
 0x11a   : > { %6207 = vmatmul.mubr.msk.bf16.vlgmr.msra.gmra.mxu1 %vm1092_vm1, %v6492_v2  ;;  %v6500_v2 = vld [vmem:[%s8745_s25 + $0x30] sm:$0xff]  }
 0x11b   : > { %1888 = vmatprep.mubr.bf16.mxu1 %v8760_v25  ;;  %1869 = vmatpush1.bf16.msra.mxu1 %v7092_v9 }
 0x11c   : > { %1870 = vmatprep.subr.bf16.mxu1 %v7118_v18 }
 0x11f   : > { %1871 = vmatpush1.bf16.msra.mxu1 %v7116_v17 }
 0x120   : > { %1974 = vmatprep.subr.bf16.mxu1 %v7142_v27 }
 0x1ba   : > { %v7146_v28 = vpop.f32.mrf.mxu1 }
 0x1bc   : > { %v7148_v29 = vpop.f32.mrf.mxu1 }
 0x1be   : > { %v7150_v30 = vpop.f32.mrf.mxu1 }
 0x1c0   : > { %v7152_v31 = vpop.f32.mrf.mxu1 }
 0x1c2   : > { %v7154_v32 = vpop.f32.mrf.mxu1 }
 0x1c4   : > { %v7156_v33 = vpop.f32.mrf.mxu1 }
 0x1c6   : > { %v7158_v34 = vpop.f32.mrf.mxu1 }
 0x1c8   : > { %v7160_v35 = vpop.f32.mrf.mxu1 }
 0x1ca   : > { %v7162_v36 = vpop.f32.mrf.mxu1 }
 0x1cc   : > { %v7164_v37 = vpop.f32.mrf.mxu1 }
 0x1ce   : > { %v7166_v38 = vpop.f32.mrf.mxu1 }
 0x1d0   : > { %v7168_v39 = vpop.f32.mrf.mxu1 }
 0x1d2   : > { %v7170_v40 = vpop.f32.mrf.mxu1 }
 0x1d4   : > { %v7172_v41 = vpop.f32.mrf.mxu1 }
 0x1d6   : > { %v7174_v42 = vpop.f32.mrf.mxu1 }
 0x1d8   : > { %v7176_v43 = vpop.f32.mrf.mxu1 }
 0x1da   : > { %v6208_v44 = vpop.f32.mrf.mxu1 }
 0x1dc   : > { %v1700_v45 = vpop.f32.mrf.mxu1 }
 0x1de   : > { %v6209_v46 = vpop.f32.mrf.mxu1 }
 0x1df   : > { %v1716_v61 = vpack.c.bf16 %v6209_v46, %v6208_v44  ;;  %v6513_v44 = vld [vmem:[%s8745_s25 + $0x98] sm:$0xff]   ;;  %v6515_v46 = vld [vmem:[%s8745_s25 + $0xd0] sm:$0xff]  }
 0x1e0   : > { %v1703_v51 = vpop.f32.mrf.mxu1 }
 0x1e1   : > { %v1715_v52 = vpack.c.bf16 %v1703_v51, %v1700_v45  ;;  %v6514_v45 = vld [vmem:[%s8745_s25 + $0x50] sm:$0xff]   ;;  %v6520_v51 = vld [vmem:[%s8745_s25 + $0x8] sm:$0xff]  }
 0x1e3   : > { %5563 = vmatmul.mubr.msk.bf16.vlgmr.msra.gmra.mxu0 %vm1430_vm2, %v1715_v52  ;;  %5565 = vmatmul.mubr.msk.bf16.vlgmr.msra.gmra.mxu1 %vm1430_vm2, %v1715_v52 }
 0x1e4   : > { %1845 = vmatprep.mubr.bf16.mxu0 %v8760_v25  ;;  %1898 = vmatprep.mubr.bf16.mxu1 %v8760_v25 }
 0x1e5   : > { %1922 = vmatpush1.bf16.msra.mxu0 %v7138_v24  ;;  %1975 = vmatpush1.bf16.msra.mxu1 %v7140_v26 }
 0x1e6   : > { %1923 = vmatprep.subr.bf16.mxu0 %v7190_v53  ;;  %1976 = vmatprep.subr.bf16.mxu1 %v7192_v54 }
 0x1e9   : > { %1924 = vmatpush1.bf16.msra.mxu0 %v7200_v56  ;;  %1977 = vmatpush1.bf16.msra.mxu1 %v7202_v57 }
 0x1ea   : > { %5728 = vmatprep.subr.bf16.mxu0 %v6494_v59  ;;  %5756 = vmatprep.subr.bf16.mxu1 %v6495_v60  ;;  %v6522_v59 = vld [vmem:[%s8745_s25 + $0x40] sm:$0xff]  }
 0x1eb   : > { %5564 = vmatmul.mubr.msk.bf16.gmra.mxu0 %vm1430_vm2, %v1716_v61  ;;  %5566 = vmatmul.mubr.msk.bf16.gmra.mxu1 %vm1430_vm2, %v1716_v61  ;;  %v6523_v60 = vld [vmem:[%s8745_s25 + $0xc0] sm:$0xff]  }
 0x1ec   : > { %1941 = vmatprep.mubr.bf16.mxu0 %v8760_v25  ;;  %1994 = vmatprep.mubr.bf16.mxu1 %v8760_v25 }
 0x1f3   : > { %5567 = vmatmul.mubr.msk.bf16.vlgmr.msra.gmra.mxu0 %vm1430_vm2, %v1715_v52  ;;  %5569 = vmatmul.mubr.msk.bf16.vlgmr.msra.gmra.mxu1 %vm1430_vm2, %v1715_v52  ;;  %v6521_v52 = vld [vmem:[%s8745_s25 + $0x88] sm:$0xff]  }
 0x1f4   : > { %1951 = vmatprep.mubr.bf16.mxu0 %v8760_v25  ;;  %2004 = vmatprep.mubr.bf16.mxu1 %v8760_v25 }
 0x1f5   : > { %5729 = vmatpush3.bf16.msra.mxu0 %v6496_v62  ;;  %5757 = vmatpush3.bf16.msra.mxu1 %v6497_v63  ;;  %v6525_v62 = vld [vmem:[%s8745_s25 + $0x80] sm:$0xff]   ;;  %v6526_v63 = vld [vmem:[%s8745_s25 + $0x178] sm:$0xff]  }
 0x1f6   : > { %5730 = vmatprep.subr.bf16.mxu0 %v6498_v0  ;;  %5758 = vmatprep.subr.bf16.mxu1 %v6499_v1  ;;  %v6527_v0 = vld [vmem:[%s8745_s25 + $0x1f8] sm:$0xff]   ;;  %v1524_v1 = vpop.f32.mrf.mxu0 }
 0x1f9   : > { %5731 = vmatpush3.bf16.msra.mxu0 %v6500_v2  ;;  %5759 = vmatpush3.bf16.msra.mxu1 %v6501_v3  ;;  %v1526_v2 = vpop.f32.mrf.mxu0 }
 0x1fa   : > { %5732 = vmatprep.subr.bf16.mxu0 %v6502_v4  ;;  %5760 = vmatprep.subr.bf16.mxu1 %v6503_v5 }
 0x1fb   : > { %5568 = vmatmul.mubr.msk.bf16.gmra.mxu0 %vm1430_vm2, %v1716_v61  ;;  %5570 = vmatmul.mubr.msk.bf16.gmra.mxu1 %vm1430_vm2, %v1716_v61  ;;  %v6524_v61 = vld [vmem:[%s8745_s25] sm:$0xff]   ;;  %v1528_v3 = vpop.f32.mrf.mxu0 }
 0x1fd   : > { %5733 = vmatpush3.bf16.msra.mxu0 %v6504_v7  ;;  %5761 = vmatpush3.bf16.msra.mxu1 %v6505_v11  ;;  %v1530_v4 = vpop.f32.mrf.mxu0 }
 0x1fe   : > { %5734 = vmatprep.subr.bf16.mxu0 %v6506_v12  ;;  %5762 = vmatprep.subr.bf16.mxu1 %v6507_v13 }
 0x1ff   : > { %v7320_v5 = vpop.f32.mrf.mxu0 }
 0x201   : > { %5735 = vmatpush3.bf16.msra.mxu0 %v6508_v15  ;;  %5763 = vmatpush3.bf16.msra.mxu1 %v6509_v19  ;;  %v1536_v7 = vpop.f32.mrf.mxu0 }
 0x202   : > { %5736 = vmatprep.subr.bf16.mxu0 %v6510_v20  ;;  %5764 = vmatprep.subr.bf16.mxu1 %v6511_v21 }
 0x203   : > { %v7322_v11 = vpop.f32.mrf.mxu0 }
 0x205   : > { %5737 = vmatpush3.bf16.msra.mxu0 %v6512_v23  ;;  %5765 = vmatpush3.bf16.msra.mxu1 %v6513_v44  ;;  %v7324_v12 = vpop.f32.mrf.mxu0  ;;  %v1053_v23 = vlaneseq }
 0x206   : > { %5738 = vmatprep.subr.bf16.mxu0 %v6514_v45  ;;  %5766 = vmatprep.subr.bf16.mxu1 %v6515_v46 }
 0x207   : > { %v7326_v13 = vpop.f32.mrf.mxu0  ;;  %v7338_v45 = vshrl.u32 %v1053_v23, 7 }
 0x209   : > { %5739 = vmatpush3.bf16.msra.mxu0 %v6516_v47  ;;  %5767 = vmatpush3.bf16.msra.mxu1 %v6517_v48  ;;  %v7328_v15 = vpop.f32.mrf.mxu0  ;;  %v1316_v47 = vsub.s32 1, %v7338_v45  ;;  %v1324_v48 = vsub.s32 3, %v7338_v45 }
 0x20a   : > { %5740 = vmatprep.subr.bf16.mxu0 %v6518_v49  ;;  %5768 = vmatprep.subr.bf16.mxu1 %v6519_v50  ;;  %v7345_v49 = vsub.s32 0, %v7338_v45  ;;  %v1320_v50 = vsub.s32 2, %v7338_v45 }
 0x20b   : > { %v7330_v19 = vpop.f32.mrf.mxu0 }
 0x20c   : > { %8984 = vst [vmem:[#allocation29_spill] sm:$0xff] %v7345_v49 }
 0x20d   : > { %5741 = vmatpush3.bf16.msra.mxu0 %v6520_v51  ;;  %5769 = vmatpush3.bf16.msra.mxu1 %v6521_v52  ;;  %v7332_v20 = vpop.f32.mrf.mxu0  ;;  %v7353_v52 = vld [vmem:[%s8985_s0] sm:$0xff]  ;;  %s5507_s0 = sshll.u32 %s6973_s29, 1 }
 0x20e   : > { %5742 = vmatprep.subr.bf16.mxu0 %v6522_v59  ;;  %5770 = vmatprep.subr.bf16.mxu1 %v6523_v60 }
 0x20f   : > { %v7334_v21 = vpop.f32.mrf.mxu0 }
 0x211   : > { %5743 = vmatpush3.bf16.msra.mxu0 %v6524_v61  ;;  %5771 = vmatpush3.bf16.msra.mxu1 %v6525_v62  ;;  %v7336_v44 = vpop.f32.mrf.mxu0  ;;  %v1317_v61 = vrot.slane %v7353_v52, %v1316_v47  ;;  %v1325_v62 = vrot.slane %v7353_v52, %v1324_v48 }
 0x212   : > { %5784 = vmatprep.subr.bf16.mxu0 %v6526_v63  ;;  %5812 = vmatprep.subr.bf16.mxu1 %v6527_v0  ;;  %v1313_v63 = vrot.slane %v7353_v52, %v7345_v49  ;;  %v1321_v0 = vrot.slane %v7353_v52, %v1320_v50 }
 0x213   : > { %v7340_v46 = vpop.f32.mrf.mxu0  ;;  %v7366_v26 = vadd.f32 %v7148_v29, %v1317_v61  ;;  %v7368_v47 = vadd.f32 %v1526_v2, %v1325_v62  ;;  %v7371_v48 = vadd.f32 %v7152_v31, %v1317_v61  ;;  %v7373_v24 = vadd.f32 %v1530_v4, %v1325_v62 }
 0x214   : > { %v7361_v57 = vadd.f32 %v7150_v30, %v1313_v63  ;;  %v7363_v56 = vadd.f32 %v1528_v3, %v1321_v0  ;;  %v7376_v50 = vadd.f32 %v7146_v28, %v1313_v63  ;;  %v7378_v27 = vadd.f32 %v1524_v1, %v1321_v0 }
 0x215   : > { %v7348_v51 = vpop.f32.mrf.mxu0  ;;  %8988 = vst [vmem:[#allocation32_spill] sm:$0xff] %v7366_v26  ;;  %8989 = vst [vmem:[#allocation33_spill] sm:$0xff] %v7368_v47 }
 0x216   : > { %8986 = vst [vmem:[#allocation30_spill] sm:$0xff] %v7361_v57  ;;  %8987 = vst [vmem:[#allocation31_spill] sm:$0xff] %v7363_v56 }
 0x217   : > { %8990 = vst [vmem:[#allocation34_spill] sm:$0xff] %v7371_v48  ;;  %8991 = vst [vmem:[#allocation35_spill] sm:$0xff] %v7373_v24 }
 0x218   : > { %8992 = vst [vmem:[#allocation36_spill] sm:$0xff] %v7376_v50  ;;  %8993 = vst [vmem:[#allocation37_spill] sm:$0xff] %v7378_v27 }
 0x2a3   : > { %v1837_v59 = vpop.f32.mrf.mxu0  ;;  %v1890_v60 = vpop.f32.mrf.mxu1 }
 0x2a4   : > { %v2015_v9 = vmul.f32 %v1837_v59, %v7376_v50  ;;  %v2017_v28 = vmul.f32 %v1890_v60, %v7378_v27  ;;  %v6530_v59 = vld [vmem:[%s8745_s25 + $0x170] sm:$0xff]  }
 0x2a5   : > { %v1839_v23 = vpop.f32.mrf.mxu0  ;;  %v1892_v25 = vpop.f32.mrf.mxu1  ;;  %v6531_v60 = vld [vmem:[%s8745_s25 + $0x1f0] sm:$0xff]  }
 0x2a6   : > { %v2016_v29 = vmul.f32 %v1839_v23, %v7366_v26  ;;  %v2018_v2 = vmul.f32 %v1892_v25, %v7368_v47  ;;  %v6529_v25 = vld [vmem:[%s8745_s25 + $0x1b8] sm:$0xff]  }
 0x2a7   : > { %v1841_v54 = vpop.f32.mrf.mxu0  ;;  %v1894_v53 = vpop.f32.mrf.mxu1 }
 0x2a8   : > { %v2023_v30 = vmul.f32 %v1841_v54, %v7361_v57  ;;  %v2025_v3 = vmul.f32 %v1894_v53, %v7363_v56  ;;  %v6528_v53 = vld [vmem:[%s8745_s25 + $0x138] sm:$0xff]  }
 0x2a9   : > { %v1843_v17 = vpop.f32.mrf.mxu0  ;;  %v1896_v18 = vpop.f32.mrf.mxu1 }
 0x2aa   : > { %v2024_v31 = vmul.f32 %v1843_v17, %v7371_v48  ;;  %v2026_v4 = vmul.f32 %v1896_v18, %v7373_v24  ;;  %v2047_v23 = vpack.c.bf16 %v2023_v30, %v2015_v9  ;;  %v2049_v17 = vpack.c.bf16 %v2025_v3, %v2017_v28 }
 0x2ab   : > { %v1847_v1 = vpop.f32.mrf.mxu0  ;;  %v1900_v10 = vpop.f32.mrf.mxu1  ;;  %v7406_v9 = vadd.f32 %v1536_v7, %v1325_v62  ;;  %v7409_v30 = vadd.f32 %v7158_v34, %v1313_v63  ;;  %v1332_v3 = vsub.s32 5, %v7338_v45  ;;  %v7413_v28 = vadd.f32 %v7322_v11, %v1321_v0  ;;  %v7425_v34 = vld [vmem:[%s8745_s25 + $0x130] sm:$0xff]  }
 0x2ac   : > { %v2048_v49 = vpack.c.bf16 %v2024_v31, %v2016_v29  ;;  %v2050_v54 = vpack.c.bf16 %v2026_v4, %v2018_v2  ;;  %v7401_v29 = vadd.f32 %v7154_v32, %v1313_v63  ;;  %v7404_v2 = vadd.f32 %v7156_v33, %v1317_v61  ;;  %9001 = vst [vmem:[#allocation45_spill] sm:$0xff] %v7425_v34 }
 0x2ad   : > { %v1849_v48 = vpop.f32.mrf.mxu0  ;;  %v1902_v18 = vpop.f32.mrf.mxu1  ;;  %8996 = vst [vmem:[#allocation40_spill] sm:$0xff] %v7406_v9  ;;  %8997 = vst [vmem:[#allocation41_spill] sm:$0xff] %v7409_v30  ;;  %v7416_v32 = vadd.f32 %v7160_v35, %v1317_v61  ;;  %v7419_v33 = vadd.f32 %v7324_v12, %v1325_v62  ;;  %v1340_v7 = vsub.s32 7, %v7338_v45  ;;  %v7435_v12 = vld [vmem:[%s8745_s25 + $0x1b0] sm:$0xff]   ;;  %v7440_v62 = vld [vmem:[%s8745_s25 + $0x168] sm:$0xff]  }
 0x2ae   : > { %8994 = vst [vmem:[#allocation38_spill] sm:$0xff] %v7401_v29  ;;  %2479 = vmatprep.mubr.bf16.mxu0 %v2048_v49  ;;  %2528 = vmatprep.mubr.bf16.mxu1 %v2050_v54  ;;  %8995 = vst [vmem:[#allocation39_spill] sm:$0xff] %v7404_v2  ;;  %v7428_v49 = vadd.f32 %v7320_v5, %v1321_v0  ;;  %v2032_v11 = vmul.f32 %v1849_v48, %v7404_v2 }
 0x2af   : > { %v1851_v31 = vpop.f32.mrf.mxu0  ;;  %v1904_v4 = vpop.f32.mrf.mxu1  ;;  %2480 = vmatmul.mubr.bf16.vlgmr.msra.gmra.mxu0 %v2047_v23  ;;  %2529 = vmatmul.mubr.bf16.vlgmr.msra.gmra.mxu1 %v2049_v17  ;;  %8998 = vst [vmem:[#allocation42_spill] sm:$0xff] %v7413_v28  ;;  %8999 = vst [vmem:[#allocation43_spill] sm:$0xff] %v7416_v32  ;;  %v2034_v5 = vmul.f32 %v1902_v18, %v7406_v9  ;;  %v7460_v18 = vrot.slane %v7353_v52, %v1340_v7  ;;  %v7479_v7 = vld [vmem:[%s8745_s25 + $0x160] sm:$0xff]  }
 0x2b0   : > { %9000 = vst [vmem:[#allocation44_spill] sm:$0xff] %v7419_v33  ;;  %5785 = vmatpush3.bf16.msra.mxu0 %v6528_v53  ;;  %5813 = vmatpush3.bf16.msra.mxu1 %v6529_v25  ;;  %9002 = vst [vmem:[#allocation46_spill] sm:$0xff] %v7428_v49  ;;  %v2039_v35 = vmul.f32 %v1851_v31, %v7409_v30  ;;  %v2041_v0 = vmul.f32 %v1904_v4, %v7413_v28 }
 0x2b1   : > { %v1853_v61 = vpop.f32.mrf.mxu0  ;;  %v1906_v63 = vpop.f32.mrf.mxu1  ;;  %5786 = vmatprep.subr.bf16.mxu0 %v6530_v59  ;;  %5814 = vmatprep.subr.bf16.mxu1 %v6531_v60  ;;  %9003 = vst [vmem:[#allocation47_spill] sm:$0xff] %v7435_v12  ;;  %9004 = vst [vmem:[#allocation48_spill] sm:$0xff] %v7440_v62  ;;  %v7447_v53 = vrot.slane %v7353_v52, %v1332_v3  ;;  %v2031_v25 = vmul.f32 %v1847_v1, %v7401_v29  ;;  %v7457_v59 = vld [vmem:[%s8745_s25 + $0x1e8] sm:$0xff]  }
 0x2b2   : > { %v2040_v48 = vmul.f32 %v1853_v61, %v7416_v32  ;;  %v2042_v54 = vmul.f32 %v1906_v63, %v7419_v33  ;;  %9005 = vst [vmem:[#allocation49_spill] sm:$0xff] %v7457_v59  ;;  %v2033_v60 = vmul.f32 %v1900_v10, %v7428_v49  ;;  %v7467_v1 = vld [vmem:[%s8745_s25 + $0x128] sm:$0xff]   ;;  %9008 = vst [vmem:[#allocation52_spill] sm:$0xff] %v7479_v7 }
 0x2b3   : > { %v7450_v23 = vpop.f32.mrf.mxu0  ;;  %v7452_v17 = vpop.f32.mrf.mxu1  ;;  %9006 = vst [vmem:[#allocation50_spill] sm:$0xff] %v7467_v1  ;;  %v2055_v3 = vpack.c.bf16 %v2039_v35, %v2031_v25  ;;  %v7474_v10 = vld [vmem:[%s8745_s25 + $0x1a8] sm:$0xff]   ;;  %v7484_v35 = vld [vmem:[%s8745_s25 + $0x1e0] sm:$0xff]   ;;  %v7501_v25 = vadd.f32 %v7168_v39, %v7447_v53 }
 0x2b4   : > { %v2056_v31 = vpack.c.bf16 %v2040_v48, %v2032_v11  ;;  %v2058_v4 = vpack.c.bf16 %v2042_v54, %v2034_v5  ;;  %5787 = vmatpush3.bf16.msra.mxu0 %v7425_v34  ;;  %5815 = vmatpush3.bf16.msra.mxu1 %v7435_v12  ;;  %9007 = vst [vmem:[#allocation51_spill] sm:$0xff] %v7474_v10  ;;  %9009 = vst [vmem:[#allocation53_spill] sm:$0xff] %v7484_v35  ;;  %v7518_v39 = vld [vmem:[%s8745_s25 + $0x1a0] sm:$0xff]  }
 0x2b5   : > { %v1945_v61 = vpop.f32.mrf.mxu0  ;;  %v1998_v63 = vpop.f32.mrf.mxu1  ;;  %5788 = vmatprep.subr.bf16.mxu0 %v7440_v62  ;;  %v2057_v11 = vpack.c.bf16 %v2041_v0, %v2033_v60  ;;  %v7488_v5 = vadd.f32 %v7164_v37, %v7447_v53  ;;  %5816 = vmatprep.subr.bf16.mxu1 %v7457_v59  ;;  %v7497_v0 = vadd.f32 %v7328_v15, %v7460_v18  ;;  %v7511_v37 = vld [vmem:[%s8745_s25 + $0x120] sm:$0xff]  }
 0x2b6   : > { %2487 = vmatprep.mubr.bf16.mxu0 %v2056_v31  ;;  %2536 = vmatprep.mubr.bf16.mxu1 %v2058_v4  ;;  %9012 = vst [vmem:[#allocation56_spill] sm:$0xff] %v7501_v25  ;;  %v7505_v60 = vadd.f32 %v7332_v20, %v7460_v18  ;;  %9014 = vst [vmem:[#allocation58_spill] sm:$0xff] %v7511_v37  ;;  %v7523_v20 = vld [vmem:[%s8745_s25 + $0x158] sm:$0xff]  }
 0x2b7   : > { %9010 = vst [vmem:[#allocation54_spill] sm:$0xff] %v7488_v5  ;;  %v7491_v48 = vpop.f32.mrf.mxu0  ;;  %v7493_v54 = vpop.f32.mrf.mxu1  ;;  %2488 = vmatmul.mubr.bf16.gmra.mxu0 %v2055_v3  ;;  %9011 = vst [vmem:[#allocation55_spill] sm:$0xff] %v7497_v0  ;;  %2537 = vmatmul.mubr.bf16.gmra.mxu1 %v2057_v11  ;;  %v2020_v4 = vmul.f32 %v1945_v61, %v7488_v5  ;;  %v2022_v3 = vmul.f32 %v1998_v63, %v7497_v0  ;;  %v7543_v61 = vld [vmem:[%s8745_s25 + $0x118] sm:$0xff]  }
 0x2b8   : > { %9013 = vst [vmem:[#allocation57_spill] sm:$0xff] %v7505_v60  ;;  %5789 = vmatpush3.bf16.msra.mxu0 %v7467_v1  ;;  %5817 = vmatpush3.bf16.msra.mxu1 %v7474_v10  ;;  %9015 = vst [vmem:[#allocation59_spill] sm:$0xff] %v7518_v39  ;;  %v7550_v63 = vld [vmem:[%s8745_s25 + $0x198] sm:$0xff]  }
 0x2b9   : > { %v1949_v15 = vpop.f32.mrf.mxu0  ;;  %v2002_v31 = vpop.f32.mrf.mxu1  ;;  %5790 = vmatprep.subr.bf16.mxu0 %v7479_v7  ;;  %9016 = vst [vmem:[#allocation60_spill] sm:$0xff] %v7523_v20  ;;  %5818 = vmatprep.subr.bf16.mxu1 %v7484_v35  ;;  %v7533_v7 = vld [vmem:[%s8745_s25 + $0x1d8] sm:$0xff]   ;;  %9018 = vst [vmem:[#allocation62_spill] sm:$0xff] %v7543_v61  ;;  %v7623_v35 = vadd.f32 %v7176_v43, %v7447_v53  ;;  %v7645_v43 = vld [vmem:[%s8745_s25 + $0x180] sm:$0xff]  }
 0x2ba   : > { %v2028_v11 = vmul.f32 %v1949_v15, %v7501_v25  ;;  %v2030_v10 = vmul.f32 %v2002_v31, %v7505_v60  ;;  %9017 = vst [vmem:[#allocation61_spill] sm:$0xff] %v7533_v7  ;;  %9019 = vst [vmem:[#allocation63_spill] sm:$0xff] %v7550_v63  ;;  %v7561_v15 = vld [vmem:[%s8745_s25 + $0x1d0] sm:$0xff]  }
 0x2bb   : > { %v7535_v1 = vpop.f32.mrf.mxu0  ;;  %v7537_v12 = vpop.f32.mrf.mxu1  ;;  %9021 = vst [vmem:[#allocation65_spill] sm:$0xff] %v7561_v15  ;;  %9032 = vst [vmem:[#allocation76_spill] sm:$0xff] %v7623_v35 }
 0x2bc   : > { %v2052_v59 = vpack.c.bf16 %v2028_v11, %v2020_v4  ;;  %v2054_v62 = vpack.c.bf16 %v2030_v10, %v2022_v3  ;;  %5791 = vmatpush3.bf16.msra.mxu0 %v7511_v37  ;;  %5819 = vmatpush3.bf16.msra.mxu1 %v7518_v39  ;;  %v7555_v10 = vld [vmem:[%s8745_s25 + $0x150] sm:$0xff]   ;;  %v1328_v11 = vsub.s32 4, %v7338_v45  ;;  %9036 = vst [vmem:[#allocation80_spill] sm:$0xff] %v7645_v43 }
 0x2bd   : > { %5792 = vmatprep.subr.bf16.mxu0 %v7523_v20  ;;  %9020 = vst [vmem:[#allocation64_spill] sm:$0xff] %v7555_v10  ;;  %5820 = vmatprep.subr.bf16.mxu1 %v7533_v7  ;;  %v1955_v31 = vpop.f32.mrf.mxu0  ;;  %v2008_v4 = vpop.f32.mrf.mxu1  ;;  %v7567_v3 = vld [vmem:[%s8745_s25 + $0x110] sm:$0xff]   ;;  %v7593_v20 = vld [vmem:[%s8745_s25 + $0x108] sm:$0xff]  }
 0x2be   : > { %2577 = vmatprep.mubr.bf16.mxu0 %v2052_v59  ;;  %2626 = vmatprep.mubr.bf16.mxu1 %v2054_v62  ;;  %9022 = vst [vmem:[#allocation66_spill] sm:$0xff] %v7567_v3  ;;  %v7575_v59 = vld [vmem:[%s8745_s25 + $0x190] sm:$0xff]   ;;  %v7580_v62 = vld [vmem:[%s8745_s25 + $0x148] sm:$0xff]   ;;  %9026 = vst [vmem:[#allocation70_spill] sm:$0xff] %v7593_v20  ;;  %v1329_v39 = vrot.slane %v7353_v52, %v1328_v11 }
 0x2bf   : > { %9023 = vst [vmem:[#allocation67_spill] sm:$0xff] %v7575_v59  ;;  %9024 = vst [vmem:[#allocation68_spill] sm:$0xff] %v7580_v62  ;;  %v2010_v7 = vpop.f32.mrf.mxu1  ;;  %v7613_v11 = vld [vmem:[%s8745_s25 + $0x1c0] sm:$0xff]  }
 0x2c0   : > { %5793 = vmatpush3.bf16.msra.mxu0 %v7543_v61  ;;  %5821 = vmatpush3.bf16.msra.mxu1 %v7550_v63  ;;  %v1336_v61 = vsub.s32 6, %v7338_v45  ;;  %v7587_v63 = vld [vmem:[%s8745_s25 + $0x1c8] sm:$0xff]   ;;  %9029 = vst [vmem:[#allocation73_spill] sm:$0xff] %v7613_v11 }
 0x2c1   : > { %5794 = vmatprep.subr.bf16.mxu0 %v7555_v10  ;;  %5822 = vmatprep.subr.bf16.mxu1 %v7561_v15  ;;  %9025 = vst [vmem:[#allocation69_spill] sm:$0xff] %v7587_v63  ;;  %v1957_v10 = vpop.f32.mrf.mxu0  ;;  %v7601_v45 = vld [vmem:[%s8745_s25 + $0x188] sm:$0xff]   ;;  %v2012_v60 = vpop.f32.mrf.mxu1 }
 0x2c2   : > { %9027 = vst [vmem:[#allocation71_spill] sm:$0xff] %v7601_v45  ;;  %v1337_v15 = vrot.slane %v7353_v52, %v1336_v61  ;;  %v7629_v52 = vld [vmem:[%s8745_s25 + $0x100] sm:$0xff]   ;;  %v7632_v61 = vadd.f32 %v7162_v36, %v1329_v39  ;;  %v7652_v36 = vadd.f32 %v7172_v41, %v7447_v53  ;;  %v7668_v41 = vld [vmem:[%s8738_s18 + $0x18] sm:$0xff] }
 0x2c3   : > { %9033 = vst [vmem:[#allocation77_spill] sm:$0xff] %v7629_v52  ;;  %9040 = vst [vmem:[#allocation84_spill] sm:$0xff] %v7668_v41 }
 0x2c4   : > { %5795 = vmatpush3.bf16.msra.mxu0 %v7567_v3  ;;  %5823 = vmatpush3.bf16.msra.mxu1 %v7575_v59  ;;  %v7606_v3 = vld [vmem:[%s8745_s25 + $0x140] sm:$0xff]   ;;  %v1959_v59 = vpop.f32.mrf.mxu0  ;;  %v7619_v37 = vadd.f32 %v7330_v19, %v1337_v15  ;;  %9034 = vst [vmem:[#allocation78_spill] sm:$0xff] %v7632_v61  ;;  %9038 = vst [vmem:[#allocation82_spill] sm:$0xff] %v7652_v36 }
 0x2c5   : > { %5796 = vmatprep.subr.bf16.mxu0 %v7580_v62  ;;  %9028 = vst [vmem:[#allocation72_spill] sm:$0xff] %v7606_v3  ;;  %5824 = vmatprep.subr.bf16.mxu1 %v7587_v63  ;;  %v7616_v62 = vadd.f32 %v7166_v38, %v1329_v39  ;;  %v7636_v38 = vadd.f32 %v7348_v51, %v7460_v18 }
 0x2c6   : > { %9031 = vst [vmem:[#allocation75_spill] sm:$0xff] %v7619_v37  ;;  %v2029_v51 = vmul.f32 %v7493_v54, %v7619_v37  ;;  %v2036_v54 = vmul.f32 %v1955_v31, %v7652_v36  ;;  %v7686_v31 = vadd.f32 %v7340_v46, %v1337_v15 }
 0x2c7   : > { %9030 = vst [vmem:[#allocation74_spill] sm:$0xff] %v7616_v62  ;;  %9035 = vst [vmem:[#allocation79_spill] sm:$0xff] %v7636_v38  ;;  %v2027_v19 = vmul.f32 %v7491_v48, %v7616_v62  ;;  %v2044_v48 = vmul.f32 %v1959_v59, %v7623_v35 }
 0x2c8   : > { %5797 = vmatpush3.bf16.msra.mxu0 %v7593_v20  ;;  %5825 = vmatpush3.bf16.msra.mxu1 %v7601_v45  ;;  %v7648_v20 = vadd.f32 %v7326_v13, %v1337_v15  ;;  %v2019_v45 = vmul.f32 %v7450_v23, %v7632_v61  ;;  %v2046_v13 = vmul.f32 %v2012_v60, %v7636_v38 }
 0x2c9   : > { %5798 = vmatprep.subr.bf16.mxu0 %v7606_v3  ;;  %5826 = vmatprep.subr.bf16.mxu1 %v7613_v11  ;;  %v7660_v3 = vadd.f32 %v7336_v44, %v7460_v18  ;;  %v2060_v18 = vpack.c.bf16 %v2044_v48, %v2036_v54  ;;  %v7678_v60 = vadd.f32 %v7174_v42, %v1329_v39  ;;  %v7696_v42 = vld [vmem:[%s8738_s18 + $0x8] sm:$0xff] }
 0x2ca   : > { %9037 = vst [vmem:[#allocation81_spill] sm:$0xff] %v7648_v20  ;;  %v2021_v53 = vmul.f32 %v7452_v17, %v7648_v20  ;;  %v2051_v59 = vpack.c.bf16 %v2027_v19, %v2019_v45  ;;  %v7683_v17 = vld [vmem:[%s8738_s18 + $0x10] sm:$0xff]  ;;  %9043 = vst [vmem:[#allocation87_spill] sm:$0xff] %v7686_v31  ;;  %v7699_v19 = vadd.f32 %v7334_v21, %v1337_v15  ;;  %v7738_v15 = vld [vmem:[%s8739_s19 + $0x8] sm:$0xff] }
 0x2cb   : > { %9039 = vst [vmem:[#allocation83_spill] sm:$0xff] %v7660_v3  ;;  %v2038_v44 = vmul.f32 %v2008_v4, %v7660_v3  ;;  %9041 = vst [vmem:[#allocation85_spill] sm:$0xff] %v7678_v60  ;;  %v7689_v4 = vadd.f32 %v7170_v40, %v1329_v39  ;;  %v2043_v45 = vmul.f32 %v1957_v10, %v7678_v60  ;;  %v7709_v39 = vld [vmem:[%s8738_s18] sm:$0xff] }
 0x2cc   : > { %5799 = vmatpush3.bf16.msra.mxu0 %v7629_v52  ;;  %5827 = vmatpush3.bf16.msra.mxu1 %v7645_v43  ;;  %v2053_v23 = vpack.c.bf16 %v2029_v51, %v2021_v53  ;;  %9042 = vst [vmem:[#allocation86_spill] sm:$0xff] %v7683_v17  ;;  %9045 = vst [vmem:[#allocation89_spill] sm:$0xff] %v7696_v42  ;;  %v2045_v46 = vmul.f32 %v2010_v7, %v7686_v31  ;;  %v7718_v7 = vld [vmem:[%s8739_s19 + $0x18] sm:$0xff]  ;;  %v8813_v51 = vmov 0.0  }
 0x2cd   : > { %6218 = vmatprep.subr.mxu1 %v7668_v41  ;;  %v2062_v38 = vpack.c.bf16 %v2046_v13, %v2038_v44  ;;  %9044 = vst [vmem:[#allocation88_spill] sm:$0xff] %v7689_v4  ;;  %9046 = vst [vmem:[#allocation90_spill] sm:$0xff] %v7699_v19  ;;  %v2035_v40 = vmul.f32 %v7535_v1, %v7689_v4  ;;  %v2037_v10 = vmul.f32 %v7537_v12, %v7699_v19  ;;  %v7728_v12 = vld [vmem:[%s8739_s19 + $0x10] sm:$0xff] }
 0x2ce   : > { %9047 = vst [vmem:[#allocation91_spill] sm:$0xff] %v7709_v39  ;;  %9048 = vst [vmem:[#allocation92_spill] sm:$0xff] %v7718_v7  ;;  %6210 = vmatprep.subr.bf16.mxu0 %v8813_v51 }
 0x2cf   : > { %2578 = vmatmul.mubr.bf16.vlgmr.msra.gmra.mxu0 %v2051_v59  ;;  %2627 = vmatmul.mubr.bf16.vlgmr.msra.gmra.mxu1 %v2053_v23  ;;  %v2059_v21 = vpack.c.bf16 %v2043_v45, %v2035_v40  ;;  %v2061_v1 = vpack.c.bf16 %v2045_v46, %v2037_v10  ;;  %9049 = vst [vmem:[#allocation93_spill] sm:$0xff] %v7728_v12  ;;  %9050 = vst [vmem:[#allocation94_spill] sm:$0xff] %v7738_v15 }
 0x2d0   : > { %2585 = vmatprep.mubr.bf16.mxu0 %v2060_v18  ;;  %2634 = vmatprep.mubr.bf16.mxu1 %v2062_v38  ;;  %v7745_v38 = vld [vmem:[%s8739_s19] sm:$0xff] }
 0x2d1   : > { %6219 = vmatpush3.msra.mxu1 %v7668_v41  ;;  %9051 = vst [vmem:[#allocation95_spill] sm:$0xff] %v7745_v38 }
 0x2d2   : > { %6220 = vmatprep.subr.mxu1 %v7683_v17 }
 0x2d3   : > { %6221 = vmatpush3.msra.mxu1 %v7683_v17 }
 0x2d4   : > { %6222 = vmatprep.subr.mxu1 %v7696_v42 }
 0x2d5   : > { %6223 = vmatpush3.msra.mxu1 %v7696_v42 }
 0x2d6   : > { %6224 = vmatprep.subr.mxu1 %v7709_v39 }
 0x2d7   : > { %2586 = vmatmul.mubr.bf16.gmra.mxu0 %v2059_v21  ;;  %6225 = vmatpush3.msra.mxu1 %v7709_v39 }
 0x2d8   : > { %2635 = vmatmul.mubr.bf16.gmra.mxu1 %v2061_v1  ;;  %6240 = vmatprep.subr.mxu1 %v7718_v7 }
 0x2d9   : > { %6226 = vmatprep.mubr.msk.f32.mxu1 %vm1430_vm2, %v7052_v58  ;;  %6214 = vmatprep.mubr.msk.bf16.mxu0 %vm6777_vm3, %v8813_v51 }
 0x2e0   : > { %6227 = vmatmul.mubr.msk.f32.vlgmr.msra.gmra.mxu1 %vm1430_vm2, %v7050_v55 }
 0x2e1   : > { %6241 = vmatpush3.msra.mxu1 %v7718_v7  ;;  %6248 = vmatprep.mubr.msk.f32.mxu1 %vm1430_vm2, %v7052_v58 }
 0x2e2   : > { %6242 = vmatprep.subr.mxu1 %v7728_v12 }
 0x2e3   : > { %6243 = vmatpush3.msra.mxu1 %v7728_v12 }
 0x2e4   : > { %6244 = vmatprep.subr.mxu1 %v7738_v15 }
 0x2e5   : > { %6245 = vmatpush3.msra.mxu1 %v7738_v15 }
 0x2e6   : > { %6246 = vmatprep.subr.mxu1 %v7745_v38 }
 0x2e7   : > { %6247 = vmatpush3.msra.mxu1 %v7745_v38 }
 0x2e8   : > { %6249 = vmatmul.mubr.msk.f32.vlgmr.msra.gmra.mxu1 %vm1430_vm2, %v7050_v55 }
 0x36f   : > { %v5744_v48 = vpop.f32.mrf.mxu0  ;;  %v5772_v13 = vpop.f32.mrf.mxu1 }
 0x371   : > { %v5745_v53 = vpop.f32.mrf.mxu0  ;;  %v5773_v54 = vpop.f32.mrf.mxu1 }
 0x372   : > { %v5746_v37 = vadd.f32 %v5745_v53, %v5744_v48  ;;  %v5774_v62 = vadd.f32 %v5773_v54, %v5772_v13  ;;  %v7855_v54 = vld [vmem:[%s6986_s8] sm:$0xff]  }
 0x373   : > { %v5747_v59 = vpop.f32.mrf.mxu0  ;;  %v5775_v44 = vpop.f32.mrf.mxu1 }
 0x375   : > { %v5748_v23 = vpop.f32.mrf.mxu0  ;;  %v5776_v18 = vpop.f32.mrf.mxu1 }
 0x376   : > { %v5749_v3 = vadd.f32 %v5748_v23, %v5747_v59  ;;  %v5777_v52 = vadd.f32 %v5776_v18, %v5775_v44  ;;  %v2531_v59 = vadd.f32 %v5774_v62, %v5746_v37  ;;  %v7812_v37 = vld [vmem:[%s8732_s12] sm:$0xff]  ;;  %v7822_v62 = vld [vmem:[%s8733_s13 + $0x18] sm:$0xff] }
 0x377   : > { %v5750_v45 = vpop.f32.mrf.mxu0  ;;  %v5778_v46 = vpop.f32.mrf.mxu1  ;;  %v7863_v23 = vld [vmem:[%s8733_s13] sm:$0xff]  ;;  %v7870_v18 = vld [vmem:[%s8740_s20 + $0x18] sm:$0xff] }
 0x378   : > { %v2534_v34 = vadd.f32 %v5777_v52, %v5749_v3 }
 0x379   : > { %v5751_v40 = vpop.f32.mrf.mxu0  ;;  %v5779_v10 = vpop.f32.mrf.mxu1 }
 0x37a   : > { %v5752_v60 = vadd.f32 %v5751_v40, %v5750_v45  ;;  %v5780_v41 = vadd.f32 %v5779_v10, %v5778_v46  ;;  %v7877_v10 = vld [vmem:[%s8740_s20 + $0x10] sm:$0xff] }
 0x37b   : > { %v5753_v21 = vpop.f32.mrf.mxu0  ;;  %v5781_v1 = vpop.f32.mrf.mxu1 }
 0x37c   : > { %v2539_v25 = vadd.f32 %v5780_v41, %v5752_v60 }
 0x37d   : > { %v5754_v51 = vpop.f32.mrf.mxu0  ;;  %v5782_v38 = vpop.f32.mrf.mxu1 }
 0x37e   : > { %v5755_v20 = vadd.f32 %v5754_v51, %v5753_v21  ;;  %v5783_v61 = vadd.f32 %v5782_v38, %v5781_v1  ;;  %v7887_v21 = vld [vmem:[%s8740_s20 + $0x8] sm:$0xff]  ;;  %v7894_v1 = vld [vmem:[%s8740_s20] sm:$0xff] }
 0x380   : > { %v2542_v29 = vadd.f32 %v5783_v61, %v5755_v20  ;;  %v9053_v20 = vmov 0.0  }
 0x38f   : > { %v5800_v15 = vpop.f32.mrf.mxu0  ;;  %v5828_v12 = vpop.f32.mrf.mxu1 }
 0x391   : > { %v5801_v7 = vpop.f32.mrf.mxu0  ;;  %v5829_v39 = vpop.f32.mrf.mxu1 }
 0x392   : > { %v5802_v33 = vadd.f32 %v5801_v7, %v5800_v15  ;;  %v5830_v41 = vadd.f32 %v5829_v39, %v5828_v12  ;;  %v7842_v12 = vld [vmem:[%s8733_s13 + $0x10] sm:$0xff]  ;;  %v7851_v15 = vld [vmem:[%s8733_s13 + $0x8] sm:$0xff] }
 0x393   : > { %v5803_v42 = vpop.f32.mrf.mxu0  ;;  %v5831_v19 = vpop.f32.mrf.mxu1 }
 0x395   : > { %v5804_v4 = vpop.f32.mrf.mxu0  ;;  %v5832_v17 = vpop.f32.mrf.mxu1 }
 0x396   : > { %v5805_v0 = vadd.f32 %v5804_v4, %v5803_v42  ;;  %v5833_v48 = vadd.f32 %v5832_v17, %v5831_v19 }
 0x397   : > { %v5806_v31 = vpop.f32.mrf.mxu0 }
 0x398   : > { %v5834_v43 = vpop.f32.mrf.mxu1  ;;  %v2583_v44 = vadd.f32 %v5805_v0, %v2534_v34  ;;  %v7784_v34 = vld [vmem:[%s8732_s12 + $0x10] sm:$0xff]  ;;  %v7805_v0 = vld [vmem:[%s8734_s14 + $0x8] sm:$0xff] }
 0x399   : > { %v5807_v36 = vpop.f32.mrf.mxu0 }
 0x39a   : > { %v5808_v11 = vadd.f32 %v5807_v36, %v5806_v31  ;;  %v5835_v35 = vpop.f32.mrf.mxu1  ;;  %v2580_v31 = vadd.f32 %v5802_v33, %v2531_v59  ;;  %v2632_v60 = vadd.f32 %v5833_v48, %v2583_v44  ;;  %v7777_v33 = vld [vmem:[%s8734_s14 + $0x18] sm:$0xff] }
 0x39b   : > { %v5809_v63 = vpop.f32.mrf.mxu0  ;;  %v5836_v51 = vadd.f32 %v5835_v35, %v5834_v43  ;;  %6262 = vmatprep.subr.mxu1 %v7777_v33  ;;  %v7789_v35 = vld [vmem:[%s8734_s14 + $0x10] sm:$0xff] }
 0x39c   : > { %v5837_v5 = vpop.f32.mrf.mxu1  ;;  %v2588_v45 = vadd.f32 %v5808_v11, %v2539_v25  ;;  %v2629_v3 = vadd.f32 %v5830_v41, %v2580_v31  ;;  %6263 = vmatpush3.msra.mxu1 %v7777_v33  ;;  %v7833_v11 = vld [vmem:[%s9054_s11] ss:$0 sm:$0xff] }
 0x39d   : > { %v5810_v49 = vpop.f32.mrf.mxu0  ;;  %6264 = vmatprep.subr.mxu1 %v7789_v35  ;;  %v1059_v31 = vld [vmem:[%s8742_s22] sm:$0x1] }
 0x39e   : > { %v5811_v46 = vadd.f32 %v5810_v49, %v5809_v63  ;;  %v5838_v40 = vpop.f32.mrf.mxu1  ;;  %v2637_v13 = vadd.f32 %v5836_v51, %v2588_v45  ;;  %v2643_v25 = vpack.c.bf16 %v2632_v60, %v2629_v3  ;;  %v7764_v49 = vld [vmem:[%s7760_s4] sm:$0xff]   ;;  %6265 = vmatpush3.msra.mxu1 %v7789_v35  ;;  %v9055_v45 = vmov 0   ;;  %v9056_v51 = vld [vmem:[#allocation29_spill] sm:$0xff] }
 0x39f   : > { %v5839_v36 = vadd.f32 %v5838_v40, %v5837_v5  ;;  %v7798_v5 = vld [vmem:[%s8732_s12 + $0x8] sm:$0xff]  ;;  %6266 = vmatprep.subr.mxu1 %v7805_v0  ;;  %v7817_v63 = vld [vmem:[%s8734_s14] sm:$0xff] }
 0x3a0   : > { %v2591_v38 = vadd.f32 %v5811_v46, %v2542_v29  ;;  %v7771_v29 = vld [vmem:[%s8732_s12 + $0x18] sm:$0xff]  ;;  %6267 = vmatpush3.msra.mxu1 %v7805_v0  ;;  %v1049_v46 = vld [vmem:[%s8735_s15] sm:$0x1]  ;;  %v6228_v44 = vpop.f32.mrf.mxu1 }
 0x3a1   : > { %6268 = vmatprep.subr.mxu1 %v7817_v63  ;;  %v1050_v40 = vld [vmem:[%s8741_s21] sm:$0x1] }
 0x3a2   : > { %v2640_v53 = vadd.f32 %v5839_v36, %v2591_v38  ;;  %6269 = vmatpush3.msra.mxu1 %v7817_v63  ;;  %v1051_v59 = vadd.f32 %v1050_v40, %v1049_v46  ;;  %v1058_v36 = vld [vmem:[%s8736_s16] sm:$0x1] }
 0x3a3   : > { %v1060_v60 = vadd.f32 %v1059_v31, %v1058_v36 }
 0x3a4   : > { %v2644_v4 = vpack.c.bf16 %v2640_v53, %v2637_v13  ;;  %v7915_v38 = vrot.slane %v1051_v59, %v9056_v51  ;;  %v2768_v53 = vpop.f32.mrf.mxu1 }
 0x3a6   : > { %6211 = vmatpush3.bf16.msra.mxu0 %v2644_v4  ;;  %9057 = vst [vmem:[#allocation29_spill] sm:$0xff] %v7915_v38 }
 0x3a7   : > { %6212 = vmatprep.subr.bf16.mxu0 %v9053_v20 }
 0x3aa   : > { %6213 = vmatpush3.bf16.msra.mxu0 %v2643_v25 }
 0x3ab   : > { %6229 = vmatprep.subr.mxu0 %v7771_v29 }
 0x3ad   : > { %6215 = vmatmul.mubr.msk.bf16.vlgmr.msra.gmra.mxu0 %vm1430_vm2, %v7764_v49 }
 0x3ae   : > { %6230 = vmatpush3.msra.mxu0 %v7771_v29 }
 0x3af   : > { %6231 = vmatprep.subr.mxu0 %v7784_v34 }
 0x3b0   : > { %6232 = vmatpush3.msra.mxu0 %v7784_v34 }
 0x3b1   : > { %6233 = vmatprep.subr.mxu0 %v7798_v5 }
 0x3b2   : > { %6234 = vmatpush3.msra.mxu0 %v7798_v5 }
 0x3b3   : > { %6235 = vmatprep.subr.mxu0 %v7812_v37 }
 0x3b4   : > { %6236 = vmatpush3.msra.mxu0 %v7812_v37 }
 0x3b5   : > { %6251 = vmatprep.subr.mxu0 %v7822_v62 }
 0x46d   : > { %v2687_v52 = vpop.f32.mrf.mxu0 }
 0x46e   : > { %v2688_v61 = vadd.f32 %v7833_v11, %v2687_v52 }
 0x46f   : > { %v6216_v43 = vpop.f32.mrf.mxu0 }
 0x470   : > { %v2694_v17 = vmax.f32 %v2688_v61, 0.0  ;;  %v6250_v61 = vpop.f32.mrf.mxu1  ;;  %v7926_v43 = vrot.slane %v1060_v60, %v9056_v51 }
 0x471   : > { %v2690_v42 = vpop.f32.mrf.mxu0 }
 0x472   : > { %v2691_v19 = vadd.f32 %v7833_v11, %v2690_v42  ;;  %6237 = vmatprep.mubr.msk.f32.mxu0 %vm1430_vm2, %v2694_v17  ;;  %6270 = vmatprep.mubr.msk.f32.mxu1 %vm1430_vm2, %v2694_v17  ;;  %9058 = vst [vmem:[#allocation96_spill] sm:$0xff] %v7926_v43 }
 0x473   : > { %v6217_v39 = vpop.f32.mrf.mxu0 }
 0x474   : > { %v2695_v7 = vmax.f32 %v2691_v19, 0.0  ;;  %v2938_v39 = vpop.f32.mrf.mxu1 }
 0x476   : > { %6238 = vmatmul.mubr.msk.f32.vlgmr.msra.gmra.mxu0 %vm1430_vm2, %v2695_v7  ;;  %6271 = vmatmul.mubr.msk.f32.vlgmr.msra.gmra.mxu1 %vm1430_vm2, %v2695_v7 }
 0x477   : > { %6252 = vmatpush3.msra.mxu0 %v7822_v62  ;;  %6259 = vmatprep.mubr.msk.f32.mxu0 %vm1430_vm2, %v2694_v17 }
 0x478   : > { %6253 = vmatprep.subr.mxu0 %v7842_v12  ;;  %6286 = vmatprep.mubr.msk.bf16.mxu1 %vm1092_vm1, %v7855_v54 }
 0x479   : > { %6254 = vmatpush3.msra.mxu0 %v7842_v12 }
 0x47a   : > { %6255 = vmatprep.subr.mxu0 %v7851_v15 }
 0x47b   : > { %6256 = vmatpush3.msra.mxu0 %v7851_v15 }
 0x47c   : > { %6257 = vmatprep.subr.mxu0 %v7863_v23 }
 0x47d   : > { %6258 = vmatpush3.msra.mxu0 %v7863_v23 }
 0x47e   : > { %6260 = vmatmul.mubr.msk.f32.vlgmr.msra.gmra.mxu0 %vm1430_vm2, %v2695_v7  ;;  %6273 = vmatprep.subr.mxu0 %v7870_v18 }
 0x47f   : > { %6274 = vmatpush3.msra.mxu0 %v7870_v18  ;;  %6281 = vmatprep.mubr.msk.f32.mxu0 %vm1430_vm2, %v7052_v58 }
 0x480   : > { %6275 = vmatprep.subr.mxu0 %v7877_v10 }
 0x481   : > { %6276 = vmatpush3.msra.mxu0 %v7877_v10 }
 0x482   : > { %6277 = vmatprep.subr.mxu0 %v7887_v21 }
 0x483   : > { %6278 = vmatpush3.msra.mxu0 %v7887_v21 }
 0x484   : > { %6279 = vmatprep.subr.mxu0 %v7894_v1 }
 0x485   : > { %6280 = vmatpush3.msra.mxu0 %v7894_v1 }
 0x486   : > { %6282 = vmatmul.mubr.msk.f32.vlgmr.msra.gmra.mxu0 %vm1430_vm2, %v7050_v55  ;;  %3270 = vmatprep.subr.bf16.mxu0 %v7085_v6 }
 0x487   : > { %3271 = vmatpush1.bf16.msra.mxu0 %v7090_v8  ;;  %3290 = vmatprep.mubr.bf16.mxu0 %v9055_v45 }
 0x488   : > { %3272 = vmatprep.subr.bf16.mxu0 %v7109_v14 }
 0x48b   : > { %3273 = vmatpush1.bf16.msra.mxu0 %v7114_v16 }
 0x48c   : > { %3376 = vmatprep.subr.bf16.mxu0 %v7133_v22 }
 0x536   : > { %v6239_v48 = vpop.f32.mrf.mxu0 }
 0x537   : > { %v2855_v13 = vadd.f32 %v6239_v48, %v6228_v44 }
 0x538   : > { %v2849_v41 = vpop.f32.mrf.mxu0 }
 0x539   : > { %v2859_v4 = vadd.f32 %v2855_v13, %v7915_v38  ;;  %v2850_v3 = vadd.f32 %v2849_v41, %v2768_v53 }
 0x53b   : > { %v5642_v25 = vmul.f32 -1.442695, %v2859_v4  ;;  %v2858_v52 = vadd.f32 %v2850_v3, %v7915_v38  ;;  %v6272_v4 = vpop.f32.mrf.mxu1  ;;  %v7933_v3 = vld [vmem:[%s8743_s23] ss:$0 sm:$0xff] }
 0x53c   : > { %9059 = vst [vmem:[#allocation97_spill] sm:$0xff] %v7933_v3 }
 0x53d   : > { %6559 = vpow2.f32 %v5642_v25  ;;  %v5641_v17 = vmul.f32 -1.442695, %v2858_v52  ;;  %v7938_v52 = vld [vmem:[%s8737_s17] ss:$0 sm:$0xff] }
 0x53e   : > { %v6261_v42 = vpop.f32.mrf.mxu0  ;;  %9060 = vst [vmem:[#allocation98_spill] sm:$0xff] %v7938_v52 }
 0x53f   : > { %6561 = vpow2.f32 %v5641_v17  ;;  %v3019_v19 = vadd.f32 %v6261_v42, %v6250_v61 }
 0x540   : > { %v3013_v7 = vpop.f32.mrf.mxu0 }
 0x541   : > { %v3023_v46 = vadd.f32 %v3019_v19, %v7926_v43  ;;  %v3014_v40 = vadd.f32 %v3013_v7, %v2938_v39  ;;  %v3102_v39 = vpop.f32.mrf.mxu1  ;;  %v3108_v7 = vadd.f32 %v6272_v4, %v7938_v52 }
 0x543   : > { %v5648_v59 = vmul.f32 -1.442695, %v3023_v46  ;;  %v3022_v44 = vadd.f32 %v3014_v40, %v7926_v43 }
 0x545   : > { %v5647_v36 = vmul.f32 -1.442695, %v3022_v44  ;;  %6563 = vpow2.f32 %v5648_v59  ;;  %v3103_v44 = vadd.f32 %v7938_v52, %v3102_v39 }
 0x546   : > { %v6283_v41 = vpop.f32.mrf.mxu0 }
 0x547   : > { %6565 = vpow2.f32 %v5647_v36  ;;  %v3183_v42 = vadd.f32 %v6283_v41, %v7933_v3 }
 0x548   : > { %v3177_v61 = vpop.f32.mrf.mxu0 }
 0x549   : > { %v3178_v40 = vadd.f32 %v7933_v3, %v3177_v61 }
 0x54a   : > { %v6560_v31 = vpop.eup %6559 }
 0x54b   : > { %v2867_v48 = vadd.f32 1.0, %v6560_v31 }
 0x54c   : > { %v6562_v51 = vpop.eup %6561 }
 0x54d   : > { %6567 = vrcp.f32 %v2867_v48  ;;  %v2866_v13 = vadd.f32 1.0, %v6562_v51 }
 0x54f   : > { %6569 = vrcp.f32 %v2866_v13 }
 0x552   : > { %v6564_v53 = vpop.eup %6563 }
 0x553   : > { %v3031_v25 = vadd.f32 1.0, %v6564_v53 }
 0x554   : > { %v6566_v60 = vpop.eup %6565 }
 0x555   : > { %v3030_v17 = vadd.f32 1.0, %v6566_v60  ;;  %6571 = vrcp.f32 %v3031_v25 }
 0x557   : > { %6573 = vrcp.f32 %v3030_v17 }
 0x55a   : > { %v6568_v19 = vpop.eup %6567 }
 0x55b   : > { %v3187_v46 = vmul.f32 %v6568_v19, %v3183_v42 }
 0x55c   : > { %v6570_v59 = vpop.eup %6569 }
 0x55d   : > { %v3189_v36 = vadd.f32 %v3187_v46, %v3108_v7  ;;  %v3186_v31 = vmul.f32 %v6570_v59, %v3178_v40  ;;  %v9061_v46 = vld [vmem:[#allocation16_spill] sm:$0xff]  ;;  %v7954_v40 = vld [vmem:[%s6986_s8 + $0x8] sm:$0xff]   ;;  %v9063_v59 = vld [vmem:[#allocation15_spill] sm:$0xff]  ;;  %s9256_s8 = sld [smem:[#allocation8_spill]] }
 0x55e   : > { %9062 = vst [vmem:[#allocation16_spill] sm:$0xff] %v7954_v40 }
 0x55f   : > { %6575 = vtanh.f32 %v3189_v36  ;;  %v3188_v48 = vadd.f32 %v3186_v31, %v3103_v44  ;;  %v9066_v44 = vld [vmem:[#allocation24_spill] sm:$0xff] }
 0x561   : > { %6577 = vtanh.f32 %v3188_v48 }
 0x562   : > { %v6572_v51 = vpop.eup %6571 }
 0x563   : > { %v3193_v53 = vsub.f32 1.0, %v6572_v51  ;;  %v3197_v19 = vmul.f32 %v6572_v51, %v7050_v55  ;;  %v9064_v55 = vld [vmem:[#allocation20_spill] sm:$0xff]  ;;  %s5709_s6 = sshll.u32 %s9256_s8, 6  ;;  %s6778_s8 = smov [#allocation2]  }
 0x564   : > { %v6574_v13 = vpop.eup %6573  ;;  %s6717_s30 = sshll.u32 %s6778_s8, 4  ;;  %s6718_s30 = int_to_ptr.vmem [resolvable:$false] %s6717_s30 }
 0x565   : > { %v3192_v60 = vsub.f32 1.0, %v6574_v13  ;;  %v3196_v61 = vmul.f32 %v6574_v13, %v7052_v58  ;;  %v9065_v58 = vld [vmem:[#allocation19_spill] sm:$0xff]  ;;  %p6720_p0 = scmp.lt.s32.totalorder %s8681_s5, %s6718_s30 }
 0x56c   : > { %v6576_v41 = vpop.eup %6575 }
 0x56d   : > { %v3195_v4 = vmul.f32 %v6576_v41, %v3193_v53  ;;  %v9067_v53 = vld [vmem:[#allocation22_spill] sm:$0xff]  ;;  %v9068_v41 = vld [vmem:[#allocation23_spill] sm:$0xff] }
 0x56e   : > { %v6578_v25 = vpop.eup %6577 }
 0x56f   : > { %v3194_v42 = vmul.f32 %v6578_v25, %v3192_v60  ;;  %v7948_v17 = vadd.f32 %v3197_v19, %v3195_v4  ;;  %v9069_v60 = vld [vmem:[#allocation25_spill] sm:$0xff]  ;;  %v9070_v4 = vld [vmem:[#allocation26_spill] sm:$0xff]  ;;  %v7976_v19 = vld [vmem:[%s8745_s25 + $0x78] sm:$0xff]  }
 0x570   : > { %9073 = vst [vmem:[#allocation99_spill] sm:$0xff] %v7976_v19 }
 0x571   : > { %v7946_v39 = vadd.f32 %v3196_v61, %v3194_v42  ;;  %v9071_v42 = vld [vmem:[#allocation27_spill] sm:$0xff]  ;;  %v9072_v61 = vld [vmem:[#allocation28_spill] sm:$0xff] }
 0x573   : > { %v3200_v7 = vpack.c.bf16 %v7948_v17, %v7946_v39 }
 0x575   : > { %6284 = vmatprep.subr.bf16.mxu1 %v3200_v7 }
 0x576   : > { %6285 = vmatpush3.bf16.msra.mxu1 %v3200_v7  ;;  %v7982_v7 = vld [vmem:[%s8745_s25 + $0xf8] sm:$0xff]  }
 0x577   : > { %3323 = vmatprep.subr.bf16.mxu1 %v9061_v46  ;;  %9074 = vst [vmem:[#allocation100_spill] sm:$0xff] %v7982_v7 }
 0x579   : > { %6287 = vmatmul.mubr.msk.bf16.vlgmr.msra.gmra.mxu1 %vm1092_vm1, %v7954_v40 }
 0x57a   : > { %3324 = vmatpush1.bf16.msra.mxu1 %v9063_v59  ;;  %3343 = vmatprep.mubr.bf16.mxu1 %v9055_v45 }
 0x57b   : > { %3325 = vmatprep.subr.bf16.mxu1 %v9064_v55 }
 0x57e   : > { %3326 = vmatpush1.bf16.msra.mxu1 %v9065_v58 }
 0x57f   : > { %3429 = vmatprep.subr.bf16.mxu1 %v9066_v44 }
 0x639   : > { %v6288_v36 = vpop.f32.mrf.mxu1 }
 0x63b   : > { %v3235_v31 = vpop.f32.mrf.mxu1 }
 0x63d   : > { %v6289_v48 = vpop.f32.mrf.mxu1 }
 0x63e   : > { %v3251_v25 = vpack.c.bf16 %v6289_v48, %v6288_v36  ;;  %v7996_v36 = vld [vmem:[%s8745_s25 + $0x38] sm:$0xff]   ;;  %v8008_v48 = vld [vmem:[%s8745_s25 + $0x70] sm:$0xff]  }
 0x63f   : > { %v3238_v51 = vpop.f32.mrf.mxu1  ;;  %9075 = vst [vmem:[#allocation101_spill] sm:$0xff] %v7996_v36  ;;  %9077 = vst [vmem:[#allocation103_spill] sm:$0xff] %v8008_v48 }
 0x640   : > { %v3250_v13 = vpack.c.bf16 %v3238_v51, %v3235_v31  ;;  %v8002_v31 = vld [vmem:[%s8745_s25 + $0xb8] sm:$0xff]   ;;  %v8014_v51 = vld [vmem:[%s8745_s25 + $0xf0] sm:$0xff]  }
 0x641   : > { %9076 = vst [vmem:[#allocation102_spill] sm:$0xff] %v8002_v31  ;;  %9078 = vst [vmem:[#allocation104_spill] sm:$0xff] %v8014_v51 }
 0x642   : > { %5655 = vmatmul.mubr.msk.bf16.vlgmr.msra.gmra.mxu0 %vm1430_vm2, %v3250_v13  ;;  %5657 = vmatmul.mubr.msk.bf16.vlgmr.msra.gmra.mxu1 %vm1430_vm2, %v3250_v13 }
 0x643   : > { %3300 = vmatprep.mubr.bf16.mxu0 %v9055_v45  ;;  %3353 = vmatprep.mubr.bf16.mxu1 %v9055_v45 }
 0x644   : > { %3377 = vmatpush1.bf16.msra.mxu0 %v9067_v53  ;;  %3430 = vmatpush1.bf16.msra.mxu1 %v9068_v41  ;;  %v9107_v53 = vld [vmem:[#allocation34_spill] sm:$0xff] }
 0x645   : > { %3378 = vmatprep.subr.bf16.mxu0 %v9069_v60  ;;  %3431 = vmatprep.subr.bf16.mxu1 %v9070_v4 }
 0x648   : > { %3379 = vmatpush1.bf16.msra.mxu0 %v9071_v42  ;;  %3432 = vmatpush1.bf16.msra.mxu1 %v9072_v61 }
 0x649   : > { %5882 = vmatprep.subr.bf16.mxu0 %v7976_v19  ;;  %5910 = vmatprep.subr.bf16.mxu1 %v7982_v7 }
 0x64a   : > { %5656 = vmatmul.mubr.msk.bf16.gmra.mxu0 %vm1430_vm2, %v3251_v25  ;;  %5658 = vmatmul.mubr.msk.bf16.gmra.mxu1 %vm1430_vm2, %v3251_v25 }
 0x64b   : > { %3396 = vmatprep.mubr.bf16.mxu0 %v9055_v45  ;;  %3449 = vmatprep.mubr.bf16.mxu1 %v9055_v45 }
 0x652   : > { %5659 = vmatmul.mubr.msk.bf16.vlgmr.msra.gmra.mxu0 %vm1430_vm2, %v3250_v13  ;;  %5661 = vmatmul.mubr.msk.bf16.vlgmr.msra.gmra.mxu1 %vm1430_vm2, %v3250_v13  ;;  %v8020_v13 = vld [vmem:[%s8745_s25 + $0x30] sm:$0xff]  }
 0x653   : > { %3406 = vmatprep.mubr.bf16.mxu0 %v9055_v45  ;;  %3459 = vmatprep.mubr.bf16.mxu1 %v9055_v45  ;;  %9079 = vst [vmem:[#allocation105_spill] sm:$0xff] %v8020_v13 }
 0x654   : > { %5883 = vmatpush3.bf16.msra.mxu0 %v7996_v36  ;;  %5911 = vmatpush3.bf16.msra.mxu1 %v8002_v31  ;;  %v8026_v31 = vld [vmem:[%s8745_s25 + $0xb0] sm:$0xff]  }
 0x655   : > { %5884 = vmatprep.subr.bf16.mxu0 %v8008_v48  ;;  %5912 = vmatprep.subr.bf16.mxu1 %v8014_v51  ;;  %9080 = vst [vmem:[#allocation106_spill] sm:$0xff] %v8026_v31  ;;  %v8032_v48 = vld [vmem:[%s8745_s25 + $0x68] sm:$0xff]  }
 0x656   : > { %9081 = vst [vmem:[#allocation107_spill] sm:$0xff] %v8032_v48  ;;  %v8038_v51 = vld [vmem:[%s8745_s25 + $0xe8] sm:$0xff]  }
 0x657   : > { %9082 = vst [vmem:[#allocation108_spill] sm:$0xff] %v8038_v51 }
 0x658   : > { %5885 = vmatpush3.bf16.msra.mxu0 %v8020_v13  ;;  %5913 = vmatpush3.bf16.msra.mxu1 %v8026_v31  ;;  %v8046_v31 = vld [vmem:[%s8745_s25 + $0x28] sm:$0xff]  }
 0x659   : > { %5886 = vmatprep.subr.bf16.mxu0 %v8032_v48  ;;  %5914 = vmatprep.subr.bf16.mxu1 %v8038_v51  ;;  %9083 = vst [vmem:[#allocation109_spill] sm:$0xff] %v8046_v31  ;;  %v8052_v48 = vld [vmem:[%s8745_s25 + $0xa8] sm:$0xff]   ;;  %v8058_v51 = vld [vmem:[%s8745_s25 + $0x60] sm:$0xff]  }
 0x65a   : > { %5660 = vmatmul.mubr.msk.bf16.gmra.mxu0 %vm1430_vm2, %v3251_v25  ;;  %5662 = vmatmul.mubr.msk.bf16.gmra.mxu1 %vm1430_vm2, %v3251_v25  ;;  %9084 = vst [vmem:[#allocation110_spill] sm:$0xff] %v8052_v48  ;;  %9085 = vst [vmem:[#allocation111_spill] sm:$0xff] %v8058_v51  ;;  %v8064_v25 = vld [vmem:[%s8745_s25 + $0xe0] sm:$0xff]  }
 0x65b   : > { %9086 = vst [vmem:[#allocation112_spill] sm:$0xff] %v8064_v25 }
 0x65c   : > { %5887 = vmatpush3.bf16.msra.mxu0 %v8046_v31  ;;  %5915 = vmatpush3.bf16.msra.mxu1 %v8052_v48  ;;  %v8070_v31 = vld [vmem:[%s8745_s25 + $0x20] sm:$0xff]  }
 0x65d   : > { %5888 = vmatprep.subr.bf16.mxu0 %v8058_v51  ;;  %5916 = vmatprep.subr.bf16.mxu1 %v8064_v25  ;;  %9087 = vst [vmem:[#allocation113_spill] sm:$0xff] %v8070_v31  ;;  %v8076_v48 = vld [vmem:[%s8745_s25 + $0xa0] sm:$0xff]   ;;  %v8082_v51 = vld [vmem:[%s8745_s25 + $0x58] sm:$0xff]  }
 0x65e   : > { %9088 = vst [vmem:[#allocation114_spill] sm:$0xff] %v8076_v48  ;;  %9089 = vst [vmem:[#allocation115_spill] sm:$0xff] %v8082_v51  ;;  %v8088_v25 = vld [vmem:[%s8745_s25 + $0xd8] sm:$0xff]  }
 0x65f   : > { %9090 = vst [vmem:[#allocation116_spill] sm:$0xff] %v8088_v25 }
 0x660   : > { %5889 = vmatpush3.bf16.msra.mxu0 %v8070_v31  ;;  %5917 = vmatpush3.bf16.msra.mxu1 %v8076_v48  ;;  %v8094_v31 = vld [vmem:[%s8745_s25 + $0x18] sm:$0xff]  }
 0x661   : > { %5890 = vmatprep.subr.bf16.mxu0 %v8082_v51  ;;  %5918 = vmatprep.subr.bf16.mxu1 %v8088_v25  ;;  %9091 = vst [vmem:[#allocation117_spill] sm:$0xff] %v8094_v31  ;;  %v8100_v48 = vld [vmem:[%s8745_s25 + $0x98] sm:$0xff]   ;;  %v8106_v51 = vld [vmem:[%s8745_s25 + $0x50] sm:$0xff]  }
 0x662   : > { %9092 = vst [vmem:[#allocation118_spill] sm:$0xff] %v8100_v48  ;;  %9093 = vst [vmem:[#allocation119_spill] sm:$0xff] %v8106_v51  ;;  %v8112_v25 = vld [vmem:[%s8745_s25 + $0xd0] sm:$0xff]  }
 0x663   : > { %9094 = vst [vmem:[#allocation120_spill] sm:$0xff] %v8112_v25 }
 0x664   : > { %5891 = vmatpush3.bf16.msra.mxu0 %v8094_v31  ;;  %5919 = vmatpush3.bf16.msra.mxu1 %v8100_v48  ;;  %v8118_v31 = vld [vmem:[%s8745_s25 + $0x10] sm:$0xff]  }
 0x665   : > { %5892 = vmatprep.subr.bf16.mxu0 %v8106_v51  ;;  %5920 = vmatprep.subr.bf16.mxu1 %v8112_v25  ;;  %9095 = vst [vmem:[#allocation121_spill] sm:$0xff] %v8118_v31  ;;  %v8124_v48 = vld [vmem:[%s8745_s25 + $0x90] sm:$0xff]   ;;  %v8130_v51 = vld [vmem:[%s8745_s25 + $0x48] sm:$0xff]  }
 0x666   : > { %9096 = vst [vmem:[#allocation122_spill] sm:$0xff] %v8124_v48  ;;  %9097 = vst [vmem:[#allocation123_spill] sm:$0xff] %v8130_v51  ;;  %v8136_v25 = vld [vmem:[%s8745_s25 + $0xc8] sm:$0xff]  }
 0x667   : > { %9098 = vst [vmem:[#allocation124_spill] sm:$0xff] %v8136_v25 }
 0x668   : > { %5893 = vmatpush3.bf16.msra.mxu0 %v8118_v31  ;;  %5921 = vmatpush3.bf16.msra.mxu1 %v8124_v48  ;;  %v8142_v31 = vld [vmem:[%s8745_s25 + $0x8] sm:$0xff]  }
 0x669   : > { %5894 = vmatprep.subr.bf16.mxu0 %v8130_v51  ;;  %5922 = vmatprep.subr.bf16.mxu1 %v8136_v25  ;;  %9099 = vst [vmem:[#allocation125_spill] sm:$0xff] %v8142_v31  ;;  %v8148_v48 = vld [vmem:[%s8745_s25 + $0x88] sm:$0xff]   ;;  %v8154_v51 = vld [vmem:[%s8745_s25 + $0x40] sm:$0xff]  }
 0x66a   : > { %9100 = vst [vmem:[#allocation126_spill] sm:$0xff] %v8148_v48  ;;  %9101 = vst [vmem:[#allocation127_spill] sm:$0xff] %v8154_v51  ;;  %v8160_v25 = vld [vmem:[%s8745_s25 + $0xc0] sm:$0xff]  }
 0x66b   : > { %9102 = vst [vmem:[#allocation128_spill] sm:$0xff] %v8160_v25 }
 0x66c   : > { %5895 = vmatpush3.bf16.msra.mxu0 %v8142_v31  ;;  %5923 = vmatpush3.bf16.msra.mxu1 %v8148_v48  ;;  %v8166_v31 = vld [vmem:[%s8745_s25] sm:$0xff]  }
 0x66d   : > { %5896 = vmatprep.subr.bf16.mxu0 %v8154_v51  ;;  %5924 = vmatprep.subr.bf16.mxu1 %v8160_v25  ;;  %9103 = vst [vmem:[#allocation129_spill] sm:$0xff] %v8166_v31  ;;  %v8172_v48 = vld [vmem:[%s8745_s25 + $0x80] sm:$0xff]   ;;  %v8178_v51 = vld [vmem:[%s8745_s25 + $0x178] sm:$0xff]  }
 0x66e   : > { %9104 = vst [vmem:[#allocation130_spill] sm:$0xff] %v8172_v48  ;;  %9105 = vst [vmem:[#allocation131_spill] sm:$0xff] %v8178_v51  ;;  %v8184_v25 = vld [vmem:[%s8745_s25 + $0x1f8] sm:$0xff]  }
 0x66f   : > { %9106 = vst [vmem:[#allocation132_spill] sm:$0xff] %v8184_v25 }
 0x670   : > { %5897 = vmatpush3.bf16.msra.mxu0 %v8166_v31  ;;  %5925 = vmatpush3.bf16.msra.mxu1 %v8172_v48 }
 0x671   : > { %5938 = vmatprep.subr.bf16.mxu0 %v8178_v51  ;;  %5966 = vmatprep.subr.bf16.mxu1 %v8184_v25 }
 0x702   : > { %v3292_v31 = vpop.f32.mrf.mxu0  ;;  %v3345_v13 = vpop.f32.mrf.mxu1 }
 0x703   : > { %v3470_v16 = vmul.f32 %v3292_v31, %v7376_v50  ;;  %v3472_v14 = vmul.f32 %v3345_v13, %v7378_v27  ;;  %v9112_v31 = vld [vmem:[#allocation44_spill] sm:$0xff]  ;;  %v9113_v13 = vld [vmem:[#allocation38_spill] sm:$0xff] }
 0x704   : > { %v3294_v36 = vpop.f32.mrf.mxu0  ;;  %v3347_v7 = vpop.f32.mrf.mxu1  ;;  %v9149_v50 = vld [vmem:[#allocation82_spill] sm:$0xff] }
 0x705   : > { %v3471_v51 = vmul.f32 %v3294_v36, %v7366_v26  ;;  %v3473_v41 = vmul.f32 %v3347_v7, %v7368_v47 }
 0x706   : > { %v3296_v19 = vpop.f32.mrf.mxu0  ;;  %v3349_v48 = vpop.f32.mrf.mxu1 }
 0x707   : > { %v3478_v61 = vmul.f32 %v3296_v19, %v7361_v57  ;;  %v3480_v42 = vmul.f32 %v3349_v48, %v7363_v56 }
 0x708   : > { %v3298_v4 = vpop.f32.mrf.mxu0  ;;  %v3351_v60 = vpop.f32.mrf.mxu1 }
 0x709   : > { %v3479_v22 = vmul.f32 %v3298_v4, %v9107_v53  ;;  %v3481_v25 = vmul.f32 %v3351_v60, %v7373_v24  ;;  %v3502_v57 = vpack.c.bf16 %v3478_v61, %v3470_v16  ;;  %v3504_v48 = vpack.c.bf16 %v3480_v42, %v3472_v14  ;;  %v8198_v60 = vld [vmem:[%s8745_s25 + $0x138] sm:$0xff]   ;;  %v8218_v4 = vld [vmem:[%s8745_s25 + $0x1f0] sm:$0xff]   ;;  %v9150_v24 = vld [vmem:[#allocation77_spill] sm:$0xff] }
 0x70a   : > { %v3302_v8 = vpop.f32.mrf.mxu0  ;;  %v3355_v40 = vpop.f32.mrf.mxu1  ;;  %9108 = vst [vmem:[#allocation133_spill] sm:$0xff] %v8198_v60  ;;  %v8204_v16 = vld [vmem:[%s8745_s25 + $0x1b8] sm:$0xff]   ;;  %9111 = vst [vmem:[#allocation136_spill] sm:$0xff] %v8218_v4 }
 0x70b   : > { %v3503_v6 = vpack.c.bf16 %v3479_v22, %v3471_v51  ;;  %v3505_v19 = vpack.c.bf16 %v3481_v25, %v3473_v41  ;;  %9109 = vst [vmem:[#allocation134_spill] sm:$0xff] %v8204_v16  ;;  %v8212_v41 = vld [vmem:[%s8745_s25 + $0x170] sm:$0xff]   ;;  %v3486_v25 = vmul.f32 %v3302_v8, %v9113_v13 }
 0x70c   : > { %v3304_v56 = vpop.f32.mrf.mxu0  ;;  %v3357_v52 = vpop.f32.mrf.mxu1  ;;  %9110 = vst [vmem:[#allocation135_spill] sm:$0xff] %v8212_v41 }
 0x70d   : > { %3550 = vmatprep.mubr.bf16.mxu0 %v3503_v6  ;;  %3599 = vmatprep.mubr.bf16.mxu1 %v3505_v19  ;;  %v3487_v6 = vmul.f32 %v3304_v56, %v7404_v2  ;;  %v3489_v56 = vmul.f32 %v3357_v52, %v7406_v9 }
 0x70e   : > { %v3306_v36 = vpop.f32.mrf.mxu0  ;;  %v3359_v7 = vpop.f32.mrf.mxu1  ;;  %3551 = vmatmul.mubr.bf16.vlgmr.msra.gmra.mxu0 %v3502_v57  ;;  %3600 = vmatmul.mubr.bf16.vlgmr.msra.gmra.mxu1 %v3504_v48 }
 0x70f   : > { %5939 = vmatpush3.bf16.msra.mxu0 %v8198_v60  ;;  %5967 = vmatpush3.bf16.msra.mxu1 %v8204_v16  ;;  %v3494_v14 = vmul.f32 %v3306_v36, %v7409_v30  ;;  %v3496_v42 = vmul.f32 %v3359_v7, %v7413_v28  ;;  %v9114_v36 = vld [vmem:[#allocation46_spill] sm:$0xff]  ;;  %v9115_v16 = vld [vmem:[#allocation45_spill] sm:$0xff]  ;;  %v9117_v7 = vld [vmem:[#allocation48_spill] sm:$0xff] }
 0x710   : > { %v3308_v22 = vpop.f32.mrf.mxu0  ;;  %v3361_v57 = vpop.f32.mrf.mxu1  ;;  %5940 = vmatprep.subr.bf16.mxu0 %v8212_v41  ;;  %5968 = vmatprep.subr.bf16.mxu1 %v8218_v4  ;;  %v3488_v41 = vmul.f32 %v3355_v40, %v9114_v36  ;;  %v9116_v4 = vld [vmem:[#allocation47_spill] sm:$0xff]  ;;  %v9119_v40 = vld [vmem:[#allocation50_spill] sm:$0xff]  ;;  %v9148_v28 = vld [vmem:[#allocation81_spill] sm:$0xff] }
 0x711   : > { %v3495_v61 = vmul.f32 %v3308_v22, %v7416_v32  ;;  %v3497_v51 = vmul.f32 %v3361_v57, %v9112_v31  ;;  %v3510_v60 = vpack.c.bf16 %v3494_v14, %v3486_v25  ;;  %v9118_v57 = vld [vmem:[#allocation49_spill] sm:$0xff]  ;;  %v9127_v36 = vld [vmem:[#allocation58_spill] sm:$0xff]  ;;  %v9129_v31 = vld [vmem:[#allocation60_spill] sm:$0xff] }
 0x712   : > { %v3398_v19 = vpop.f32.mrf.mxu0  ;;  %v3451_v48 = vpop.f32.mrf.mxu1  ;;  %v3512_v22 = vpack.c.bf16 %v3496_v42, %v3488_v41  ;;  %v9125_v42 = vld [vmem:[#allocation57_spill] sm:$0xff]  ;;  %v9147_v32 = vld [vmem:[#allocation79_spill] sm:$0xff] }
 0x713   : > { %v3511_v30 = vpack.c.bf16 %v3495_v61, %v3487_v6  ;;  %v3513_v2 = vpack.c.bf16 %v3497_v51, %v3489_v56  ;;  %5941 = vmatpush3.bf16.msra.mxu0 %v9115_v16  ;;  %5969 = vmatpush3.bf16.msra.mxu1 %v9116_v4  ;;  %v9120_v6 = vld [vmem:[#allocation51_spill] sm:$0xff]  ;;  %v9121_v4 = vld [vmem:[#allocation52_spill] sm:$0xff]  ;;  %v9122_v56 = vld [vmem:[#allocation54_spill] sm:$0xff]  ;;  %v3476_v27 = vmul.f32 %v3451_v48, %v9148_v28 }
 0x714   : > { %v3400_v52 = vpop.f32.mrf.mxu0  ;;  %v3453_v9 = vpop.f32.mrf.mxu1  ;;  %5942 = vmatprep.subr.bf16.mxu0 %v9117_v7  ;;  %5970 = vmatprep.subr.bf16.mxu1 %v9118_v57  ;;  %v9123_v51 = vld [vmem:[#allocation55_spill] sm:$0xff]  ;;  %v9126_v7 = vld [vmem:[#allocation53_spill] sm:$0xff] }
 0x715   : > { %3558 = vmatprep.mubr.bf16.mxu0 %v3511_v30  ;;  %3607 = vmatprep.mubr.bf16.mxu1 %v3513_v2  ;;  %v3475_v61 = vmul.f32 %v3400_v52, %v9122_v56  ;;  %v3477_v41 = vmul.f32 %v3453_v9, %v9123_v51  ;;  %v9124_v30 = vld [vmem:[#allocation56_spill] sm:$0xff]  ;;  %v9130_v52 = vld [vmem:[#allocation61_spill] sm:$0xff] }
 0x716   : > { %v3402_v8 = vpop.f32.mrf.mxu0  ;;  %v3455_v13 = vpop.f32.mrf.mxu1  ;;  %3559 = vmatmul.mubr.bf16.gmra.mxu0 %v3510_v60  ;;  %3608 = vmatmul.mubr.bf16.gmra.mxu1 %v3512_v22  ;;  %v9144_v51 = vld [vmem:[#allocation76_spill] sm:$0xff]  ;;  %v9145_v56 = vld [vmem:[#allocation73_spill] sm:$0xff] }
 0x717   : > { %5943 = vmatpush3.bf16.msra.mxu0 %v9119_v40  ;;  %5971 = vmatpush3.bf16.msra.mxu1 %v9120_v6  ;;  %v9128_v6 = vld [vmem:[#allocation59_spill] sm:$0xff]  ;;  %v9154_v48 = vld [vmem:[#allocation85_spill] sm:$0xff] }
 0x718   : > { %v3404_v16 = vpop.f32.mrf.mxu0  ;;  %v3457_v14 = vpop.f32.mrf.mxu1  ;;  %5944 = vmatprep.subr.bf16.mxu0 %v9121_v4  ;;  %5972 = vmatprep.subr.bf16.mxu1 %v9126_v7  ;;  %v9131_v4 = vld [vmem:[#allocation62_spill] sm:$0xff]  ;;  %v9133_v7 = vld [vmem:[#allocation64_spill] sm:$0xff] }
 0x719   : > { %v3483_v2 = vmul.f32 %v3404_v16, %v9124_v30  ;;  %v3485_v25 = vmul.f32 %v3457_v14, %v9125_v42  ;;  %v9132_v14 = vld [vmem:[#allocation63_spill] sm:$0xff] }
 0x71a   : > { %v3408_v60 = vpop.f32.mrf.mxu0  ;;  %v3461_v40 = vpop.f32.mrf.mxu1  ;;  %v9141_v42 = vld [vmem:[#allocation71_spill] sm:$0xff] }
 0x71b   : > { %v3507_v22 = vpack.c.bf16 %v3483_v2, %v3475_v61  ;;  %v3509_v57 = vpack.c.bf16 %v3485_v25, %v3477_v41  ;;  %5945 = vmatpush3.bf16.msra.mxu0 %v9127_v36  ;;  %5973 = vmatpush3.bf16.msra.mxu1 %v9128_v6  ;;  %v9134_v61 = vld [vmem:[#allocation65_spill] sm:$0xff]  ;;  %v9135_v2 = vld [vmem:[#allocation66_spill] sm:$0xff]  ;;  %v9136_v25 = vld [vmem:[#allocation67_spill] sm:$0xff] }
 0x71c   : > { %5946 = vmatprep.subr.bf16.mxu0 %v9129_v31  ;;  %5974 = vmatprep.subr.bf16.mxu1 %v9130_v52  ;;  %v3410_v9 = vpop.f32.mrf.mxu0  ;;  %v3463_v16 = vpop.f32.mrf.mxu1  ;;  %v9137_v31 = vld [vmem:[#allocation68_spill] sm:$0xff]  ;;  %v9139_v52 = vld [vmem:[#allocation70_spill] sm:$0xff] }
 0x71d   : > { %3648 = vmatprep.mubr.bf16.mxu0 %v3507_v22  ;;  %3697 = vmatprep.mubr.bf16.mxu1 %v3509_v57  ;;  %v9138_v22 = vld [vmem:[#allocation69_spill] sm:$0xff] }
 0x71e   : > { %v3412_v41 = vpop.f32.mrf.mxu0  ;;  %v3465_v36 = vpop.f32.mrf.mxu1 }
 0x71f   : > { %5947 = vmatpush3.bf16.msra.mxu0 %v9131_v4  ;;  %5975 = vmatpush3.bf16.msra.mxu1 %v9132_v14  ;;  %v9140_v4 = vld [vmem:[#allocation74_spill] sm:$0xff] }
 0x720   : > { %5948 = vmatprep.subr.bf16.mxu0 %v9133_v7  ;;  %5976 = vmatprep.subr.bf16.mxu1 %v9134_v61  ;;  %v3414_v57 = vpop.f32.mrf.mxu0  ;;  %v3467_v6 = vpop.f32.mrf.mxu1  ;;  %v3482_v14 = vmul.f32 %v3402_v8, %v9140_v4  ;;  %v9142_v7 = vld [vmem:[#allocation72_spill] sm:$0xff]  ;;  %v9143_v61 = vld [vmem:[#allocation75_spill] sm:$0xff] }
 0x721   : > { %v3484_v30 = vmul.f32 %v3455_v13, %v9143_v61 }
 0x723   : > { %5949 = vmatpush3.bf16.msra.mxu0 %v9135_v2  ;;  %5977 = vmatpush3.bf16.msra.mxu1 %v9136_v25  ;;  %v3499_v2 = vmul.f32 %v3414_v57, %v9144_v51  ;;  %v9146_v25 = vld [vmem:[#allocation78_spill] sm:$0xff]  ;;  %v3508_v13 = vpack.c.bf16 %v3484_v30, %v3476_v27 }
 0x724   : > { %5950 = vmatprep.subr.bf16.mxu0 %v9137_v31  ;;  %5978 = vmatprep.subr.bf16.mxu1 %v9138_v22  ;;  %v3474_v31 = vmul.f32 %v3398_v19, %v9146_v25  ;;  %v3501_v22 = vmul.f32 %v3467_v6, %v9147_v32  ;;  %v3498_v6 = vmul.f32 %v3412_v41, %v9154_v48  ;;  %v9158_v27 = vld [vmem:[#allocation90_spill] sm:$0xff]  ;;  %v9160_v41 = vld [vmem:[#allocation91_spill] sm:$0xff] }
 0x725   : > { %v3492_v30 = vmul.f32 %v3461_v40, %v9158_v27  ;;  %v9163_v40 = vld [vmem:[#allocation94_spill] sm:$0xff] }
 0x726   : > { %v3506_v8 = vpack.c.bf16 %v3482_v14, %v3474_v31  ;;  %v9157_v14 = vld [vmem:[#allocation88_spill] sm:$0xff] }
 0x727   : > { %5951 = vmatpush3.bf16.msra.mxu0 %v9139_v52  ;;  %5979 = vmatpush3.bf16.msra.mxu1 %v9141_v42  ;;  %v3491_v52 = vmul.f32 %v3410_v9, %v9149_v50  ;;  %v9151_v42 = vld [vmem:[#allocation83_spill] sm:$0xff]  ;;  %v3490_v31 = vmul.f32 %v3408_v60, %v9157_v14  ;;  %v9162_v60 = vld [vmem:[#allocation93_spill] sm:$0xff] }
 0x728   : > { %5952 = vmatprep.subr.bf16.mxu0 %v9142_v7  ;;  %5980 = vmatprep.subr.bf16.mxu1 %v9145_v56  ;;  %v3493_v4 = vmul.f32 %v3463_v16, %v9151_v42  ;;  %v9152_v7 = vld [vmem:[#allocation80_spill] sm:$0xff]  ;;  %v9156_v16 = vld [vmem:[#allocation86_spill] sm:$0xff] }
 0x729   : > { %v3515_v57 = vpack.c.bf16 %v3499_v2, %v3491_v52  ;;  %v9153_v56 = vld [vmem:[#allocation84_spill] sm:$0xff]  ;;  %v9159_v2 = vld [vmem:[#allocation89_spill] sm:$0xff]  ;;  %v9164_v52 = vld [vmem:[#allocation95_spill] sm:$0xff] }
 0x72a   : > { %v3517_v19 = vpack.c.bf16 %v3501_v22, %v3493_v4  ;;  %v3514_v4 = vpack.c.bf16 %v3498_v6, %v3490_v31 }
 0x72b   : > { %5953 = vmatpush3.bf16.msra.mxu0 %v9150_v24  ;;  %5981 = vmatpush3.bf16.msra.mxu1 %v9152_v7  ;;  %v9155_v24 = vld [vmem:[#allocation87_spill] sm:$0xff] }
 0x72c   : > { %6290 = vmatprep.subr.bf16.mxu0 %v9053_v20  ;;  %6298 = vmatprep.subr.mxu1 %v9153_v56  ;;  %v3500_v9 = vmul.f32 %v3465_v36, %v9155_v24  ;;  %v9161_v36 = vld [vmem:[#allocation92_spill] sm:$0xff] }
 0x72e   : > { %3649 = vmatmul.mubr.bf16.vlgmr.msra.gmra.mxu0 %v3506_v8  ;;  %3698 = vmatmul.mubr.bf16.vlgmr.msra.gmra.mxu1 %v3508_v13  ;;  %v3516_v22 = vpack.c.bf16 %v3500_v9, %v3492_v30 }
 0x72f   : > { %3656 = vmatprep.mubr.bf16.mxu0 %v3515_v57  ;;  %3705 = vmatprep.mubr.bf16.mxu1 %v3517_v19 }
 0x730   : > { %6299 = vmatpush3.msra.mxu1 %v9153_v56 }
 0x731   : > { %6300 = vmatprep.subr.mxu1 %v9156_v16 }
 0x732   : > { %6301 = vmatpush3.msra.mxu1 %v9156_v16 }
 0x733   : > { %6302 = vmatprep.subr.mxu1 %v9159_v2 }
 0x734   : > { %6303 = vmatpush3.msra.mxu1 %v9159_v2 }
 0x735   : > { %6304 = vmatprep.subr.mxu1 %v9160_v41 }
 0x736   : > { %3657 = vmatmul.mubr.bf16.gmra.mxu0 %v3514_v4  ;;  %6305 = vmatpush3.msra.mxu1 %v9160_v41 }
 0x737   : > { %3706 = vmatmul.mubr.bf16.gmra.mxu1 %v3516_v22  ;;  %6320 = vmatprep.subr.mxu1 %v9161_v36 }
 0x738   : > { %6306 = vmatprep.mubr.msk.f32.mxu1 %vm1430_vm2, %v7946_v39  ;;  %6294 = vmatprep.mubr.msk.bf16.mxu0 %vm6777_vm3, %v9053_v20 }
 0x73f   : > { %6307 = vmatmul.mubr.msk.f32.vlgmr.msra.gmra.mxu1 %vm1430_vm2, %v7948_v17 }
 0x740   : > { %6321 = vmatpush3.msra.mxu1 %v9161_v36  ;;  %6328 = vmatprep.mubr.msk.f32.mxu1 %vm1430_vm2, %v7946_v39 }
 0x741   : > { %6322 = vmatprep.subr.mxu1 %v9162_v60 }
 0x742   : > { %6323 = vmatpush3.msra.mxu1 %v9162_v60 }
 0x743   : > { %6324 = vmatprep.subr.mxu1 %v9163_v40 }
 0x744   : > { %6325 = vmatpush3.msra.mxu1 %v9163_v40 }
 0x745   : > { %6326 = vmatprep.subr.mxu1 %v9164_v52 }
 0x746   : > { %6327 = vmatpush3.msra.mxu1 %v9164_v52 }
 0x747   : > { %6329 = vmatmul.mubr.msk.f32.vlgmr.msra.gmra.mxu1 %vm1430_vm2, %v7948_v17  ;;  %6342 = vmatprep.subr.mxu1 %v7777_v33 }
 0x748   : > { %6343 = vmatpush3.msra.mxu1 %v7777_v33 }
 0x749   : > { %6344 = vmatprep.subr.mxu1 %v7789_v35 }
 0x74a   : > { %6345 = vmatpush3.msra.mxu1 %v7789_v35 }
 0x74b   : > { %6346 = vmatprep.subr.mxu1 %v7805_v0 }
 0x74c   : > { %6347 = vmatpush3.msra.mxu1 %v7805_v0 }
 0x74d   : > { %6348 = vmatprep.subr.mxu1 %v7817_v63 }
 0x74e   : > { %6349 = vmatpush3.msra.mxu1 %v7817_v63 }
 0x7ce   : > { %v5898_v8 = vpop.f32.mrf.mxu0  ;;  %v5926_v7 = vpop.f32.mrf.mxu1 }
 0x7d0   : > { %v5899_v13 = vpop.f32.mrf.mxu0  ;;  %v5927_v57 = vpop.f32.mrf.mxu1 }
 0x7d1   : > { %v5900_v47 = vadd.f32 %v5899_v13, %v5898_v8  ;;  %v5928_v26 = vadd.f32 %v5927_v57, %v5926_v7 }
 0x7d2   : > { %v5901_v56 = vpop.f32.mrf.mxu0  ;;  %v5929_v19 = vpop.f32.mrf.mxu1 }
 0x7d4   : > { %v5902_v6 = vpop.f32.mrf.mxu0  ;;  %v5930_v33 = vpop.f32.mrf.mxu1 }
 0x7d5   : > { %v5903_v50 = vadd.f32 %v5902_v6, %v5901_v56  ;;  %v5931_v28 = vadd.f32 %v5930_v33, %v5929_v19  ;;  %v3602_v56 = vadd.f32 %v5928_v26, %v5900_v47 }
 0x7d6   : > { %v5904_v9 = vpop.f32.mrf.mxu0  ;;  %v5932_v16 = vpop.f32.mrf.mxu1 }
 0x7d7   : > { %v3605_v58 = vadd.f32 %v5931_v28, %v5903_v50 }
 0x7d8   : > { %v5905_v31 = vpop.f32.mrf.mxu0  ;;  %v5933_v35 = vpop.f32.mrf.mxu1 }
 0x7d9   : > { %v5906_v24 = vadd.f32 %v5905_v31, %v5904_v9  ;;  %v5934_v48 = vadd.f32 %v5933_v35, %v5932_v16 }
 0x7da   : > { %v5907_v30 = vpop.f32.mrf.mxu0  ;;  %v5935_v2 = vpop.f32.mrf.mxu1 }
 0x7db   : > { %v3610_v43 = vadd.f32 %v5934_v48, %v5906_v24 }
 0x7dc   : > { %v5908_v4 = vpop.f32.mrf.mxu0  ;;  %v5936_v0 = vpop.f32.mrf.mxu1 }
 0x7dd   : > { %v5909_v25 = vadd.f32 %v5908_v4, %v5907_v30  ;;  %v5937_v51 = vadd.f32 %v5936_v0, %v5935_v2 }
 0x7df   : > { %v3613_v45 = vadd.f32 %v5937_v51, %v5909_v25 }
 0x7ee   : > { %v5954_v22 = vpop.f32.mrf.mxu0  ;;  %v5982_v41 = vpop.f32.mrf.mxu1 }
 0x7f0   : > { %v5955_v36 = vpop.f32.mrf.mxu0  ;;  %v5983_v63 = vpop.f32.mrf.mxu1 }
 0x7f1   : > { %v5956_v59 = vadd.f32 %v5955_v36, %v5954_v22  ;;  %v5984_v13 = vadd.f32 %v5983_v63, %v5982_v41 }
 0x7f2   : > { %v5957_v60 = vpop.f32.mrf.mxu0  ;;  %v5985_v40 = vpop.f32.mrf.mxu1 }
 0x7f4   : > { %v5958_v52 = vpop.f32.mrf.mxu0  ;;  %v5986_v27 = vpop.f32.mrf.mxu1 }
 0x7f5   : > { %v5959_v38 = vadd.f32 %v5958_v52, %v5957_v60 }
 0x7f6   : > { %v5960_v14 = vpop.f32.mrf.mxu0 }
 0x7f7   : > { %v5988_v42 = vpop.f32.mrf.mxu1  ;;  %v3654_v19 = vadd.f32 %v5959_v38, %v3605_v58 }
 0x7f8   : > { %v5961_v32 = vpop.f32.mrf.mxu0 }
 0x7f9   : > { %v5962_v61 = vadd.f32 %v5961_v32, %v5960_v14  ;;  %v5989_v53 = vpop.f32.mrf.mxu1  ;;  %v3651_v32 = vadd.f32 %v5956_v59, %v3602_v56  ;;  %v5987_v14 = vadd.f32 %v5986_v27, %v5985_v40 }
 0x7fa   : > { %v5963_v3 = vpop.f32.mrf.mxu0  ;;  %v5990_v6 = vadd.f32 %v5989_v53, %v5988_v42 }
 0x7fb   : > { %v5991_v44 = vpop.f32.mrf.mxu1  ;;  %v3659_v9 = vadd.f32 %v5962_v61, %v3610_v43  ;;  %v3703_v48 = vadd.f32 %v5987_v14, %v3654_v19  ;;  %v3700_v57 = vadd.f32 %v5984_v13, %v3651_v32  ;;  %v9171_v61 = vld [vmem:[#allocation96_spill] sm:$0xff] }
 0x7fc   : > { %v5964_v55 = vpop.f32.mrf.mxu0 }
 0x7fd   : > { %v5965_v16 = vadd.f32 %v5964_v55, %v5963_v3  ;;  %v5992_v31 = vpop.f32.mrf.mxu1  ;;  %v3708_v8 = vadd.f32 %v5990_v6, %v3659_v9  ;;  %v3714_v50 = vpack.c.bf16 %v3703_v48, %v3700_v57 }
 0x7fe   : > { %v5993_v35 = vadd.f32 %v5992_v31, %v5991_v44  ;;  %v9172_v31 = vld [vmem:[#allocation97_spill] sm:$0xff] }
 0x7ff   : > { %v3662_v33 = vadd.f32 %v5965_v16, %v3613_v45 }
 0x801   : > { %v3711_v7 = vadd.f32 %v5993_v35, %v3662_v33  ;;  %v9173_v33 = vld [vmem:[#allocation98_spill] sm:$0xff] }
 0x803   : > { %v3715_v24 = vpack.c.bf16 %v3711_v7, %v3708_v8 }
 0x805   : > { %6291 = vmatpush3.bf16.msra.mxu0 %v3715_v24 }
 0x806   : > { %6292 = vmatprep.subr.bf16.mxu0 %v9053_v20 }
 0x809   : > { %6293 = vmatpush3.bf16.msra.mxu0 %v3714_v50 }
 0x80a   : > { %6309 = vmatprep.subr.mxu0 %v7771_v29 }
 0x80c   : > { %6295 = vmatmul.mubr.msk.bf16.vlgmr.msra.gmra.mxu0 %vm1430_vm2, %v7764_v49 }
 0x80d   : > { %6310 = vmatpush3.msra.mxu0 %v7771_v29 }
 0x80e   : > { %6311 = vmatprep.subr.mxu0 %v7784_v34 }
 0x80f   : > { %6312 = vmatpush3.msra.mxu0 %v7784_v34 }
 0x810   : > { %6313 = vmatprep.subr.mxu0 %v7798_v5 }
 0x811   : > { %6314 = vmatpush3.msra.mxu0 %v7798_v5 }
 0x812   : > { %6315 = vmatprep.subr.mxu0 %v7812_v37 }
 0x813   : > { %6316 = vmatpush3.msra.mxu0 %v7812_v37  ;;  %v9165_v37 = vld [vmem:[#allocation15_spill] sm:$0xff] }
 0x814   : > { %6331 = vmatprep.subr.mxu0 %v7822_v62 }
 0x8cc   : > { %v3750_v26 = vpop.f32.mrf.mxu0 }
 0x8cd   : > { %v3751_v47 = vadd.f32 %v7833_v11, %v3750_v26 }
 0x8ce   : > { %v6296_v28 = vpop.f32.mrf.mxu0 }
 0x8cf   : > { %v3757_v49 = vmax.f32 %v3751_v47, 0.0 }
 0x8d0   : > { %v3753_v29 = vpop.f32.mrf.mxu0 }
 0x8d1   : > { %v3754_v45 = vadd.f32 %v7833_v11, %v3753_v29  ;;  %6317 = vmatprep.mubr.msk.f32.mxu0 %vm1430_vm2, %v3757_v49  ;;  %6350 = vmatprep.mubr.msk.f32.mxu1 %vm1430_vm2, %v3757_v49  ;;  %v9167_v11 = vld [vmem:[#allocation20_spill] sm:$0xff] }
 0x8d2   : > { %v6297_v34 = vpop.f32.mrf.mxu0 }
 0x8d3   : > { %v3758_v5 = vmax.f32 %v3754_v45, 0.0 }
 0x8d5   : > { %6318 = vmatmul.mubr.msk.f32.vlgmr.msra.gmra.mxu0 %vm1430_vm2, %v3758_v5  ;;  %6351 = vmatmul.mubr.msk.f32.vlgmr.msra.gmra.mxu1 %vm1430_vm2, %v3758_v5 }
 0x8d6   : > { %6332 = vmatpush3.msra.mxu0 %v7822_v62  ;;  %6339 = vmatprep.mubr.msk.f32.mxu0 %vm1430_vm2, %v3757_v49  ;;  %v9166_v62 = vmov 0  }
 0x8d7   : > { %6333 = vmatprep.subr.mxu0 %v7842_v12  ;;  %6366 = vmatprep.mubr.msk.bf16.mxu1 %vm1092_vm1, %v7855_v54  ;;  %v6308_v54 = vpop.f32.mrf.mxu1 }
 0x8d8   : > { %6334 = vmatpush3.msra.mxu0 %v7842_v12  ;;  %v9168_v12 = vld [vmem:[#allocation19_spill] sm:$0xff] }
 0x8d9   : > { %6335 = vmatprep.subr.mxu0 %v7851_v15 }
 0x8da   : > { %6336 = vmatpush3.msra.mxu0 %v7851_v15  ;;  %v9169_v15 = vld [vmem:[#allocation24_spill] sm:$0xff] }
 0x8db   : > { %6337 = vmatprep.subr.mxu0 %v7863_v23 }
 0x8dc   : > { %6338 = vmatpush3.msra.mxu0 %v7863_v23 }
 0x8dd   : > { %6340 = vmatmul.mubr.msk.f32.vlgmr.msra.gmra.mxu0 %vm1430_vm2, %v3758_v5  ;;  %6353 = vmatprep.subr.mxu0 %v7870_v18 }
 0x8de   : > { %6354 = vmatpush3.msra.mxu0 %v7870_v18  ;;  %6361 = vmatprep.mubr.msk.f32.mxu0 %vm1430_vm2, %v7946_v39 }
 0x8df   : > { %6355 = vmatprep.subr.mxu0 %v7877_v10 }
 0x8e0   : > { %6356 = vmatpush3.msra.mxu0 %v7877_v10  ;;  %v3831_v10 = vpop.f32.mrf.mxu1 }
 0x8e1   : > { %6357 = vmatprep.subr.mxu0 %v7887_v21 }
 0x8e2   : > { %6358 = vmatpush3.msra.mxu0 %v7887_v21  ;;  %v6330_v59 = vpop.f32.mrf.mxu1 }
 0x8e3   : > { %6359 = vmatprep.subr.mxu0 %v7894_v1 }
 0x8e4   : > { %6360 = vmatpush3.msra.mxu0 %v7894_v1  ;;  %v9170_v1 = vld [vmem:[#allocation29_spill] sm:$0xff]  ;;  %v4001_v53 = vpop.f32.mrf.mxu1 }
 0x8e5   : > { %6362 = vmatmul.mubr.msk.f32.vlgmr.msra.gmra.mxu0 %vm1430_vm2, %v7948_v17  ;;  %4386 = vmatprep.subr.bf16.mxu0 %v9061_v46 }
 0x8e6   : > { %4387 = vmatpush1.bf16.msra.mxu0 %v9165_v37  ;;  %4406 = vmatprep.mubr.bf16.mxu0 %v9166_v62 }
 0x8e7   : > { %4388 = vmatprep.subr.bf16.mxu0 %v9167_v11 }
 0x8ea   : > { %4389 = vmatpush1.bf16.msra.mxu0 %v9168_v12 }
 0x8eb   : > { %4492 = vmatprep.subr.bf16.mxu0 %v9169_v15  ;;  %v9174_v15 = vld [vmem:[#allocation13_spill] sm:$0xff] }
 0x995   : > { %v6319_v23 = vpop.f32.mrf.mxu0  ;;  %v6352_v40 = vpop.f32.mrf.mxu1 }
 0x996   : > { %v3918_v18 = vadd.f32 %v6319_v23, %v6308_v54  ;;  %v4171_v35 = vadd.f32 %v6352_v40, %v9173_v33  ;;  %v9175_v54 = vld [vmem:[#allocation16_spill] sm:$0xff]  ;;  %v9176_v23 = vld [vmem:[#allocation14_spill] sm:$0xff] }
 0x997   : > { %v3912_v21 = vpop.f32.mrf.mxu0  ;;  %v4165_v6 = vpop.f32.mrf.mxu1  ;;  %v9199_v40 = vld [vmem:[#allocation112_spill] sm:$0xff] }
 0x998   : > { %v3922_v38 = vadd.f32 %v3918_v18, %v9170_v1  ;;  %v3913_v43 = vadd.f32 %v3912_v21, %v3831_v10  ;;  %v4166_v7 = vadd.f32 %v9173_v33, %v4165_v6  ;;  %v9179_v18 = vld [vmem:[#allocation21_spill] sm:$0xff]  ;;  %v9206_v6 = vld [vmem:[#allocation119_spill] sm:$0xff]  ;;  %v9207_v33 = vld [vmem:[#allocation120_spill] sm:$0xff] }
 0x99a   : > { %v5669_v3 = vmul.f32 -1.442695, %v3922_v38  ;;  %v3921_v46 = vadd.f32 %v3913_v43, %v9170_v1 }
 0x99c   : > { %6579 = vpow2.f32 %v5669_v3  ;;  %v5668_v55 = vmul.f32 -1.442695, %v3921_v46  ;;  %v9180_v46 = vld [vmem:[#allocation22_spill] sm:$0xff] }
 0x99d   : > { %v6341_v58 = vpop.f32.mrf.mxu0 }
 0x99e   : > { %6581 = vpow2.f32 %v5668_v55  ;;  %v4082_v44 = vadd.f32 %v6341_v58, %v6330_v59  ;;  %v9181_v59 = vld [vmem:[#allocation23_spill] sm:$0xff]  ;;  %v9182_v55 = vld [vmem:[#allocation25_spill] sm:$0xff]  ;;  %v9183_v58 = vld [vmem:[#allocation26_spill] sm:$0xff] }
 0x99f   : > { %v4076_v51 = vpop.f32.mrf.mxu0 }
 0x9a0   : > { %v4086_v25 = vadd.f32 %v4082_v44, %v9171_v61  ;;  %v4077_v42 = vadd.f32 %v4076_v51, %v4001_v53  ;;  %v9184_v53 = vld [vmem:[#allocation27_spill] sm:$0xff]  ;;  %v9185_v51 = vld [vmem:[#allocation28_spill] sm:$0xff] }
 0x9a2   : > { %v5675_v27 = vmul.f32 -1.442695, %v4086_v25  ;;  %v4085_v30 = vadd.f32 %v4077_v42, %v9171_v61  ;;  %v9186_v25 = vld [vmem:[#allocation99_spill] sm:$0xff]  ;;  %v9187_v42 = vld [vmem:[#allocation100_spill] sm:$0xff] }
 0x9a4   : > { %v5674_v2 = vmul.f32 -1.442695, %v4085_v30  ;;  %6583 = vpow2.f32 %v5675_v27  ;;  %v9188_v27 = vld [vmem:[#allocation101_spill] sm:$0xff]  ;;  %v9189_v30 = vld [vmem:[#allocation102_spill] sm:$0xff] }
 0x9a5   : > { %v6363_v63 = vpop.f32.mrf.mxu0 }
 0x9a6   : > { %6585 = vpow2.f32 %v5674_v2  ;;  %v4246_v56 = vadd.f32 %v6363_v63, %v9172_v31  ;;  %v9190_v2 = vld [vmem:[#allocation103_spill] sm:$0xff]  ;;  %v9197_v63 = vld [vmem:[#allocation110_spill] sm:$0xff] }
 0x9a7   : > { %v4240_v9 = vpop.f32.mrf.mxu0 }
 0x9a8   : > { %v4241_v14 = vadd.f32 %v9172_v31, %v4240_v9  ;;  %v9201_v9 = vld [vmem:[#allocation114_spill] sm:$0xff]  ;;  %v9203_v31 = vld [vmem:[#allocation116_spill] sm:$0xff] }
 0x9a9   : > { %v6580_v4 = vpop.eup %6579 }
 0x9aa   : > { %v3930_v0 = vadd.f32 1.0, %v6580_v4  ;;  %v9191_v4 = vld [vmem:[#allocation104_spill] sm:$0xff] }
 0x9ab   : > { %v6582_v22 = vpop.eup %6581 }
 0x9ac   : > { %6587 = vrcp.f32 %v3930_v0  ;;  %v3929_v41 = vadd.f32 1.0, %v6582_v22  ;;  %v9192_v0 = vld [vmem:[#allocation105_spill] sm:$0xff]  ;;  %v9193_v22 = vld [vmem:[#allocation106_spill] sm:$0xff] }
 0x9ae   : > { %6589 = vrcp.f32 %v3929_v41  ;;  %v9194_v41 = vld [vmem:[#allocation107_spill] sm:$0xff] }
 0x9b1   : > { %v6584_v36 = vpop.eup %6583 }
 0x9b2   : > { %v4094_v52 = vadd.f32 1.0, %v6584_v36  ;;  %v9195_v36 = vld [vmem:[#allocation108_spill] sm:$0xff] }
 0x9b3   : > { %v6586_v60 = vpop.eup %6585 }
 0x9b4   : > { %v4093_v16 = vadd.f32 1.0, %v6586_v60  ;;  %6591 = vrcp.f32 %v4094_v52  ;;  %v9198_v60 = vld [vmem:[#allocation111_spill] sm:$0xff]  ;;  %v9200_v52 = vld [vmem:[#allocation113_spill] sm:$0xff] }
 0x9b6   : > { %6593 = vrcp.f32 %v4093_v16  ;;  %v9202_v16 = vld [vmem:[#allocation115_spill] sm:$0xff] }
 0x9b9   : > { %v6588_v19 = vpop.eup %6587 }
 0x9ba   : > { %v4250_v32 = vmul.f32 %v6588_v19, %v4246_v56  ;;  %v9204_v56 = vld [vmem:[#allocation117_spill] sm:$0xff]  ;;  %v9205_v19 = vld [vmem:[#allocation118_spill] sm:$0xff] }
 0x9bb   : > { %v6590_v8 = vpop.eup %6589 }
 0x9bc   : > { %v4252_v13 = vadd.f32 %v4250_v32, %v4171_v35  ;;  %v4249_v48 = vmul.f32 %v6590_v8, %v4241_v14  ;;  %v9208_v35 = vld [vmem:[#allocation121_spill] sm:$0xff]  ;;  %v9209_v32 = vld [vmem:[#allocation122_spill] sm:$0xff]  ;;  %v9210_v14 = vld [vmem:[#allocation123_spill] sm:$0xff] }
 0x9bd   : > { %v9211_v8 = vld [vmem:[#allocation124_spill] sm:$0xff] }
 0x9be   : > { %6595 = vtanh.f32 %v4252_v13  ;;  %v4251_v24 = vadd.f32 %v4249_v48, %v4166_v7  ;;  %v9212_v7 = vld [vmem:[#allocation125_spill] sm:$0xff]  ;;  %v9213_v13 = vld [vmem:[#allocation126_spill] sm:$0xff]  ;;  %v9214_v48 = vld [vmem:[#allocation127_spill] sm:$0xff] }
 0x9c0   : > { %6597 = vtanh.f32 %v4251_v24  ;;  %v9215_v24 = vld [vmem:[#allocation128_spill] sm:$0xff] }
 0x9c1   : > { %v6592_v57 = vpop.eup %6591 }
 0x9c2   : > { %v4256_v26 = vsub.f32 1.0, %v6592_v57  ;;  %v4260_v5 = vmul.f32 %v6592_v57, %v7948_v17  ;;  %v9178_v17 = vld [vmem:[#allocation18_spill] sm:$0xff]  ;;  %v9216_v57 = vld [vmem:[#allocation129_spill] sm:$0xff] }
 0x9c3   : > { %v6594_v50 = vpop.eup %6593 }
 0x9c4   : > { %v4255_v28 = vsub.f32 1.0, %v6594_v50  ;;  %v4259_v34 = vmul.f32 %v6594_v50, %v7946_v39  ;;  %v9177_v39 = vld [vmem:[#allocation17_spill] sm:$0xff]  ;;  %v9217_v50 = vld [vmem:[#allocation130_spill] sm:$0xff] }
 0x9cb   : > { %v6596_v47 = vpop.eup %6595 }
 0x9cc   : > { %v4258_v49 = vmul.f32 %v6596_v47, %v4256_v26  ;;  %v9218_v26 = vld [vmem:[#allocation131_spill] sm:$0xff]  ;;  %v9219_v47 = vld [vmem:[#allocation132_spill] sm:$0xff] }
 0x9cd   : > { %v6598_v29 = vpop.eup %6597 }
 0x9ce   : > { %v4257_v45 = vmul.f32 %v6598_v29, %v4255_v28  ;;  %v8363_v11 = vadd.f32 %v4260_v5, %v4258_v49 }
 0x9d0   : > { %v8361_v37 = vadd.f32 %v4259_v34, %v4257_v45 }
 0x9d2   : > { %v4263_v12 = vpack.c.bf16 %v8363_v11, %v8361_v37 }
 0x9d4   : > { %6364 = vmatprep.subr.bf16.mxu1 %v4263_v12 }
 0x9d5   : > { %6365 = vmatpush3.bf16.msra.mxu1 %v4263_v12  ;;  %v9220_v12 = vld [vmem:[#allocation30_spill] sm:$0xff] }
 0x9d6   : > { %4333 = vmatprep.subr.bf16.mxu1 %v9174_v15 }
 0x9d8   : > { %6367 = vmatmul.mubr.msk.bf16.vlgmr.msra.gmra.mxu1 %vm1092_vm1, %v9175_v54  ;;  %v9221_v54 = vld [vmem:[#allocation31_spill] sm:$0xff] }
 0x9d9   : > { %4334 = vmatpush1.bf16.msra.mxu1 %v9176_v23  ;;  %4353 = vmatprep.mubr.bf16.mxu1 %v9166_v62 }
 0x9da   : > { %4335 = vmatprep.subr.bf16.mxu1 %v9177_v39 }
 0x9dd   : > { %4336 = vmatpush1.bf16.msra.mxu1 %v9178_v17 }
 0x9de   : > { %4439 = vmatprep.subr.bf16.mxu1 %v9179_v18  ;;  %v9222_v18 = vld [vmem:[#allocation32_spill] sm:$0xff] }
 0xa98   : > { %v6368_v10 = vpop.f32.mrf.mxu1 }
 0xa9a   : > { %v4298_v21 = vpop.f32.mrf.mxu1 }
 0xa9c   : > { %v6369_v38 = vpop.f32.mrf.mxu1 }
 0xa9d   : > { %v4314_v44 = vpack.c.bf16 %v6369_v38, %v6368_v10 }
 0xa9e   : > { %v4301_v43 = vpop.f32.mrf.mxu1 }
 0xa9f   : > { %v4313_v3 = vpack.c.bf16 %v4301_v43, %v4298_v21  ;;  %v9223_v21 = vld [vmem:[#allocation33_spill] sm:$0xff]  ;;  %v9224_v43 = vld [vmem:[#allocation34_spill] sm:$0xff] }
 0xaa1   : > { %5682 = vmatmul.mubr.msk.bf16.vlgmr.msra.gmra.mxu1 %vm1430_vm2, %v4313_v3  ;;  %5684 = vmatmul.mubr.msk.bf16.vlgmr.msra.gmra.mxu0 %vm1430_vm2, %v4313_v3 }
 0xaa2   : > { %4363 = vmatprep.mubr.bf16.mxu1 %v9166_v62  ;;  %4416 = vmatprep.mubr.bf16.mxu0 %v9166_v62 }
 0xaa3   : > { %4440 = vmatpush1.bf16.msra.mxu1 %v9180_v46  ;;  %4493 = vmatpush1.bf16.msra.mxu0 %v9181_v59  ;;  %v9225_v46 = vld [vmem:[#allocation35_spill] sm:$0xff] }
 0xaa4   : > { %4441 = vmatprep.subr.bf16.mxu1 %v9182_v55  ;;  %4494 = vmatprep.subr.bf16.mxu0 %v9183_v58  ;;  %v9226_v55 = vld [vmem:[#allocation36_spill] sm:$0xff] }
 0xaa7   : > { %4442 = vmatpush1.bf16.msra.mxu1 %v9184_v53  ;;  %4495 = vmatpush1.bf16.msra.mxu0 %v9185_v51 }
 0xaa8   : > { %6036 = vmatprep.subr.bf16.mxu1 %v9186_v25  ;;  %6064 = vmatprep.subr.bf16.mxu0 %v9187_v42 }
 0xaa9   : > { %5683 = vmatmul.mubr.msk.bf16.gmra.mxu1 %vm1430_vm2, %v4314_v44  ;;  %5685 = vmatmul.mubr.msk.bf16.gmra.mxu0 %vm1430_vm2, %v4314_v44 }
 0xaaa   : > { %4459 = vmatprep.mubr.bf16.mxu1 %v9166_v62  ;;  %4512 = vmatprep.mubr.bf16.mxu0 %v9166_v62 }
 0xab1   : > { %5686 = vmatmul.mubr.msk.bf16.vlgmr.msra.gmra.mxu1 %vm1430_vm2, %v4313_v3  ;;  %5688 = vmatmul.mubr.msk.bf16.vlgmr.msra.gmra.mxu0 %vm1430_vm2, %v4313_v3 }
 0xab2   : > { %4469 = vmatprep.mubr.bf16.mxu1 %v9166_v62  ;;  %4522 = vmatprep.mubr.bf16.mxu0 %v9166_v62  ;;  %v9196_v62 = vld [vmem:[#allocation109_spill] sm:$0xff] }
 0xab3   : > { %6037 = vmatpush3.bf16.msra.mxu1 %v9188_v27  ;;  %6065 = vmatpush3.bf16.msra.mxu0 %v9189_v30 }
 0xab4   : > { %6038 = vmatprep.subr.bf16.mxu1 %v9190_v2  ;;  %6066 = vmatprep.subr.bf16.mxu0 %v9191_v4 }
 0xab7   : > { %6039 = vmatpush3.bf16.msra.mxu1 %v9192_v0  ;;  %6067 = vmatpush3.bf16.msra.mxu0 %v9193_v22 }
 0xab8   : > { %6040 = vmatprep.subr.bf16.mxu1 %v9194_v41  ;;  %6068 = vmatprep.subr.bf16.mxu0 %v9195_v36  ;;  %v9228_v36 = vld [vmem:[#allocation133_spill] sm:$0xff] }
 0xab9   : > { %5687 = vmatmul.mubr.msk.bf16.gmra.mxu1 %vm1430_vm2, %v4314_v44  ;;  %5689 = vmatmul.mubr.msk.bf16.gmra.mxu0 %vm1430_vm2, %v4314_v44  ;;  %v9227_v44 = vld [vmem:[#allocation37_spill] sm:$0xff] }
 0xabb   : > { %6041 = vmatpush3.bf16.msra.mxu1 %v9196_v62  ;;  %6069 = vmatpush3.bf16.msra.mxu0 %v9197_v63  ;;  %v9229_v62 = vld [vmem:[#allocation134_spill] sm:$0xff]  ;;  %v9230_v63 = vld [vmem:[#allocation39_spill] sm:$0xff] }
 0xabc   : > { %6042 = vmatprep.subr.bf16.mxu1 %v9198_v60  ;;  %6070 = vmatprep.subr.bf16.mxu0 %v9199_v40  ;;  %v9231_v40 = vld [vmem:[#allocation41_spill] sm:$0xff] }
 0xabf   : > { %6043 = vmatpush3.bf16.msra.mxu1 %v9200_v52  ;;  %6071 = vmatpush3.bf16.msra.mxu0 %v9201_v9 }
 0xac0   : > { %6044 = vmatprep.subr.bf16.mxu1 %v9202_v16  ;;  %6072 = vmatprep.subr.bf16.mxu0 %v9203_v31  ;;  %v9232_v31 = vld [vmem:[#allocation135_spill] sm:$0xff] }
 0xac3   : > { %6045 = vmatpush3.bf16.msra.mxu1 %v9204_v56  ;;  %6073 = vmatpush3.bf16.msra.mxu0 %v9205_v19  ;;  %v9233_v56 = vld [vmem:[#allocation136_spill] sm:$0xff] }
 0xac4   : > { %6046 = vmatprep.subr.bf16.mxu1 %v9206_v6  ;;  %6074 = vmatprep.subr.bf16.mxu0 %v9207_v33  ;;  %v9234_v19 = vld [vmem:[#allocation40_spill] sm:$0xff]  ;;  %v9235_v33 = vld [vmem:[#allocation42_spill] sm:$0xff] }
 0xac7   : > { %6047 = vmatpush3.bf16.msra.mxu1 %v9208_v35  ;;  %6075 = vmatpush3.bf16.msra.mxu0 %v9209_v32  ;;  %v9236_v32 = vld [vmem:[#allocation43_spill] sm:$0xff] }
 0xac8   : > { %6048 = vmatprep.subr.bf16.mxu1 %v9210_v14  ;;  %6076 = vmatprep.subr.bf16.mxu0 %v9211_v8  ;;  %v9237_v8 = vld [vmem:[#allocation44_spill] sm:$0xff] }
 0xacb   : > { %6049 = vmatpush3.bf16.msra.mxu1 %v9212_v7  ;;  %6077 = vmatpush3.bf16.msra.mxu0 %v9213_v13  ;;  %v9238_v13 = vld [vmem:[#allocation38_spill] sm:$0xff] }
 0xacc   : > { %6050 = vmatprep.subr.bf16.mxu1 %v9214_v48  ;;  %6078 = vmatprep.subr.bf16.mxu0 %v9215_v24 }
 0xacf   : > { %6051 = vmatpush3.bf16.msra.mxu1 %v9216_v57  ;;  %6079 = vmatpush3.bf16.msra.mxu0 %v9217_v50  ;;  %v9239_v50 = vld [vmem:[#allocation46_spill] sm:$0xff] }
 0xad0   : > { %6092 = vmatprep.subr.bf16.mxu1 %v9218_v26  ;;  %6120 = vmatprep.subr.bf16.mxu0 %v9219_v47 }
 0xb61   : > { %v4355_v28 = vpop.f32.mrf.mxu1  ;;  %v4408_v49 = vpop.f32.mrf.mxu0 }
 0xb62   : > { %v4533_v58 = vmul.f32 %v4355_v28, %v9226_v55  ;;  %v4535_v53 = vmul.f32 %v4408_v49, %v9227_v44  ;;  %v6659_v49 = vld [vmem:[%s8745_s25 + $0x130] sm:$0xff]   ;;  %v9242_v55 = vld [vmem:[#allocation56_spill] sm:$0xff]  ;;  %v9243_v44 = vld [vmem:[#allocation57_spill] sm:$0xff] }
 0xb63   : > { %v4357_v29 = vpop.f32.mrf.mxu1  ;;  %v4410_v45 = vpop.f32.mrf.mxu0 }
 0xb64   : > { %v4534_v10 = vmul.f32 %v4357_v29, %v9222_v18  ;;  %v4536_v38 = vmul.f32 %v4410_v45, %v9223_v21  ;;  %v6660_v45 = vld [vmem:[%s8745_s25 + $0x1b0] sm:$0xff]   ;;  %v6664_v18 = vld [vmem:[%s8745_s25 + $0x1a8] sm:$0xff]  }
 0xb65   : > { %v4359_v34 = vpop.f32.mrf.mxu1  ;;  %v4412_v5 = vpop.f32.mrf.mxu0 }
 0xb66   : > { %v4541_v15 = vmul.f32 %v4359_v34, %v9220_v12  ;;  %v4543_v23 = vmul.f32 %v4412_v5, %v9221_v54  ;;  %v6661_v12 = vld [vmem:[%s8745_s25 + $0x168] sm:$0xff]  }
 0xb67   : > { %v4361_v39 = vpop.f32.mrf.mxu1  ;;  %v4414_v17 = vpop.f32.mrf.mxu0  ;;  %v6662_v54 = vld [vmem:[%s8745_s25 + $0x1e8] sm:$0xff]  }
 0xb68   : > { %v4542_v3 = vmul.f32 %v4361_v39, %v9224_v43  ;;  %v4544_v59 = vmul.f32 %v4414_v17, %v9225_v46  ;;  %v4565_v30 = vpack.c.bf16 %v4541_v15, %v4533_v58  ;;  %v4567_v2 = vpack.c.bf16 %v4543_v23, %v4535_v53  ;;  %v6663_v17 = vld [vmem:[%s8745_s25 + $0x128] sm:$0xff]   ;;  %v9240_v43 = vld [vmem:[#allocation54_spill] sm:$0xff]  ;;  %v9241_v46 = vld [vmem:[#allocation55_spill] sm:$0xff] }
 0xb69   : > { %v4365_v51 = vpop.f32.mrf.mxu1  ;;  %v4418_v25 = vpop.f32.mrf.mxu0 }
 0xb6a   : > { %v4566_v42 = vpack.c.bf16 %v4542_v3, %v4534_v10  ;;  %v4568_v27 = vpack.c.bf16 %v4544_v59, %v4536_v38  ;;  %v4549_v48 = vmul.f32 %v4365_v51, %v9238_v13  ;;  %v4551_v26 = vmul.f32 %v4418_v25, %v9239_v50  ;;  %v6665_v38 = vld [vmem:[%s8745_s25 + $0x160] sm:$0xff]   ;;  %v9245_v13 = vld [vmem:[#allocation75_spill] sm:$0xff] }
 0xb6b   : > { %v4367_v4 = vpop.f32.mrf.mxu1  ;;  %v4420_v0 = vpop.f32.mrf.mxu0  ;;  %v6666_v51 = vld [vmem:[%s8745_s25 + $0x1e0] sm:$0xff]  }
 0xb6c   : > { %4613 = vmatprep.mubr.bf16.mxu1 %v4566_v42  ;;  %4662 = vmatprep.mubr.bf16.mxu0 %v4568_v27  ;;  %v4550_v60 = vmul.f32 %v4367_v4, %v9230_v63  ;;  %v4552_v6 = vmul.f32 %v4420_v0, %v9234_v19  ;;  %v6668_v4 = vld [vmem:[%s8745_s25 + $0x1a0] sm:$0xff]   ;;  %v6669_v0 = vld [vmem:[%s8745_s25 + $0x158] sm:$0xff]   ;;  %v6678_v19 = vld [vmem:[%s8745_s25 + $0x1c8] sm:$0xff]  }
 0xb6d   : > { %v4369_v22 = vpop.f32.mrf.mxu1  ;;  %v4422_v41 = vpop.f32.mrf.mxu0  ;;  %4614 = vmatmul.mubr.bf16.vlgmr.msra.gmra.mxu1 %v4565_v30  ;;  %4663 = vmatmul.mubr.bf16.vlgmr.msra.gmra.mxu0 %v4567_v2  ;;  %v6667_v2 = vld [vmem:[%s8745_s25 + $0x120] sm:$0xff]   ;;  %v6672_v63 = vld [vmem:[%s8745_s25 + $0x198] sm:$0xff]  }
 0xb6e   : > { %6093 = vmatpush3.bf16.msra.mxu1 %v9228_v36  ;;  %6121 = vmatpush3.bf16.msra.mxu0 %v9229_v62  ;;  %v4557_v52 = vmul.f32 %v4369_v22, %v9231_v40  ;;  %v4559_v35 = vmul.f32 %v4422_v41, %v9235_v33  ;;  %v6670_v22 = vld [vmem:[%s8745_s25 + $0x1d8] sm:$0xff]   ;;  %v6674_v40 = vld [vmem:[%s8745_s25 + $0x1d0] sm:$0xff]   ;;  %v9246_v50 = vld [vmem:[#allocation76_spill] sm:$0xff] }
 0xb6f   : > { %v4371_v9 = vpop.f32.mrf.mxu1  ;;  %v4424_v16 = vpop.f32.mrf.mxu0  ;;  %6094 = vmatprep.subr.bf16.mxu1 %v9232_v31  ;;  %6122 = vmatprep.subr.bf16.mxu0 %v9233_v56  ;;  %v6671_v62 = vld [vmem:[%s8745_s25 + $0x118] sm:$0xff]   ;;  %v6676_v31 = vld [vmem:[%s8745_s25 + $0x190] sm:$0xff]   ;;  %v6677_v56 = vld [vmem:[%s8745_s25 + $0x148] sm:$0xff]  }
 0xb70   : > { %v4558_v14 = vmul.f32 %v4371_v9, %v9236_v32  ;;  %v4560_v7 = vmul.f32 %v4424_v16, %v9237_v8  ;;  %v4573_v29 = vpack.c.bf16 %v4557_v52, %v4549_v48  ;;  %v4575_v15 = vpack.c.bf16 %v4559_v35, %v4551_v26  ;;  %v6675_v16 = vld [vmem:[%s8745_s25 + $0x110] sm:$0xff]   ;;  %v6679_v35 = vld [vmem:[%s8745_s25 + $0x108] sm:$0xff]  }
 0xb71   : > { %v8448_v24 = vpop.f32.mrf.mxu1  ;;  %v8450_v57 = vpop.f32.mrf.mxu0  ;;  %v9244_v32 = vld [vmem:[#allocation74_spill] sm:$0xff]  ;;  %v6680_v8 = vld [vmem:[%s8745_s25 + $0x188] sm:$0xff]  }
 0xb72   : > { %v4574_v47 = vpack.c.bf16 %v4558_v14, %v4550_v60  ;;  %v4576_v28 = vpack.c.bf16 %v4560_v7, %v4552_v6  ;;  %6095 = vmatpush3.bf16.msra.mxu1 %v6659_v49  ;;  %6123 = vmatpush3.bf16.msra.mxu0 %v6660_v45  ;;  %v6673_v60 = vld [vmem:[%s8745_s25 + $0x150] sm:$0xff]   ;;  %v6681_v7 = vld [vmem:[%s8745_s25 + $0x140] sm:$0xff]  }
 0xb73   : > { %v4463_v34 = vpop.f32.mrf.mxu1  ;;  %v4516_v5 = vpop.f32.mrf.mxu0  ;;  %6096 = vmatprep.subr.bf16.mxu1 %v6661_v12  ;;  %6124 = vmatprep.subr.bf16.mxu0 %v6662_v54  ;;  %v9250_v12 = vld [vmem:[#allocation82_spill] sm:$0xff]  ;;  %v6683_v54 = vld [vmem:[%s8745_s25 + $0x100] sm:$0xff]  }
 0xb74   : > { %4621 = vmatprep.mubr.bf16.mxu1 %v4574_v47  ;;  %4670 = vmatprep.mubr.bf16.mxu0 %v4576_v28  ;;  %v4538_v3 = vmul.f32 %v4463_v34, %v9240_v43  ;;  %v4540_v59 = vmul.f32 %v4516_v5, %v9241_v46  ;;  %v6682_v47 = vld [vmem:[%s8745_s25 + $0x1c0] sm:$0xff]   ;;  %v9247_v28 = vld [vmem:[#allocation78_spill] sm:$0xff]  ;;  %v9249_v34 = vld [vmem:[#allocation81_spill] sm:$0xff] }
 0xb75   : > { %v4465_v23 = vpop.f32.mrf.mxu1  ;;  %v4518_v39 = vpop.f32.mrf.mxu0  ;;  %4622 = vmatmul.mubr.bf16.gmra.mxu1 %v4573_v29  ;;  %4671 = vmatmul.mubr.bf16.gmra.mxu0 %v4575_v15  ;;  %v4537_v49 = vmul.f32 %v8448_v24, %v9247_v28  ;;  %v9248_v29 = vld [vmem:[#allocation79_spill] sm:$0xff]  ;;  %v4539_v5 = vmul.f32 %v8450_v57, %v9249_v34 }
 0xb76   : > { %6097 = vmatpush3.bf16.msra.mxu1 %v6663_v17  ;;  %6125 = vmatpush3.bf16.msra.mxu0 %v6664_v18  ;;  %v4545_v14 = vmul.f32 %v4465_v23, %v9244_v32  ;;  %v4547_v48 = vmul.f32 %v4518_v39, %v9245_v13  ;;  %v9251_v39 = vld [vmem:[#allocation83_spill] sm:$0xff]  ;;  %v6684_v18 = vld [vmem:[%s8745_s25 + $0x180] sm:$0xff]  }
 0xb77   : > { %v4467_v10 = vpop.f32.mrf.mxu1  ;;  %v4520_v21 = vpop.f32.mrf.mxu0  ;;  %6098 = vmatprep.subr.bf16.mxu1 %v6665_v38  ;;  %6126 = vmatprep.subr.bf16.mxu0 %v6666_v51  ;;  %v6685_v57 = vld [vmem:[%s8738_s18 + $0x18] sm:$0xff]  ;;  %v9252_v38 = vld [vmem:[#allocation85_spill] sm:$0xff] }
 0xb78   : > { %v4546_v58 = vmul.f32 %v4467_v10, %v9242_v55  ;;  %v4548_v53 = vmul.f32 %v4520_v21, %v9243_v44  ;;  %v4569_v23 = vpack.c.bf16 %v4545_v14, %v4537_v49  ;;  %v4571_v24 = vpack.c.bf16 %v4547_v48, %v4539_v5  ;;  %v9254_v55 = vld [vmem:[#allocation88_spill] sm:$0xff]  ;;  %v9255_v44 = vld [vmem:[#allocation90_spill] sm:$0xff]  ;;  %v6687_v51 = vld [vmem:[%s8738_s18 + $0x8] sm:$0xff] }
 0xb79   : > { %v8481_v25 = vpop.f32.mrf.mxu1  ;;  %v8483_v30 = vpop.f32.mrf.mxu0 }
 0xb7a   : > { %v4570_v42 = vpack.c.bf16 %v4546_v58, %v4538_v3  ;;  %v4572_v27 = vpack.c.bf16 %v4548_v53, %v4540_v59  ;;  %6099 = vmatpush3.bf16.msra.mxu1 %v6667_v2  ;;  %6127 = vmatpush3.bf16.msra.mxu0 %v6668_v4  ;;  %v9253_v3 = vld [vmem:[#allocation87_spill] sm:$0xff]  ;;  %v6686_v59 = vld [vmem:[%s8738_s18 + $0x10] sm:$0xff]  ;;  %v4553_v58 = vmul.f32 %v8481_v25, %v9254_v55  ;;  %v6688_v2 = vld [vmem:[%s8738_s18] sm:$0xff] }
 0xb7b   : > { %6100 = vmatprep.subr.bf16.mxu1 %v6669_v0  ;;  %6128 = vmatprep.subr.bf16.mxu0 %v6670_v22  ;;  %v4473_v41 = vpop.f32.mrf.mxu1  ;;  %v4526_v36 = vpop.f32.mrf.mxu0  ;;  %v4555_v53 = vmul.f32 %v8483_v30, %v9255_v44  ;;  %v6689_v25 = vld [vmem:[%s8739_s19 + $0x18] sm:$0xff]  ;;  %v6690_v30 = vld [vmem:[%s8739_s19 + $0x10] sm:$0xff]  ;;  %v6691_v4 = vld [vmem:[%s8739_s19 + $0x8] sm:$0xff] }
 0xb7c   : > { %4711 = vmatprep.mubr.bf16.mxu1 %v4570_v42  ;;  %4760 = vmatprep.mubr.bf16.mxu0 %v4572_v27  ;;  %v4554_v15 = vmul.f32 %v4473_v41, %v9250_v12  ;;  %v4556_v17 = vmul.f32 %v4526_v36, %v9251_v39  ;;  %v6692_v0 = vld [vmem:[%s8739_s19] sm:$0xff]  ;;  %v6693_v22 = vld [vmem:[%s8734_s14 + $0x18] sm:$0xff]  ;;  %v6694_v41 = vld [vmem:[%s8734_s14 + $0x10] sm:$0xff] }
 0xb7d   : > { %v4475_v52 = vpop.f32.mrf.mxu1  ;;  %v4528_v9 = vpop.f32.mrf.mxu0  ;;  %v6695_v36 = vld [vmem:[%s8734_s14 + $0x8] sm:$0xff] }
 0xb7e   : > { %6101 = vmatpush3.bf16.msra.mxu1 %v6671_v62  ;;  %6129 = vmatpush3.bf16.msra.mxu0 %v6672_v63  ;;  %v4561_v43 = vmul.f32 %v4475_v52, %v9252_v38  ;;  %v4563_v46 = vmul.f32 %v4528_v9, %v9253_v3  ;;  %v6696_v62 = vld [vmem:[%s8734_s14] sm:$0xff] }
 0xb7f   : > { %6102 = vmatprep.subr.bf16.mxu1 %v6673_v60  ;;  %6130 = vmatprep.subr.bf16.mxu0 %v6674_v40  ;;  %v4477_v6 = vpop.f32.mrf.mxu1  ;;  %v4530_v33 = vpop.f32.mrf.mxu0 }
 0xb80   : > { %v4562_v26 = vmul.f32 %v4477_v6, %v9246_v50  ;;  %v4564_v45 = vmul.f32 %v4530_v33, %v9248_v29  ;;  %v4577_v42 = vpack.c.bf16 %v4561_v43, %v4553_v58  ;;  %v4579_v27 = vpack.c.bf16 %v4563_v46, %v4555_v53 }
 0xb82   : > { %6103 = vmatpush3.bf16.msra.mxu1 %v6675_v16  ;;  %6131 = vmatpush3.bf16.msra.mxu0 %v6676_v31  ;;  %v4578_v10 = vpack.c.bf16 %v4562_v26, %v4554_v15  ;;  %v4580_v21 = vpack.c.bf16 %v4564_v45, %v4556_v17 }
 0xb83   : > { %6104 = vmatprep.subr.bf16.mxu1 %v6677_v56  ;;  %6132 = vmatprep.subr.bf16.mxu0 %v6678_v19 }
 0xb86   : > { %6105 = vmatpush3.bf16.msra.mxu1 %v6679_v35  ;;  %6133 = vmatpush3.bf16.msra.mxu0 %v6680_v8 }
 0xb87   : > { %6106 = vmatprep.subr.bf16.mxu1 %v6681_v7  ;;  %6134 = vmatprep.subr.bf16.mxu0 %v6682_v47 }
 0xb8a   : > { %6107 = vmatpush3.bf16.msra.mxu1 %v6683_v54  ;;  %6135 = vmatpush3.bf16.msra.mxu0 %v6684_v18 }
 0xb8b   : > { %6370 = vmatprep.subr.bf16.mxu1 %v9053_v20  ;;  %6378 = vmatprep.subr.mxu0 %v6685_v57 }
 0xb8d   : > { %4712 = vmatmul.mubr.bf16.vlgmr.msra.gmra.mxu1 %v4569_v23  ;;  %4761 = vmatmul.mubr.bf16.vlgmr.msra.gmra.mxu0 %v4571_v24 }
 0xb8e   : > { %4719 = vmatprep.mubr.bf16.mxu1 %v4578_v10  ;;  %4768 = vmatprep.mubr.bf16.mxu0 %v4580_v21 }
 0xb8f   : > { %6379 = vmatpush3.msra.mxu0 %v6685_v57 }
 0xb90   : > { %6380 = vmatprep.subr.mxu0 %v6686_v59 }
 0xb91   : > { %6381 = vmatpush3.msra.mxu0 %v6686_v59 }
 0xb92   : > { %6382 = vmatprep.subr.mxu0 %v6687_v51 }
 0xb93   : > { %6383 = vmatpush3.msra.mxu0 %v6687_v51 }
 0xb94   : > { %6384 = vmatprep.subr.mxu0 %v6688_v2 }
 0xb95   : > { %4720 = vmatmul.mubr.bf16.gmra.mxu1 %v4577_v42  ;;  %6385 = vmatpush3.msra.mxu0 %v6688_v2 }
 0xb96   : > { %4769 = vmatmul.mubr.bf16.gmra.mxu0 %v4579_v27  ;;  %6400 = vmatprep.subr.mxu0 %v6689_v25 }
 0xb97   : > { %6386 = vmatprep.mubr.msk.f32.mxu0 %vm1430_vm2, %v8361_v37  ;;  %6374 = vmatprep.mubr.msk.bf16.mxu1 %vm6777_vm3, %v9053_v20 }
 0xb9e   : > { %6387 = vmatmul.mubr.msk.f32.vlgmr.msra.gmra.mxu0 %vm1430_vm2, %v8363_v11 }
 0xb9f   : > { %6401 = vmatpush3.msra.mxu0 %v6689_v25  ;;  %6408 = vmatprep.mubr.msk.f32.mxu0 %vm1430_vm2, %v8361_v37 }
 0xba0   : > { %6402 = vmatprep.subr.mxu0 %v6690_v30 }
 0xba1   : > { %6403 = vmatpush3.msra.mxu0 %v6690_v30 }
 0xba2   : > { %6404 = vmatprep.subr.mxu0 %v6691_v4 }
 0xba3   : > { %6405 = vmatpush3.msra.mxu0 %v6691_v4 }
 0xba4   : > { %6406 = vmatprep.subr.mxu0 %v6692_v0 }
 0xba5   : > { %6407 = vmatpush3.msra.mxu0 %v6692_v0 }
 0xba6   : > { %6409 = vmatmul.mubr.msk.f32.vlgmr.msra.gmra.mxu0 %vm1430_vm2, %v8363_v11  ;;  %6422 = vmatprep.subr.mxu0 %v6693_v22 }
 0xba7   : > { %6423 = vmatpush3.msra.mxu0 %v6693_v22 }
 0xba8   : > { %6424 = vmatprep.subr.mxu0 %v6694_v41 }
 0xba9   : > { %6425 = vmatpush3.msra.mxu0 %v6694_v41 }
 0xbaa   : > { %6426 = vmatprep.subr.mxu0 %v6695_v36 }
 0xbab   : > { %6427 = vmatpush3.msra.mxu0 %v6695_v36 }
 0xbac   : > { %6428 = vmatprep.subr.mxu0 %v6696_v62 }
 0xbad   : > { %6429 = vmatpush3.msra.mxu0 %v6696_v62 }
 0xbae   : > { %6444 = vmatprep.subr.bf16.mxu0 %v9053_v20 }
 0xc2d   : > { %v6052_v63 = vpop.f32.mrf.mxu1  ;;  %v6080_v60 = vpop.f32.mrf.mxu0 }
 0xc2f   : > { %v6053_v40 = vpop.f32.mrf.mxu1  ;;  %v6081_v52 = vpop.f32.mrf.mxu0 }
 0xc30   : > { %v6054_v10 = vadd.f32 %v6053_v40, %v6052_v63  ;;  %v6082_v57 = vadd.f32 %v6081_v52, %v6080_v60  ;;  %v6697_v52 = vld [vmem:[%s8732_s12 + $0x18] sm:$0xff] }
 0xc31   : > { %v6055_v9 = vpop.f32.mrf.mxu1  ;;  %v6083_v16 = vpop.f32.mrf.mxu0 }
 0xc32   : > { %v4665_v42 = vadd.f32 %v6082_v57, %v6054_v10 }
 0xc33   : > { %v6056_v31 = vpop.f32.mrf.mxu1  ;;  %v6084_v56 = vpop.f32.mrf.mxu0 }
 0xc34   : > { %v6057_v15 = vadd.f32 %v6056_v31, %v6055_v9  ;;  %v6085_v54 = vadd.f32 %v6084_v56, %v6083_v16  ;;  %v6698_v9 = vld [vmem:[%s7760_s4] sm:$0xff]   ;;  %v6699_v16 = vld [vmem:[%s8732_s12 + $0x10] sm:$0xff]  ;;  %v6700_v31 = vld [vmem:[%s8732_s12 + $0x8] sm:$0xff]  ;;  %s9257_s4 = sld [smem:[#allocation141_spill]] }
 0xc35   : > { %v6058_v19 = vpop.f32.mrf.mxu1  ;;  %v6086_v6 = vpop.f32.mrf.mxu0  ;;  %v6701_v56 = vld [vmem:[%s8732_s12] sm:$0xff] }
 0xc36   : > { %v4668_v46 = vadd.f32 %v6085_v54, %v6057_v15 }
 0xc37   : > { %v6059_v33 = vpop.f32.mrf.mxu1  ;;  %v6087_v35 = vpop.f32.mrf.mxu0 }
 0xc38   : > { %v6060_v34 = vadd.f32 %v6059_v33, %v6058_v19  ;;  %v6088_v5 = vadd.f32 %v6087_v35, %v6086_v6  ;;  %v6702_v19 = vld [vmem:[%s8733_s13 + $0x18] sm:$0xff]  ;;  %v6703_v33 = vld [vmem:[%s9054_s11] ss:$0 sm:$0xff]  ;;  %s8679_s11 = scalar_lea.hbm %s9259_s2, %s5709_s6 }
 0xc39   : > { %v6061_v32 = vpop.f32.mrf.mxu1  ;;  %v6089_v14 = vpop.f32.mrf.mxu0 }
 0xc3a   : > { %v4673_v38 = vadd.f32 %v6088_v5, %v6060_v34  ;;  %s866_s27 = scalar_lea.vmem %s9257_s4, %s5507_s0  ;;  %s5374_s0 = scalar_lea.sflag [#allocation3], %s840_s28 }
 0xc3b   : > { %v6062_v8 = vpop.f32.mrf.mxu1  ;;  %v6090_v7 = vpop.f32.mrf.mxu0  ;;  %s6719_s4 = scalar_lea.vmem %s6718_s30, 128 }
 0xc3c   : > { %v6063_v39 = vadd.f32 %v6062_v8, %v6061_v32  ;;  %v6091_v17 = vadd.f32 %v6090_v7, %v6089_v14  ;;  %p6721_p1 = scmp.lt.s32.totalorder %s6719_s4, %s6713_s7 }
 0xc3e   : > { %v4676_v55 = vadd.f32 %v6091_v17, %v6063_v39  ;;  %p6722_p2 = por %p6721_p1, %p6720_p0 }
 0xc40   : > { %p6723_p3 = pnand %p6722_p2, %p6716_p13 }
 0xc4d   : > { %v6108_v13 = vpop.f32.mrf.mxu1  ;;  %v6136_v48 = vpop.f32.mrf.mxu0 }
 0xc4f   : > { %v6109_v50 = vpop.f32.mrf.mxu1  ;;  %v6137_v26 = vpop.f32.mrf.mxu0 }
 0xc50   : > { %v6110_v58 = vadd.f32 %v6109_v50, %v6108_v13  ;;  %v6138_v36 = vadd.f32 %v6137_v26, %v6136_v48  ;;  %v6704_v50 = vld [vmem:[%s8733_s13 + $0x10] sm:$0xff]  ;;  %v6705_v26 = vld [vmem:[%s8733_s13 + $0x8] sm:$0xff] }
 0xc51   : > { %v6111_v47 = vpop.f32.mrf.mxu1  ;;  %v6139_v28 = vpop.f32.mrf.mxu0 }
 0xc52   : > { %v4714_v4 = vadd.f32 %v6110_v58, %v4665_v42 }
 0xc53   : > { %v6112_v49 = vpop.f32.mrf.mxu1  ;;  %v6140_v29 = vpop.f32.mrf.mxu0 }
 0xc54   : > { %v6113_v43 = vadd.f32 %v6112_v49, %v6111_v47  ;;  %v6141_v0 = vadd.f32 %v6140_v29, %v6139_v28  ;;  %v4763_v60 = vadd.f32 %v6138_v36, %v4714_v4  ;;  %v6706_v47 = vld [vmem:[%s8733_s13] sm:$0xff]  ;;  %v6707_v28 = vld [vmem:[%s8740_s20 + $0x18] sm:$0xff]  ;;  %v6709_v49 = vld [vmem:[%s8740_s20 + $0x8] sm:$0xff] }
 0xc55   : > { %v6114_v45 = vpop.f32.mrf.mxu1  ;;  %v6710_v29 = vld [vmem:[%s8740_s20] sm:$0xff] }
 0xc56   : > { %v6142_v12 = vpop.f32.mrf.mxu0  ;;  %v4717_v27 = vadd.f32 %v6113_v43, %v4668_v46  ;;  %v6712_v36 = vld [vmem:[%s8737_s17] ss:$0 sm:$0xff] }
 0xc57   : > { %v6115_v23 = vpop.f32.mrf.mxu1 }
 0xc58   : > { %v6116_v18 = vadd.f32 %v6115_v23, %v6114_v45  ;;  %v6143_v24 = vpop.f32.mrf.mxu0  ;;  %v4766_v62 = vadd.f32 %v6141_v0, %v4717_v27 }
 0xc59   : > { %v6117_v21 = vpop.f32.mrf.mxu1  ;;  %v6144_v2 = vadd.f32 %v6143_v24, %v6142_v12 }
 0xc5a   : > { %v6145_v3 = vpop.f32.mrf.mxu0  ;;  %v4722_v44 = vadd.f32 %v6116_v18, %v4673_v38  ;;  %v4777_v40 = vpack.c.bf16 %v4766_v62, %v4763_v60 }
 0xc5b   : > { %v6118_v59 = vpop.f32.mrf.mxu1 }
 0xc5c   : > { %v6119_v53 = vadd.f32 %v6118_v59, %v6117_v21  ;;  %v6146_v51 = vpop.f32.mrf.mxu0  ;;  %v4771_v22 = vadd.f32 %v6144_v2, %v4722_v44 }
 0xc5d   : > { %v6147_v30 = vadd.f32 %v6146_v51, %v6145_v3 }
 0xc5e   : > { %v4725_v25 = vadd.f32 %v6119_v53, %v4676_v55  ;;  %v6388_v45 = vpop.f32.mrf.mxu0 }
 0xc60   : > { %v4774_v41 = vadd.f32 %v6147_v30, %v4725_v25  ;;  %v4894_v12 = vpop.f32.mrf.mxu0 }
 0xc62   : > { %v4778_v63 = vpack.c.bf16 %v4774_v41, %v4771_v22 }
 0xc64   : > { %6371 = vmatpush3.bf16.msra.mxu1 %v4778_v63 }
 0xc65   : > { %6372 = vmatprep.subr.bf16.mxu1 %v9053_v20 }
 0xc66   : > { %v6410_v18 = vpop.f32.mrf.mxu0 }
 0xc68   : > { %6373 = vmatpush3.bf16.msra.mxu1 %v4777_v40  ;;  %v5064_v21 = vpop.f32.mrf.mxu0 }
 0xc69   : > { %6389 = vmatprep.subr.mxu1 %v6697_v52 }
 0xc6b   : > { %6375 = vmatmul.mubr.msk.bf16.vlgmr.msra.gmra.mxu1 %vm1430_vm2, %v6698_v9 }
 0xc6c   : > { %6390 = vmatpush3.msra.mxu1 %v6697_v52 }
 0xc6d   : > { %6391 = vmatprep.subr.mxu1 %v6699_v16 }
 0xc6e   : > { %6392 = vmatpush3.msra.mxu1 %v6699_v16 }
 0xc6f   : > { %6393 = vmatprep.subr.mxu1 %v6700_v31 }
 0xc70   : > { %6394 = vmatpush3.msra.mxu1 %v6700_v31 }
 0xc71   : > { %6395 = vmatprep.subr.mxu1 %v6701_v56 }
 0xc72   : > { %6396 = vmatpush3.msra.mxu1 %v6701_v56 }
 0xc73   : > { %6411 = vmatprep.subr.mxu1 %v6702_v19 }
 0xd2b   : > { %v4813_v6 = vpop.f32.mrf.mxu1 }
 0xd2c   : > { %v4814_v35 = vadd.f32 %v6703_v33, %v4813_v6 }
 0xd2d   : > { %v6376_v32 = vpop.f32.mrf.mxu1 }
 0xd2e   : > { %v4820_v14 = vmax.f32 %v4814_v35, 0.0 }
 0xd2f   : > { %v4816_v8 = vpop.f32.mrf.mxu1 }
 0xd30   : > { %v4817_v7 = vadd.f32 %v6703_v33, %v4816_v8  ;;  %6397 = vmatprep.mubr.msk.f32.mxu1 %vm1430_vm2, %v4820_v14  ;;  %6430 = vmatprep.mubr.msk.f32.mxu0 %vm1430_vm2, %v4820_v14 }
 0xd31   : > { %v6377_v13 = vpop.f32.mrf.mxu1 }
 0xd32   : > { %v4821_v48 = vmax.f32 %v4817_v7, 0.0 }
 0xd34   : > { %6398 = vmatmul.mubr.msk.f32.vlgmr.msra.gmra.mxu1 %vm1430_vm2, %v4821_v48  ;;  %6431 = vmatmul.mubr.msk.f32.vlgmr.msra.gmra.mxu0 %vm1430_vm2, %v4821_v48 }
 0xd35   : > { %6412 = vmatpush3.msra.mxu1 %v6702_v19  ;;  %6419 = vmatprep.mubr.msk.f32.mxu1 %vm1430_vm2, %v4820_v14 }
 0xd36   : > { %6413 = vmatprep.subr.mxu1 %v6704_v50  ;;  %6446 = vmatprep.mubr.msk.bf16.mxu0 %vm6777_vm3, %v9053_v20  ;;  %v6708_v20 = vld [vmem:[%s8740_s20 + $0x10] sm:$0xff] }
 0xd37   : > { %6414 = vmatpush3.msra.mxu1 %v6704_v50 }
 0xd38   : > { %6415 = vmatprep.subr.mxu1 %v6705_v26 }
 0xd39   : > { %6416 = vmatpush3.msra.mxu1 %v6705_v26 }
 0xd3a   : > { %6417 = vmatprep.subr.mxu1 %v6706_v47 }
 0xd3b   : > { %6418 = vmatpush3.msra.mxu1 %v6706_v47  ;;  %v5326_v47 = vld [vmem:[%s866_s27] sm:$0x3] }
 0xd3c   : > { %6420 = vmatmul.mubr.msk.f32.vlgmr.msra.gmra.mxu1 %vm1430_vm2, %v4821_v48  ;;  %6433 = vmatprep.subr.mxu1 %v6707_v28 }
 0xd3d   : > { %6434 = vmatpush3.msra.mxu1 %v6707_v28  ;;  %6441 = vmatprep.mubr.msk.f32.mxu1 %vm1430_vm2, %v8361_v37 }
 0xd3e   : > { %6435 = vmatprep.subr.mxu1 %v6708_v20 }
 0xd3f   : > { %6436 = vmatpush3.msra.mxu1 %v6708_v20 }
 0xd40   : > { %6437 = vmatprep.subr.mxu1 %v6709_v49 }
 0xd41   : > { %6438 = vmatpush3.msra.mxu1 %v6709_v49 }
 0xd42   : > { %6439 = vmatprep.subr.mxu1 %v6710_v29 }
 0xd43   : > { %6440 = vmatpush3.msra.mxu1 %v6710_v29 }
 0xd44   : > { %6442 = vmatmul.mubr.msk.f32.vlgmr.msra.gmra.mxu1 %vm1430_vm2, %v8363_v11 }
 0xdf4   : > { %v6399_v34 = vpop.f32.mrf.mxu1  ;;  %v6432_v2 = vpop.f32.mrf.mxu0 }
 0xdf5   : > { %v4981_v5 = vadd.f32 %v6399_v34, %v6388_v45  ;;  %v5234_v62 = vadd.f32 %v6712_v36, %v6432_v2 }
 0xdf6   : > { %v4975_v15 = vpop.f32.mrf.mxu1  ;;  %v5228_v41 = vpop.f32.mrf.mxu0 }
 0xdf7   : > { %v4985_v54 = vadd.f32 %v4981_v5, %v9170_v1  ;;  %v4976_v23 = vadd.f32 %v4975_v15, %v4894_v12  ;;  %v5229_v52 = vadd.f32 %v6712_v36, %v5228_v41 }
 0xdf9   : > { %v5696_v39 = vmul.f32 -1.442695, %v4985_v54  ;;  %v4984_v17 = vadd.f32 %v4976_v23, %v9170_v1 }
 0xdfb   : > { %6599 = vpow2.f32 %v5696_v39  ;;  %v5695_v24 = vmul.f32 -1.442695, %v4984_v17 }
 0xdfc   : > { %v6421_v10 = vpop.f32.mrf.mxu1 }
 0xdfd   : > { %6601 = vpow2.f32 %v5695_v24  ;;  %v5145_v57 = vadd.f32 %v6421_v10, %v6410_v18 }
 0xdfe   : > { %v5139_v38 = vpop.f32.mrf.mxu1 }
 0xdff   : > { %v5149_v43 = vadd.f32 %v5145_v57, %v9171_v61  ;;  %v5140_v3 = vadd.f32 %v5139_v38, %v5064_v21 }
 0xe01   : > { %v5702_v46 = vmul.f32 -1.442695, %v5149_v43  ;;  %v5148_v59 = vadd.f32 %v5140_v3, %v9171_v61  ;;  %v6711_v61 = vld [vmem:[%s8743_s23] ss:$0 sm:$0xff] }
 0xe03   : > { %v5701_v55 = vmul.f32 -1.442695, %v5148_v59  ;;  %6603 = vpow2.f32 %v5702_v46 }
 0xe04   : > { %v6443_v42 = vpop.f32.mrf.mxu1 }
 0xe05   : > { %6605 = vpow2.f32 %v5701_v55  ;;  %v5309_v0 = vadd.f32 %v6711_v61, %v6443_v42 }
 0xe06   : > { %v5303_v30 = vpop.f32.mrf.mxu1 }
 0xe07   : > { %v5304_v60 = vadd.f32 %v6711_v61, %v5303_v30 }
 0xe08   : > { %v6600_v58 = vpop.eup %6599 }
 0xe09   : > { %v4993_v44 = vadd.f32 1.0, %v6600_v58 }
 0xe0a   : > { %v6602_v1 = vpop.eup %6601 }
 0xe0b   : > { %6607 = vrcp.f32 %v4993_v44  ;;  %v4992_v53 = vadd.f32 1.0, %v6602_v1 }
 0xe0d   : > { %6609 = vrcp.f32 %v4992_v53 }
 0xe10   : > { %v6604_v51 = vpop.eup %6603 }
 0xe11   : > { %v5157_v25 = vadd.f32 1.0, %v6604_v51 }
 0xe12   : > { %v6606_v27 = vpop.eup %6605 }
 0xe13   : > { %v5156_v4 = vadd.f32 1.0, %v6606_v27  ;;  %6611 = vrcp.f32 %v5157_v25 }
 0xe15   : > { %6613 = vrcp.f32 %v5156_v4 }
 0xe18   : > { %v6608_v22 = vpop.eup %6607 }
 0xe19   : > { %v5313_v63 = vmul.f32 %v6608_v22, %v5309_v0 }
 0xe1a   : > { %v6610_v40 = vpop.eup %6609 }
 0xe1b   : > { %v5315_v9 = vadd.f32 %v5313_v63, %v5234_v62  ;;  %v5312_v16 = vmul.f32 %v6610_v40, %v5304_v60 }
 0xe1d   : > { %6615 = vtanh.f32 %v5315_v9  ;;  %v5314_v31 = vadd.f32 %v5312_v16, %v5229_v52 }
 0xe1f   : > { %6617 = vtanh.f32 %v5314_v31 }
 0xe20   : > { %v6612_v56 = vpop.eup %6611 }
 0xe21   : > { %v5319_v6 = vsub.f32 1.0, %v6612_v56  ;;  %v5323_v13 = vmul.f32 %v6612_v56, %v8363_v11 }
 0xe22   : > { %v6614_v19 = vpop.eup %6613 }
 0xe23   : > { %v5318_v35 = vsub.f32 1.0, %v6614_v19  ;;  %v5322_v7 = vmul.f32 %v6614_v19, %v8361_v37 }
 0xe2a   : > { %v6616_v33 = vpop.eup %6615 }
 0xe2b   : > { %v5321_v32 = vmul.f32 %v6616_v33, %v5319_v6 }
 0xe2c   : > { %v6618_v14 = vpop.eup %6617 }
 0xe2d   : > { %v5320_v8 = vmul.f32 %v6618_v14, %v5318_v35  ;;  %v5325_v50 = vadd.f32 %v5323_v13, %v5321_v32 }
 0xe2f   : > { %v5324_v48 = vadd.f32 %v5322_v7, %v5320_v8 }
 0xe31   : > { %v5327_v26 = vpack.c.bf16 %v5325_v50, %v5324_v48 }
 0xe33   : > { %6445 = vmatpush3.bf16.msra.mxu0 %v5327_v26 }
 0xe36   : > { %6447 = vmatmul.mubr.msk.bf16.vlgmr.msra.gmra.mxu0 %vm1092_vm1, %v5326_v47 }
 0xef6   : > { %v5365_v37 = vpop.f32.mrf.mxu0 }
 0xef7   : > { %5372 = vst.msk [vmem:[%s842_s1] sm:$0xf] %vm5371_vm4, %v5365_v37 }
 0xef8   : > { %v6448_v11 = vpop.f32.mrf.mxu0 }
 0xef9   : > { %6726 = shalt.err (!%p6723_p3)
}
 0xefa   : > { %s6727_s27 = scalar_lea.hbm %s8679_s11, 64  ;;  %s6731_s6 = scalar_lea.hbm %s9259_s2, 128 }
 0xefb   : > { %p6728_p4 = scmp.ne.s32.totalorder %s8679_s11, %s6727_s27  ;;  %p6732_p9 = scmp.lt.s32.totalorder %s8679_s11, %s9259_s2 }
 0xefc   : > { %p6733_p10 = scmp.lt.s32.totalorder %s6731_s6, %s6727_s27 }
 0xefd   : > { %p6729_p7 = pnand %p6728_p4, %p6952_p5 }
 0xefe   : > { %p6734_p11 = por %p6733_p10, %p6732_p9 }
 0xeff   : > { %p6730_p8 = pneg %p6729_p7 }
 0xf01   : > { %p6735_p12 = pnand %p6734_p11, %p6730_p8 }
 0xf03   : > { %6738 = shalt.err (!%p6735_p12)
}
 0xf04   : > { %6450 = dma.vmem_to_hbm [thread:$0]  (%p6952_p5), %s8681_s5, 64, %s8679_s11, %s5374_s0   ;;  %v5368_v28 = vpop.f32.mrf.mxu0 }
 0xf06   : > { %v6449_v20 = vpop.f32.mrf.mxu0 }
 0xf07 PF: > { %s9260_s29 = sld [smem:[#allocation7_spill]] }
 0xf08   : > { %s9261_s7 = sld [smem:[#allocation5_spill]] }
 0xf0d   : > { %p6456_p13 = scmp.ge.s32.totalorder %s9260_s29, 2 }
 0xf0e   : > { %s5399_s30 = sand.u32 1, %s9261_s7  }
 0xf0f   : > { %p6453_p0 = pnand %p6456_p13, %p6956_p6  ;;  %s5400_s4 = scalar_lea.sflag [#allocation3], %s5399_s30 }
 0xf11   : > { %p6454_p1 = pneg %p6453_p0 }
 0xf13   : > { %6756 = dma.done.wait (%p6454_p1), %s5400_s4, 64  }
 0xf14   : > { %6758 = vsyncadd (%p6454_p1), %s5400_s4, 4294967232  ;;  %s9263_s28 = sld [smem:[#allocation9_spill]]  ;;  %s9266_s27 = smov %s6765_s3 }
 0xf15   : > { %s9264_s26 = sld [smem:[#allocation6_spill]] }
 0xf16   : > { %s9265_s7 = sld [smem:[#allocation10_spill]] }
 0xf1a   : > { %p36_p5 = scmp.ge.s32.totalorder %s9263_s28, 4  }
 0xf1b   : > { %s9267_s3 = smov %s9264_s26 }
 0xf1c   :  { %38 = sbr.rel (!%p36_p5) target bundleno = 17 (0x11), region = 171 }
 0xf21   :  { %5405 = vsyncpa [#allocation3], 1 }
 0xf22   :  { %5407 = vsyncpa [#allocation3 + $0x1], 1 }

</bundles_post_ra>
